<compile_context>
chip_gen: v7x
topology: tpu7x:2x2x1
jax: 0.10.0
libtpu: 0.0.40
codegen_flags: <defaults>
</compile_context>

<pallas_src>
import functools

import jax
import jax.numpy as jnp
from jax import lax
from jax.experimental import pallas as pl
from jax.experimental.pallas import tpu as pltpu

D_IN = 100          # encoder input / decoder output features (PyTorch sizes)
D_HID = 1000        # encoder output / decoder input features
K_TOP = 25          # activations kept per row

D_IN_PAD = 128      # lane-aligned padded feature dims
D_HID_PAD = 1024

SUB_ROWS = 8                 # rows per register-resident sub-tile (8 f32 vregs)
PAIR_ROWS = 2 * SUB_ROWS     # two interleaved sub-tiles per inner iteration

_NEG_PAD = -1.0e30           # bias for padded hidden lanes: never reaches top-25
_KNOCK = -float("inf")       # value used to knock out the current max


def _round_up(n, m):
    return ((n + m - 1) // m) * m


def glove2k_kernel(x_ref, w_enc_ref, b_enc_ref, w_dec_ref, b_dec_ref, o_ref,
                   h_ref, *, knockout_bf16=False):
    # ---- encoder matmul (MXU), f32 accumulation; result lives in VMEM scratch.
    h_ref[...] = (jnp.dot(x_ref[...], w_enc_ref[...],
                          preferred_element_type=jnp.float32)
                  + b_enc_ref[...])            # (TB, 1024); padded lanes ~ -1e30

    work_dtype = jnp.bfloat16 if knockout_bf16 else jnp.float32
    knock = jnp.asarray(_KNOCK, dtype=work_dtype)

    tb = h_ref.shape[0]                        # static
    n_pairs = tb // PAIR_ROWS                  # static trip count

    # ---- register-blocked, read-only top-25 threshold search + sparsify ----
    # Each fori iteration handles two independent 8-row sub-tiles so the XLU
    # reduce of one can overlap the VPU compare/select of the other.  The 24
    # knock-out steps are unrolled; nothing is stored until the final
    # sparsified sub-tile is written back in place.
    def body(p, carry):
        s0 = pl.multiple_of(p * PAIR_ROWS, PAIR_ROWS)
        s1 = pl.multiple_of(s0 + SUB_ROWS, SUB_ROWS)

        h0 = h_ref[pl.ds(s0, SUB_ROWS), :]     # (8, 1024) f32, 8 vregs
        h1 = h_ref[pl.ds(s1, SUB_ROWS), :]
        w0 = h0.astype(work_dtype)             # no-op in the f32 path
        w1 = h1.astype(work_dtype)

        m0 = jnp.max(w0, axis=-1, keepdims=True)     # 1st largest per row
        m1 = jnp.max(w1, axis=-1, keepdims=True)
        for _ in range(K_TOP - 1):                   # after 24 steps: 25th largest
            m0 = jnp.max(jnp.where(w0 < m0, w0, knock), axis=-1, keepdims=True)
            m1 = jnp.max(jnp.where(w1 < m1, w1, knock), axis=-1, keepdims=True)

        # Keep top-25 (ties of the threshold survive), zero the rest.  Original
        # f32 values are preserved; in the bf16 path the *decision* is bf16.
        h_ref[pl.ds(s0, SUB_ROWS), :] = jnp.where(w0 >= m0, h0, 0.0)
        h_ref[pl.ds(s1, SUB_ROWS), :] = jnp.where(w1 >= m1, h1, 0.0)
        return carry

    lax.fori_loop(0, n_pairs, body, 0)

    # ---- decoder matmul (MXU) ----
    y = jnp.dot(h_ref[...], w_dec_ref[...], preferred_element_type=jnp.float32)
    o_ref[...] = (y + b_dec_ref[...]).astype(o_ref.dtype)


def glove2k_sparse(x, w_enc, b_enc, w_dec, b_dec, *, block_b=128,
                   knockout_bf16=False):
    """Forward pass of Glove2kSparse.

    x:     (B, 100) f32
    w_enc: (100, 1000)  (in, out) layout == PyTorch encoder.weight.T
    b_enc: (1000,) or (1, 1000)
    w_dec: (1000, 100)
    b_dec: (100,) or (1, 100)
    """
    B = x.shape[0]

    # ---- host-side padding to lane-aligned shapes (done once in real use) ----
    w_enc_p = jnp.zeros((D_IN_PAD, D_HID_PAD), jnp.float32)
    w_enc_p = w_enc_p.at[:D_IN, :D_HID].set(w_enc.astype(jnp.float32))
    b_enc_p = jnp.full((1, D_HID_PAD), _NEG_PAD, jnp.float32)
    b_enc_p = b_enc_p.at[:, :D_HID].set(
        jnp.reshape(b_enc, (1, D_HID)).astype(jnp.float32))
    w_dec_p = jnp.zeros((D_HID_PAD, D_IN_PAD), jnp.float32)
    w_dec_p = w_dec_p.at[:D_HID, :D_IN].set(w_dec.astype(jnp.float32))
    b_dec_p = jnp.zeros((1, D_IN_PAD), jnp.float32)
    b_dec_p = b_dec_p.at[:, :D_IN].set(
        jnp.reshape(b_dec, (1, D_IN)).astype(jnp.float32))

    # ---- batch tiling: multiple of PAIR_ROWS, >=2 grid tiles when B > 16 so
    #      both v7x TensorCores get work (dimension_semantics=("parallel",)). ----
    half = _round_up(-(-B // 2), PAIR_ROWS)
    TB = _round_up(min(block_b, max(PAIR_ROWS, half)), PAIR_ROWS)
    B_pad = _round_up(B, TB)
    x_p = jnp.zeros((B_pad, D_IN_PAD), jnp.float32)
    x_p = x_p.at[:B, :D_IN].set(x.astype(jnp.float32))

    grid = (B_pad // TB,)

    cost = pl.CostEstimate(
        flops=2 * B_pad * (D_IN_PAD * D_HID_PAD + D_HID_PAD * D_IN_PAD),
        transcendentals=0,
        bytes_accessed=(2 * B_pad * D_IN_PAD * 4                 # x + out
                        + 2 * D_IN_PAD * D_HID_PAD * 4           # weights
                        + (D_HID_PAD + D_IN_PAD) * 4))           # biases

    kernel = functools.partial(glove2k_kernel, knockout_bf16=knockout_bf16)

    out = pl.pallas_call(
        kernel,
        out_shape=jax.ShapeDtypeStruct((B_pad, D_IN_PAD), jnp.float32),
        grid=grid,
        in_specs=[
            pl.BlockSpec((TB, D_IN_PAD), lambda i: (i, 0)),         # x tile
            pl.BlockSpec((D_IN_PAD, D_HID_PAD), lambda i: (0, 0)),  # w_enc (grid-invariant)
            pl.BlockSpec((1, D_HID_PAD), lambda i: (0, 0)),         # b_enc
            pl.BlockSpec((D_HID_PAD, D_IN_PAD), lambda i: (0, 0)),  # w_dec
            pl.BlockSpec((1, D_IN_PAD), lambda i: (0, 0)),          # b_dec
        ],
        out_specs=pl.BlockSpec((TB, D_IN_PAD), lambda i: (i, 0)),
        scratch_shapes=[pltpu.VMEM((TB, D_HID_PAD), jnp.float32)],  # h / h_sparse
        compiler_params=pltpu.CompilerParams(
            dimension_semantics=("parallel",)),
        cost_estimate=cost,
    )(x_p, w_enc_p, b_enc_p, w_dec_p, b_dec_p)

    return out[:B, :D_IN]


def ref_forward(x, w_enc, b_enc, w_dec, b_dec):
    """Pure-JAX f32 reference of the same per-row top-25-keep semantics."""
    h = jnp.dot(x, w_enc, precision=lax.Precision.HIGHEST) + jnp.reshape(
        b_enc, (1, -1))
    thresh = lax.top_k(h, K_TOP)[0][:, -1:]
    h = jnp.where(h >= thresh, h, 0.0)
    return jnp.dot(h, w_dec, precision=lax.Precision.HIGHEST) + jnp.reshape(
        b_dec, (1, -1))


if __name__ == "__main__":
    key = jax.random.PRNGKey(0)
    kx, kx2, k1, k2, k3, k4 = jax.random.split(key, 6)

    B = 2
    x = jax.random.normal(kx, (B, D_IN), dtype=jnp.float32)

    # PyTorch-style Linear init: U(-1/sqrt(fan_in), 1/sqrt(fan_in)).
    bound_e = 1.0 / (D_IN ** 0.5)
    w_enc = jax.random.uniform(k1, (D_IN, D_HID), jnp.float32, -bound_e, bound_e)
    b_enc = jax.random.uniform(k2, (D_HID,), jnp.float32, -bound_e, bound_e)
    bound_d = 1.0 / (D_HID ** 0.5)
    w_dec = jax.random.uniform(k3, (D_HID, D_IN), jnp.float32, -bound_d, bound_d)
    b_dec = jax.random.uniform(k4, (D_IN,), jnp.float32, -bound_d, bound_d)

    # --- exact f32 path vs pure-JAX reference (small batch) ---
    out = jax.block_until_ready(glove2k_sparse(x, w_enc, b_enc, w_dec, b_dec))
    ref = ref_forward(x, w_enc, b_enc, w_dec, b_dec)
    assert out.shape == (B, D_IN), out.shape
    assert jnp.allclose(out, ref, atol=2e-3, rtol=2e-3), "mismatch vs reference"

    # --- multi-tile grid + batch padding: vs reference and tiling-invariant ---
    B2 = 300
    x2 = jax.random.normal(kx2, (B2, D_IN), dtype=jnp.float32)
    ref2 = ref_forward(x2, w_enc, b_enc, w_dec, b_dec)
    out_a = jax.block_until_ready(
        glove2k_sparse(x2, w_enc, b_enc, w_dec, b_dec, block_b=128))   # 3 tiles
    out_b = jax.block_until_ready(
        glove2k_sparse(x2, w_enc, b_enc, w_dec, b_dec, block_b=512))   # 2 tiles
    assert out_a.shape == (B2, D_IN)
    assert jnp.allclose(out_a, ref2, atol=2e-3, rtol=2e-3), "mismatch vs reference"
    assert jnp.allclose(out_a, out_b, atol=1e-5, rtol=1e-5), "tiling mismatch"

    # --- optional bf16 knock-out path (v6e/v7x bf16 VPU): smoke test ---
    out_bf = jax.block_until_ready(
        glove2k_sparse(x, w_enc, b_enc, w_dec, b_dec, knockout_bf16=True))
    assert out_bf.shape == (B, D_IN)
    assert bool(jnp.all(jnp.isfinite(out_bf)))

    print("KERNEL_OK")
</pallas_src>

<mosaic_0001>
module attributes {stable_mosaic.version = 11 : i64} {
  func.func @glove2k_kernel(%arg0: i32, %arg1: memref<16x128xf32, #tpu.memory_space<vmem>>, %arg2: memref<128x1024xf32, #tpu.memory_space<vmem>>, %arg3: memref<1x1024xf32, #tpu.memory_space<vmem>>, %arg4: memref<1024x128xf32, #tpu.memory_space<vmem>>, %arg5: memref<1x128xf32, #tpu.memory_space<vmem>>, %arg6: memref<16x128xf32, #tpu.memory_space<vmem>>, %arg7: memref<16x1024xf32, #tpu.memory_space<vmem>>) attributes {dimension_semantics = [#tpu.dimension_semantics<parallel>], iteration_bounds = array<i64: 1>, scalar_prefetch = 0 : i64, scratch_operands = 1 : i64, tpu.core_type = #tpu.core_type<tc>, window_params = [{transform_indices = @transform_0, window_bounds = array<i64: 16, 128>}, {pipeline_mode = #tpu.pipeline_mode<synchronous>, transform_indices = @transform_1, window_bounds = array<i64: 128, 1024>}, {pipeline_mode = #tpu.pipeline_mode<synchronous>, transform_indices = @transform_2, window_bounds = array<i64: 1, 1024>}, {pipeline_mode = #tpu.pipeline_mode<synchronous>, transform_indices = @transform_3, window_bounds = array<i64: 1024, 128>}, {pipeline_mode = #tpu.pipeline_mode<synchronous>, transform_indices = @transform_4, window_bounds = array<i64: 1, 128>}, {transform_indices = @transform_5, window_bounds = array<i64: 16, 128>}]} {
    %c0 = arith.constant 0 : index
    %c0_0 = arith.constant 0 : index
    %0 = vector.load %arg1[%c0, %c0_0] : memref<16x128xf32, #tpu.memory_space<vmem>>, vector<16x128xf32>
    %c0_1 = arith.constant 0 : index
    %c0_2 = arith.constant 0 : index
    %1 = vector.load %arg2[%c0_1, %c0_2] : memref<128x1024xf32, #tpu.memory_space<vmem>>, vector<128x1024xf32>
    %cst = arith.constant dense<0.000000e+00> : vector<16x1024xf32>
    %2 = tpu.matmul %0, %1, %cst {dimension_numbers = #tpu.dot_dimension_numbers<[1], [0], [0], [1], [0, 0, 1, 1], [], []>} : vector<16x128xf32>, vector<128x1024xf32>, vector<16x1024xf32> -> vector<16x1024xf32>
    %c0_3 = arith.constant 0 : index
    %c0_4 = arith.constant 0 : index
    %3 = vector.load %arg3[%c0_3, %c0_4] : memref<1x1024xf32, #tpu.memory_space<vmem>>, vector<1x1024xf32>
    %4 = vector.broadcast %3 : vector<1x1024xf32> to vector<16x1024xf32>
    %5 = arith.addf %2, %4 : vector<16x1024xf32>
    %c0_5 = arith.constant 0 : index
    %c0_6 = arith.constant 0 : index
    %6 = vector.load %arg7[%c0_5, %c0_6] : memref<16x1024xf32, #tpu.memory_space<vmem>>, vector<16x1024xf32>
    tpu.vector_store %arg7[%c0_5, %c0_6], %5 {strides = array<i32>} : memref<16x1024xf32, #tpu.memory_space<vmem>>, vector<16x1024xf32>,
    %cst_7 = arith.constant 0xFF800000 : f32
    %c0_i32 = arith.constant 0 : i32
    %c16_i32 = arith.constant 16 : i32
    %7 = arith.muli %c0_i32, %c16_i32 : i32
    %8 = tpu.assume_multiple %7, 16 : i32
    %c8_i32 = arith.constant 8 : i32
    %9 = arith.addi %8, %c8_i32 : i32
    %10 = tpu.assume_multiple %9, 8 : i32
    %11 = arith.index_cast %8 : i32 to index
    %c0_8 = arith.constant 0 : index
    %12 = vector.load %arg7[%11, %c0_8] : memref<16x1024xf32, #tpu.memory_space<vmem>>, vector<8x1024xf32>
    %13 = arith.index_cast %10 : i32 to index
    %c0_9 = arith.constant 0 : index
    %14 = vector.load %arg7[%13, %c0_9] : memref<16x1024xf32, #tpu.memory_space<vmem>>, vector<8x1024xf32>
    %cst_10 = arith.constant dense<0xFF800000> : vector<8xf32>
    %15 = vector.multi_reduction <maximumf>, %12, %cst_10 [1] : vector<8x1024xf32> to vector<8xf32>
    %16 = vector.shape_cast %15 : vector<8xf32> to vector<8x1xf32>
    %cst_11 = arith.constant dense<0xFF800000> : vector<8xf32>
    %17 = vector.multi_reduction <maximumf>, %14, %cst_11 [1] : vector<8x1024xf32> to vector<8xf32>
    %18 = vector.shape_cast %17 : vector<8xf32> to vector<8x1xf32>
    %19 = vector.broadcast %16 : vector<8x1xf32> to vector<8x1024xf32>
    %20 = arith.cmpf olt, %12, %19 : vector<8x1024xf32>
    %21 = vector.broadcast %cst_7 : f32 to vector<8x1024xf32>
    %22 = arith.select %20, %12, %21 : vector<8x1024xi1>, vector<8x1024xf32>
    %cst_12 = arith.constant dense<0xFF800000> : vector<8xf32>
    %23 = vector.multi_reduction <maximumf>, %22, %cst_12 [1] : vector<8x1024xf32> to vector<8xf32>
    %24 = vector.shape_cast %23 : vector<8xf32> to vector<8x1xf32>
    %25 = vector.broadcast %18 : vector<8x1xf32> to vector<8x1024xf32>
    %26 = arith.cmpf olt, %14, %25 : vector<8x1024xf32>
    %27 = vector.broadcast %cst_7 : f32 to vector<8x1024xf32>
    %28 = arith.select %26, %14, %27 : vector<8x1024xi1>, vector<8x1024xf32>
    %cst_13 = arith.constant dense<0xFF800000> : vector<8xf32>
    %29 = vector.multi_reduction <maximumf>, %28, %cst_13 [1] : vector<8x1024xf32> to vector<8xf32>
    %30 = vector.shape_cast %29 : vector<8xf32> to vector<8x1xf32>
    %31 = vector.broadcast %24 : vector<8x1xf32> to vector<8x1024xf32>
    %32 = arith.cmpf olt, %12, %31 : vector<8x1024xf32>
    %33 = vector.broadcast %cst_7 : f32 to vector<8x1024xf32>
    %34 = arith.select %32, %12, %33 : vector<8x1024xi1>, vector<8x1024xf32>
    %cst_14 = arith.constant dense<0xFF800000> : vector<8xf32>
    %35 = vector.multi_reduction <maximumf>, %34, %cst_14 [1] : vector<8x1024xf32> to vector<8xf32>
    %36 = vector.shape_cast %35 : vector<8xf32> to vector<8x1xf32>
    %37 = vector.broadcast %30 : vector<8x1xf32> to vector<8x1024xf32>
    %38 = arith.cmpf olt, %14, %37 : vector<8x1024xf32>
    %39 = vector.broadcast %cst_7 : f32 to vector<8x1024xf32>
    %40 = arith.select %38, %14, %39 : vector<8x1024xi1>, vector<8x1024xf32>
    %cst_15 = arith.constant dense<0xFF800000> : vector<8xf32>
    %41 = vector.multi_reduction <maximumf>, %40, %cst_15 [1] : vector<8x1024xf32> to vector<8xf32>
    %42 = vector.shape_cast %41 : vector<8xf32> to vector<8x1xf32>
    %43 = vector.broadcast %36 : vector<8x1xf32> to vector<8x1024xf32>
    %44 = arith.cmpf olt, %12, %43 : vector<8x1024xf32>
    %45 = vector.broadcast %cst_7 : f32 to vector<8x1024xf32>
    %46 = arith.select %44, %12, %45 : vector<8x1024xi1>, vector<8x1024xf32>
    %cst_16 = arith.constant dense<0xFF800000> : vector<8xf32>
    %47 = vector.multi_reduction <maximumf>, %46, %cst_16 [1] : vector<8x1024xf32> to vector<8xf32>
    %48 = vector.shape_cast %47 : vector<8xf32> to vector<8x1xf32>
    %49 = vector.broadcast %42 : vector<8x1xf32> to vector<8x1024xf32>
    %50 = arith.cmpf olt, %14, %49 : vector<8x1024xf32>
    %51 = vector.broadcast %cst_7 : f32 to vector<8x1024xf32>
    %52 = arith.select %50, %14, %51 : vector<8x1024xi1>, vector<8x1024xf32>
    %cst_17 = arith.constant dense<0xFF800000> : vector<8xf32>
    %53 = vector.multi_reduction <maximumf>, %52, %cst_17 [1] : vector<8x1024xf32> to vector<8xf32>
    %54 = vector.shape_cast %53 : vector<8xf32> to vector<8x1xf32>
    %55 = vector.broadcast %48 : vector<8x1xf32> to vector<8x1024xf32>
    %56 = arith.cmpf olt, %12, %55 : vector<8x1024xf32>
    %57 = vector.broadcast %cst_7 : f32 to vector<8x1024xf32>
    %58 = arith.select %56, %12, %57 : vector<8x1024xi1>, vector<8x1024xf32>
    %cst_18 = arith.constant dense<0xFF800000> : vector<8xf32>
    %59 = vector.multi_reduction <maximumf>, %58, %cst_18 [1] : vector<8x1024xf32> to vector<8xf32>
    %60 = vector.shape_cast %59 : vector<8xf32> to vector<8x1xf32>
    %61 = vector.broadcast %54 : vector<8x1xf32> to vector<8x1024xf32>
    %62 = arith.cmpf olt, %14, %61 : vector<8x1024xf32>
    %63 = vector.broadcast %cst_7 : f32 to vector<8x1024xf32>
    %64 = arith.select %62, %14, %63 : vector<8x1024xi1>, vector<8x1024xf32>
    %cst_19 = arith.constant dense<0xFF800000> : vector<8xf32>
    %65 = vector.multi_reduction <maximumf>, %64, %cst_19 [1] : vector<8x1024xf32> to vector<8xf32>
    %66 = vector.shape_cast %65 : vector<8xf32> to vector<8x1xf32>
    %67 = vector.broadcast %60 : vector<8x1xf32> to vector<8x1024xf32>
    %68 = arith.cmpf olt, %12, %67 : vector<8x1024xf32>
    %69 = vector.broadcast %cst_7 : f32 to vector<8x1024xf32>
    %70 = arith.select %68, %12, %69 : vector<8x1024xi1>, vector<8x1024xf32>
    %cst_20 = arith.constant dense<0xFF800000> : vector<8xf32>
    %71 = vector.multi_reduction <maximumf>, %70, %cst_20 [1] : vector<8x1024xf32> to vector<8xf32>
    %72 = vector.shape_cast %71 : vector<8xf32> to vector<8x1xf32>
    %73 = vector.broadcast %66 : vector<8x1xf32> to vector<8x1024xf32>
    %74 = arith.cmpf olt, %14, %73 : vector<8x1024xf32>
    %75 = vector.broadcast %cst_7 : f32 to vector<8x1024xf32>
    %76 = arith.select %74, %14, %75 : vector<8x1024xi1>, vector<8x1024xf32>
    %cst_21 = arith.constant dense<0xFF800000> : vector<8xf32>
    %77 = vector.multi_reduction <maximumf>, %76, %cst_21 [1] : vector<8x1024xf32> to vector<8xf32>
    %78 = vector.shape_cast %77 : vector<8xf32> to vector<8x1xf32>
    %79 = vector.broadcast %72 : vector<8x1xf32> to vector<8x1024xf32>
    %80 = arith.cmpf olt, %12, %79 : vector<8x1024xf32>
    %81 = vector.broadcast %cst_7 : f32 to vector<8x1024xf32>
    %82 = arith.select %80, %12, %81 : vector<8x1024xi1>, vector<8x1024xf32>
    %cst_22 = arith.constant dense<0xFF800000> : vector<8xf32>
    %83 = vector.multi_reduction <maximumf>, %82, %cst_22 [1] : vector<8x1024xf32> to vector<8xf32>
    %84 = vector.shape_cast %83 : vector<8xf32> to vector<8x1xf32>
    %85 = vector.broadcast %78 : vector<8x1xf32> to vector<8x1024xf32>
    %86 = arith.cmpf olt, %14, %85 : vector<8x1024xf32>
    %87 = vector.broadcast %cst_7 : f32 to vector<8x1024xf32>
    %88 = arith.select %86, %14, %87 : vector<8x1024xi1>, vector<8x1024xf32>
    %cst_23 = arith.constant dense<0xFF800000> : vector<8xf32>
    %89 = vector.multi_reduction <maximumf>, %88, %cst_23 [1] : vector<8x1024xf32> to vector<8xf32>
    %90 = vector.shape_cast %89 : vector<8xf32> to vector<8x1xf32>
    %91 = vector.broadcast %84 : vector<8x1xf32> to vector<8x1024xf32>
    %92 = arith.cmpf olt, %12, %91 : vector<8x1024xf32>
    %93 = vector.broadcast %cst_7 : f32 to vector<8x1024xf32>
    %94 = arith.select %92, %12, %93 : vector<8x1024xi1>, vector<8x1024xf32>
    %cst_24 = arith.constant dense<0xFF800000> : vector<8xf32>
    %95 = vector.multi_reduction <maximumf>, %94, %cst_24 [1] : vector<8x1024xf32> to vector<8xf32>
    %96 = vector.shape_cast %95 : vector<8xf32> to vector<8x1xf32>
    %97 = vector.broadcast %90 : vector<8x1xf32> to vector<8x1024xf32>
    %98 = arith.cmpf olt, %14, %97 : vector<8x1024xf32>
    %99 = vector.broadcast %cst_7 : f32 to vector<8x1024xf32>
    %100 = arith.select %98, %14, %99 : vector<8x1024xi1>, vector<8x1024xf32>
    %cst_25 = arith.constant dense<0xFF800000> : vector<8xf32>
    %101 = vector.multi_reduction <maximumf>, %100, %cst_25 [1] : vector<8x1024xf32> to vector<8xf32>
    %102 = vector.shape_cast %101 : vector<8xf32> to vector<8x1xf32>
    %103 = vector.broadcast %96 : vector<8x1xf32> to vector<8x1024xf32>
    %104 = arith.cmpf olt, %12, %103 : vector<8x1024xf32>
    %105 = vector.broadcast %cst_7 : f32 to vector<8x1024xf32>
    %106 = arith.select %104, %12, %105 : vector<8x1024xi1>, vector<8x1024xf32>
    %cst_26 = arith.constant dense<0xFF800000> : vector<8xf32>
    %107 = vector.multi_reduction <maximumf>, %106, %cst_26 [1] : vector<8x1024xf32> to vector<8xf32>
    %108 = vector.shape_cast %107 : vector<8xf32> to vector<8x1xf32>
    %109 = vector.broadcast %102 : vector<8x1xf32> to vector<8x1024xf32>
    %110 = arith.cmpf olt, %14, %109 : vector<8x1024xf32>
    %111 = vector.broadcast %cst_7 : f32 to vector<8x1024xf32>
    %112 = arith.select %110, %14, %111 : vector<8x1024xi1>, vector<8x1024xf32>
    %cst_27 = arith.constant dense<0xFF800000> : vector<8xf32>
    %113 = vector.multi_reduction <maximumf>, %112, %cst_27 [1] : vector<8x1024xf32> to vector<8xf32>
    %114 = vector.shape_cast %113 : vector<8xf32> to vector<8x1xf32>
    %115 = vector.broadcast %108 : vector<8x1xf32> to vector<8x1024xf32>
    %116 = arith.cmpf olt, %12, %115 : vector<8x1024xf32>
    %117 = vector.broadcast %cst_7 : f32 to vector<8x1024xf32>
    %118 = arith.select %116, %12, %117 : vector<8x1024xi1>, vector<8x1024xf32>
    %cst_28 = arith.constant dense<0xFF800000> : vector<8xf32>
    %119 = vector.multi_reduction <maximumf>, %118, %cst_28 [1] : vector<8x1024xf32> to vector<8xf32>
    %120 = vector.shape_cast %119 : vector<8xf32> to vector<8x1xf32>
    %121 = vector.broadcast %114 : vector<8x1xf32> to vector<8x1024xf32>
    %122 = arith.cmpf olt, %14, %121 : vector<8x1024xf32>
    %123 = vector.broadcast %cst_7 : f32 to vector<8x1024xf32>
    %124 = arith.select %122, %14, %123 : vector<8x1024xi1>, vector<8x1024xf32>
    %cst_29 = arith.constant dense<0xFF800000> : vector<8xf32>
    %125 = vector.multi_reduction <maximumf>, %124, %cst_29 [1] : vector<8x1024xf32> to vector<8xf32>
    %126 = vector.shape_cast %125 : vector<8xf32> to vector<8x1xf32>
    %127 = vector.broadcast %120 : vector<8x1xf32> to vector<8x1024xf32>
    %128 = arith.cmpf olt, %12, %127 : vector<8x1024xf32>
    %129 = vector.broadcast %cst_7 : f32 to vector<8x1024xf32>
    %130 = arith.select %128, %12, %129 : vector<8x1024xi1>, vector<8x1024xf32>
    %cst_30 = arith.constant dense<0xFF800000> : vector<8xf32>
    %131 = vector.multi_reduction <maximumf>, %130, %cst_30 [1] : vector<8x1024xf32> to vector<8xf32>
    %132 = vector.shape_cast %131 : vector<8xf32> to vector<8x1xf32>
    %133 = vector.broadcast %126 : vector<8x1xf32> to vector<8x1024xf32>
    %134 = arith.cmpf olt, %14, %133 : vector<8x1024xf32>
    %135 = vector.broadcast %cst_7 : f32 to vector<8x1024xf32>
    %136 = arith.select %134, %14, %135 : vector<8x1024xi1>, vector<8x1024xf32>
    %cst_31 = arith.constant dense<0xFF800000> : vector<8xf32>
    %137 = vector.multi_reduction <maximumf>, %136, %cst_31 [1] : vector<8x1024xf32> to vector<8xf32>
    %138 = vector.shape_cast %137 : vector<8xf32> to vector<8x1xf32>
    %139 = vector.broadcast %132 : vector<8x1xf32> to vector<8x1024xf32>
    %140 = arith.cmpf olt, %12, %139 : vector<8x1024xf32>
    %141 = vector.broadcast %cst_7 : f32 to vector<8x1024xf32>
    %142 = arith.select %140, %12, %141 : vector<8x1024xi1>, vector<8x1024xf32>
    %cst_32 = arith.constant dense<0xFF800000> : vector<8xf32>
    %143 = vector.multi_reduction <maximumf>, %142, %cst_32 [1] : vector<8x1024xf32> to vector<8xf32>
    %144 = vector.shape_cast %143 : vector<8xf32> to vector<8x1xf32>
    %145 = vector.broadcast %138 : vector<8x1xf32> to vector<8x1024xf32>
    %146 = arith.cmpf olt, %14, %145 : vector<8x1024xf32>
    %147 = vector.broadcast %cst_7 : f32 to vector<8x1024xf32>
    %148 = arith.select %146, %14, %147 : vector<8x1024xi1>, vector<8x1024xf32>
    %cst_33 = arith.constant dense<0xFF800000> : vector<8xf32>
    %149 = vector.multi_reduction <maximumf>, %148, %cst_33 [1] : vector<8x1024xf32> to vector<8xf32>
    %150 = vector.shape_cast %149 : vector<8xf32> to vector<8x1xf32>
    %151 = vector.broadcast %144 : vector<8x1xf32> to vector<8x1024xf32>
    %152 = arith.cmpf olt, %12, %151 : vector<8x1024xf32>
    %153 = vector.broadcast %cst_7 : f32 to vector<8x1024xf32>
    %154 = arith.select %152, %12, %153 : vector<8x1024xi1>, vector<8x1024xf32>
    %cst_34 = arith.constant dense<0xFF800000> : vector<8xf32>
    %155 = vector.multi_reduction <maximumf>, %154, %cst_34 [1] : vector<8x1024xf32> to vector<8xf32>
    %156 = vector.shape_cast %155 : vector<8xf32> to vector<8x1xf32>
    %157 = vector.broadcast %150 : vector<8x1xf32> to vector<8x1024xf32>
    %158 = arith.cmpf olt, %14, %157 : vector<8x1024xf32>
    %159 = vector.broadcast %cst_7 : f32 to vector<8x1024xf32>
    %160 = arith.select %158, %14, %159 : vector<8x1024xi1>, vector<8x1024xf32>
    %cst_35 = arith.constant dense<0xFF800000> : vector<8xf32>
    %161 = vector.multi_reduction <maximumf>, %160, %cst_35 [1] : vector<8x1024xf32> to vector<8xf32>
    %162 = vector.shape_cast %161 : vector<8xf32> to vector<8x1xf32>
    %163 = vector.broadcast %156 : vector<8x1xf32> to vector<8x1024xf32>
    %164 = arith.cmpf olt, %12, %163 : vector<8x1024xf32>
    %165 = vector.broadcast %cst_7 : f32 to vector<8x1024xf32>
    %166 = arith.select %164, %12, %165 : vector<8x1024xi1>, vector<8x1024xf32>
    %cst_36 = arith.constant dense<0xFF800000> : vector<8xf32>
    %167 = vector.multi_reduction <maximumf>, %166, %cst_36 [1] : vector<8x1024xf32> to vector<8xf32>
    %168 = vector.shape_cast %167 : vector<8xf32> to vector<8x1xf32>
    %169 = vector.broadcast %162 : vector<8x1xf32> to vector<8x1024xf32>
    %170 = arith.cmpf olt, %14, %169 : vector<8x1024xf32>
    %171 = vector.broadcast %cst_7 : f32 to vector<8x1024xf32>
    %172 = arith.select %170, %14, %171 : vector<8x1024xi1>, vector<8x1024xf32>
    %cst_37 = arith.constant dense<0xFF800000> : vector<8xf32>
    %173 = vector.multi_reduction <maximumf>, %172, %cst_37 [1] : vector<8x1024xf32> to vector<8xf32>
    %174 = vector.shape_cast %173 : vector<8xf32> to vector<8x1xf32>
    %175 = vector.broadcast %168 : vector<8x1xf32> to vector<8x1024xf32>
    %176 = arith.cmpf olt, %12, %175 : vector<8x1024xf32>
    %177 = vector.broadcast %cst_7 : f32 to vector<8x1024xf32>
    %178 = arith.select %176, %12, %177 : vector<8x1024xi1>, vector<8x1024xf32>
    %cst_38 = arith.constant dense<0xFF800000> : vector<8xf32>
    %179 = vector.multi_reduction <maximumf>, %178, %cst_38 [1] : vector<8x1024xf32> to vector<8xf32>
    %180 = vector.shape_cast %179 : vector<8xf32> to vector<8x1xf32>
    %181 = vector.broadcast %174 : vector<8x1xf32> to vector<8x1024xf32>
    %182 = arith.cmpf olt, %14, %181 : vector<8x1024xf32>
    %183 = vector.broadcast %cst_7 : f32 to vector<8x1024xf32>
    %184 = arith.select %182, %14, %183 : vector<8x1024xi1>, vector<8x1024xf32>
    %cst_39 = arith.constant dense<0xFF800000> : vector<8xf32>
    %185 = vector.multi_reduction <maximumf>, %184, %cst_39 [1] : vector<8x1024xf32> to vector<8xf32>
    %186 = vector.shape_cast %185 : vector<8xf32> to vector<8x1xf32>
    %187 = vector.broadcast %180 : vector<8x1xf32> to vector<8x1024xf32>
    %188 = arith.cmpf olt, %12, %187 : vector<8x1024xf32>
    %189 = vector.broadcast %cst_7 : f32 to vector<8x1024xf32>
    %190 = arith.select %188, %12, %189 : vector<8x1024xi1>, vector<8x1024xf32>
    %cst_40 = arith.constant dense<0xFF800000> : vector<8xf32>
    %191 = vector.multi_reduction <maximumf>, %190, %cst_40 [1] : vector<8x1024xf32> to vector<8xf32>
    %192 = vector.shape_cast %191 : vector<8xf32> to vector<8x1xf32>
    %193 = vector.broadcast %186 : vector<8x1xf32> to vector<8x1024xf32>
    %194 = arith.cmpf olt, %14, %193 : vector<8x1024xf32>
    %195 = vector.broadcast %cst_7 : f32 to vector<8x1024xf32>
    %196 = arith.select %194, %14, %195 : vector<8x1024xi1>, vector<8x1024xf32>
    %cst_41 = arith.constant dense<0xFF800000> : vector<8xf32>
    %197 = vector.multi_reduction <maximumf>, %196, %cst_41 [1] : vector<8x1024xf32> to vector<8xf32>
    %198 = vector.shape_cast %197 : vector<8xf32> to vector<8x1xf32>
    %199 = vector.broadcast %192 : vector<8x1xf32> to vector<8x1024xf32>
    %200 = arith.cmpf olt, %12, %199 : vector<8x1024xf32>
    %201 = vector.broadcast %cst_7 : f32 to vector<8x1024xf32>
    %202 = arith.select %200, %12, %201 : vector<8x1024xi1>, vector<8x1024xf32>
    %cst_42 = arith.constant dense<0xFF800000> : vector<8xf32>
    %203 = vector.multi_reduction <maximumf>, %202, %cst_42 [1] : vector<8x1024xf32> to vector<8xf32>
    %204 = vector.shape_cast %203 : vector<8xf32> to vector<8x1xf32>
    %205 = vector.broadcast %198 : vector<8x1xf32> to vector<8x1024xf32>
    %206 = arith.cmpf olt, %14, %205 : vector<8x1024xf32>
    %207 = vector.broadcast %cst_7 : f32 to vector<8x1024xf32>
    %208 = arith.select %206, %14, %207 : vector<8x1024xi1>, vector<8x1024xf32>
    %cst_43 = arith.constant dense<0xFF800000> : vector<8xf32>
    %209 = vector.multi_reduction <maximumf>, %208, %cst_43 [1] : vector<8x1024xf32> to vector<8xf32>
    %210 = vector.shape_cast %209 : vector<8xf32> to vector<8x1xf32>
    %211 = vector.broadcast %204 : vector<8x1xf32> to vector<8x1024xf32>
    %212 = arith.cmpf olt, %12, %211 : vector<8x1024xf32>
    %213 = vector.broadcast %cst_7 : f32 to vector<8x1024xf32>
    %214 = arith.select %212, %12, %213 : vector<8x1024xi1>, vector<8x1024xf32>
    %cst_44 = arith.constant dense<0xFF800000> : vector<8xf32>
    %215 = vector.multi_reduction <maximumf>, %214, %cst_44 [1] : vector<8x1024xf32> to vector<8xf32>
    %216 = vector.shape_cast %215 : vector<8xf32> to vector<8x1xf32>
    %217 = vector.broadcast %210 : vector<8x1xf32> to vector<8x1024xf32>
    %218 = arith.cmpf olt, %14, %217 : vector<8x1024xf32>
    %219 = vector.broadcast %cst_7 : f32 to vector<8x1024xf32>
    %220 = arith.select %218, %14, %219 : vector<8x1024xi1>, vector<8x1024xf32>
    %cst_45 = arith.constant dense<0xFF800000> : vector<8xf32>
    %221 = vector.multi_reduction <maximumf>, %220, %cst_45 [1] : vector<8x1024xf32> to vector<8xf32>
    %222 = vector.shape_cast %221 : vector<8xf32> to vector<8x1xf32>
    %223 = vector.broadcast %216 : vector<8x1xf32> to vector<8x1024xf32>
    %224 = arith.cmpf olt, %12, %223 : vector<8x1024xf32>
    %225 = vector.broadcast %cst_7 : f32 to vector<8x1024xf32>
    %226 = arith.select %224, %12, %225 : vector<8x1024xi1>, vector<8x1024xf32>
    %cst_46 = arith.constant dense<0xFF800000> : vector<8xf32>
    %227 = vector.multi_reduction <maximumf>, %226, %cst_46 [1] : vector<8x1024xf32> to vector<8xf32>
    %228 = vector.shape_cast %227 : vector<8xf32> to vector<8x1xf32>
    %229 = vector.broadcast %222 : vector<8x1xf32> to vector<8x1024xf32>
    %230 = arith.cmpf olt, %14, %229 : vector<8x1024xf32>
    %231 = vector.broadcast %cst_7 : f32 to vector<8x1024xf32>
    %232 = arith.select %230, %14, %231 : vector<8x1024xi1>, vector<8x1024xf32>
    %cst_47 = arith.constant dense<0xFF800000> : vector<8xf32>
    %233 = vector.multi_reduction <maximumf>, %232, %cst_47 [1] : vector<8x1024xf32> to vector<8xf32>
    %234 = vector.shape_cast %233 : vector<8xf32> to vector<8x1xf32>
    %235 = vector.broadcast %228 : vector<8x1xf32> to vector<8x1024xf32>
    %236 = arith.cmpf olt, %12, %235 : vector<8x1024xf32>
    %237 = vector.broadcast %cst_7 : f32 to vector<8x1024xf32>
    %238 = arith.select %236, %12, %237 : vector<8x1024xi1>, vector<8x1024xf32>
    %cst_48 = arith.constant dense<0xFF800000> : vector<8xf32>
    %239 = vector.multi_reduction <maximumf>, %238, %cst_48 [1] : vector<8x1024xf32> to vector<8xf32>
    %240 = vector.shape_cast %239 : vector<8xf32> to vector<8x1xf32>
    %241 = vector.broadcast %234 : vector<8x1xf32> to vector<8x1024xf32>
    %242 = arith.cmpf olt, %14, %241 : vector<8x1024xf32>
    %243 = vector.broadcast %cst_7 : f32 to vector<8x1024xf32>
    %244 = arith.select %242, %14, %243 : vector<8x1024xi1>, vector<8x1024xf32>
    %cst_49 = arith.constant dense<0xFF800000> : vector<8xf32>
    %245 = vector.multi_reduction <maximumf>, %244, %cst_49 [1] : vector<8x1024xf32> to vector<8xf32>
    %246 = vector.shape_cast %245 : vector<8xf32> to vector<8x1xf32>
    %247 = vector.broadcast %240 : vector<8x1xf32> to vector<8x1024xf32>
    %248 = arith.cmpf olt, %12, %247 : vector<8x1024xf32>
    %249 = vector.broadcast %cst_7 : f32 to vector<8x1024xf32>
    %250 = arith.select %248, %12, %249 : vector<8x1024xi1>, vector<8x1024xf32>
    %cst_50 = arith.constant dense<0xFF800000> : vector<8xf32>
    %251 = vector.multi_reduction <maximumf>, %250, %cst_50 [1] : vector<8x1024xf32> to vector<8xf32>
    %252 = vector.shape_cast %251 : vector<8xf32> to vector<8x1xf32>
    %253 = vector.broadcast %246 : vector<8x1xf32> to vector<8x1024xf32>
    %254 = arith.cmpf olt, %14, %253 : vector<8x1024xf32>
    %255 = vector.broadcast %cst_7 : f32 to vector<8x1024xf32>
    %256 = arith.select %254, %14, %255 : vector<8x1024xi1>, vector<8x1024xf32>
    %cst_51 = arith.constant dense<0xFF800000> : vector<8xf32>
    %257 = vector.multi_reduction <maximumf>, %256, %cst_51 [1] : vector<8x1024xf32> to vector<8xf32>
    %258 = vector.shape_cast %257 : vector<8xf32> to vector<8x1xf32>
    %259 = vector.broadcast %252 : vector<8x1xf32> to vector<8x1024xf32>
    %260 = arith.cmpf olt, %12, %259 : vector<8x1024xf32>
    %261 = vector.broadcast %cst_7 : f32 to vector<8x1024xf32>
    %262 = arith.select %260, %12, %261 : vector<8x1024xi1>, vector<8x1024xf32>
    %cst_52 = arith.constant dense<0xFF800000> : vector<8xf32>
    %263 = vector.multi_reduction <maximumf>, %262, %cst_52 [1] : vector<8x1024xf32> to vector<8xf32>
    %264 = vector.shape_cast %263 : vector<8xf32> to vector<8x1xf32>
    %265 = vector.broadcast %258 : vector<8x1xf32> to vector<8x1024xf32>
    %266 = arith.cmpf olt, %14, %265 : vector<8x1024xf32>
    %267 = vector.broadcast %cst_7 : f32 to vector<8x1024xf32>
    %268 = arith.select %266, %14, %267 : vector<8x1024xi1>, vector<8x1024xf32>
    %cst_53 = arith.constant dense<0xFF800000> : vector<8xf32>
    %269 = vector.multi_reduction <maximumf>, %268, %cst_53 [1] : vector<8x1024xf32> to vector<8xf32>
    %270 = vector.shape_cast %269 : vector<8xf32> to vector<8x1xf32>
    %271 = vector.broadcast %264 : vector<8x1xf32> to vector<8x1024xf32>
    %272 = arith.cmpf olt, %12, %271 : vector<8x1024xf32>
    %273 = vector.broadcast %cst_7 : f32 to vector<8x1024xf32>
    %274 = arith.select %272, %12, %273 : vector<8x1024xi1>, vector<8x1024xf32>
    %cst_54 = arith.constant dense<0xFF800000> : vector<8xf32>
    %275 = vector.multi_reduction <maximumf>, %274, %cst_54 [1] : vector<8x1024xf32> to vector<8xf32>
    %276 = vector.shape_cast %275 : vector<8xf32> to vector<8x1xf32>
    %277 = vector.broadcast %270 : vector<8x1xf32> to vector<8x1024xf32>
    %278 = arith.cmpf olt, %14, %277 : vector<8x1024xf32>
    %279 = vector.broadcast %cst_7 : f32 to vector<8x1024xf32>
    %280 = arith.select %278, %14, %279 : vector<8x1024xi1>, vector<8x1024xf32>
    %cst_55 = arith.constant dense<0xFF800000> : vector<8xf32>
    %281 = vector.multi_reduction <maximumf>, %280, %cst_55 [1] : vector<8x1024xf32> to vector<8xf32>
    %282 = vector.shape_cast %281 : vector<8xf32> to vector<8x1xf32>
    %283 = vector.broadcast %276 : vector<8x1xf32> to vector<8x1024xf32>
    %284 = arith.cmpf olt, %12, %283 : vector<8x1024xf32>
    %285 = vector.broadcast %cst_7 : f32 to vector<8x1024xf32>
    %286 = arith.select %284, %12, %285 : vector<8x1024xi1>, vector<8x1024xf32>
    %cst_56 = arith.constant dense<0xFF800000> : vector<8xf32>
    %287 = vector.multi_reduction <maximumf>, %286, %cst_56 [1] : vector<8x1024xf32> to vector<8xf32>
    %288 = vector.shape_cast %287 : vector<8xf32> to vector<8x1xf32>
    %289 = vector.broadcast %282 : vector<8x1xf32> to vector<8x1024xf32>
    %290 = arith.cmpf olt, %14, %289 : vector<8x1024xf32>
    %291 = vector.broadcast %cst_7 : f32 to vector<8x1024xf32>
    %292 = arith.select %290, %14, %291 : vector<8x1024xi1>, vector<8x1024xf32>
    %cst_57 = arith.constant dense<0xFF800000> : vector<8xf32>
    %293 = vector.multi_reduction <maximumf>, %292, %cst_57 [1] : vector<8x1024xf32> to vector<8xf32>
    %294 = vector.shape_cast %293 : vector<8xf32> to vector<8x1xf32>
    %295 = vector.broadcast %288 : vector<8x1xf32> to vector<8x1024xf32>
    %296 = arith.cmpf olt, %12, %295 : vector<8x1024xf32>
    %297 = vector.broadcast %cst_7 : f32 to vector<8x1024xf32>
    %298 = arith.select %296, %12, %297 : vector<8x1024xi1>, vector<8x1024xf32>
    %cst_58 = arith.constant dense<0xFF800000> : vector<8xf32>
    %299 = vector.multi_reduction <maximumf>, %298, %cst_58 [1] : vector<8x1024xf32> to vector<8xf32>
    %300 = vector.shape_cast %299 : vector<8xf32> to vector<8x1xf32>
    %301 = vector.broadcast %294 : vector<8x1xf32> to vector<8x1024xf32>
    %302 = arith.cmpf olt, %14, %301 : vector<8x1024xf32>
    %303 = vector.broadcast %cst_7 : f32 to vector<8x1024xf32>
    %304 = arith.select %302, %14, %303 : vector<8x1024xi1>, vector<8x1024xf32>
    %cst_59 = arith.constant dense<0xFF800000> : vector<8xf32>
    %305 = vector.multi_reduction <maximumf>, %304, %cst_59 [1] : vector<8x1024xf32> to vector<8xf32>
    %306 = vector.shape_cast %305 : vector<8xf32> to vector<8x1xf32>
    %307 = vector.broadcast %300 : vector<8x1xf32> to vector<8x1024xf32>
    %308 = arith.cmpf oge, %12, %307 : vector<8x1024xf32>
    %cst_60 = arith.constant 0.000000e+00 : f32
    %309 = vector.broadcast %cst_60 : f32 to vector<8x1024xf32>
    %310 = arith.select %308, %12, %309 : vector<8x1024xi1>, vector<8x1024xf32>
    %311 = arith.index_cast %8 : i32 to index
    %c0_61 = arith.constant 0 : index
    %312 = vector.load %arg7[%311, %c0_61] : memref<16x1024xf32, #tpu.memory_space<vmem>>, vector<8x1024xf32>
    tpu.vector_store %arg7[%311, %c0_61], %310 {strides = array<i32>} : memref<16x1024xf32, #tpu.memory_space<vmem>>, vector<8x1024xf32>,
    %313 = vector.broadcast %306 : vector<8x1xf32> to vector<8x1024xf32>
    %314 = arith.cmpf oge, %14, %313 : vector<8x1024xf32>
    %cst_62 = arith.constant 0.000000e+00 : f32
    %315 = vector.broadcast %cst_62 : f32 to vector<8x1024xf32>
    %316 = arith.select %314, %14, %315 : vector<8x1024xi1>, vector<8x1024xf32>
    %317 = arith.index_cast %10 : i32 to index
    %c0_63 = arith.constant 0 : index
    %318 = vector.load %arg7[%317, %c0_63] : memref<16x1024xf32, #tpu.memory_space<vmem>>, vector<8x1024xf32>
    tpu.vector_store %arg7[%317, %c0_63], %316 {strides = array<i32>} : memref<16x1024xf32, #tpu.memory_space<vmem>>, vector<8x1024xf32>,
    %c1_i32 = arith.constant 1 : i32
    %c0_64 = arith.constant 0 : index
    %c0_65 = arith.constant 0 : index
    %319 = vector.load %arg7[%c0_64, %c0_65] : memref<16x1024xf32, #tpu.memory_space<vmem>>, vector<16x1024xf32>
    %c0_66 = arith.constant 0 : index
    %c0_67 = arith.constant 0 : index
    %320 = vector.load %arg4[%c0_66, %c0_67] : memref<1024x128xf32, #tpu.memory_space<vmem>>, vector<1024x128xf32>
    %cst_68 = arith.constant dense<0.000000e+00> : vector<16x128xf32>
    %321 = tpu.matmul %319, %320, %cst_68 {dimension_numbers = #tpu.dot_dimension_numbers<[1], [0], [0], [1], [0, 0, 1, 1], [], []>} : vector<16x1024xf32>, vector<1024x128xf32>, vector<16x128xf32> -> vector<16x128xf32>
    %c0_69 = arith.constant 0 : index
    %c0_70 = arith.constant 0 : index
    %322 = vector.load %arg5[%c0_69, %c0_70] : memref<1x128xf32, #tpu.memory_space<vmem>>, vector<1x128xf32>
    %323 = vector.broadcast %322 : vector<1x128xf32> to vector<16x128xf32>
    %324 = arith.addf %321, %323 : vector<16x128xf32>
    %c0_71 = arith.constant 0 : index
    %c0_72 = arith.constant 0 : index
    %325 = vector.load %arg6[%c0_71, %c0_72] : memref<16x128xf32, #tpu.memory_space<vmem>>, vector<16x128xf32>
    tpu.vector_store %arg6[%c0_71, %c0_72], %324 {strides = array<i32>} : memref<16x128xf32, #tpu.memory_space<vmem>>, vector<16x128xf32>,
    return
  }
  func.func @transform_0(%arg0: i32) -> (i32, i32) {
    %c0_i32 = arith.constant 0 : i32
    %c0_i32_0 = arith.constant 0 : i32
    return %arg0, %c0_i32 : i32, i32
  }
  func.func @transform_1(%arg0: i32) -> (i32, i32) {
    %c0_i32 = arith.constant 0 : i32
    %c0_i32_0 = arith.constant 0 : i32
    %c0_i32_1 = arith.constant 0 : i32
    return %c0_i32, %c0_i32_0 : i32, i32
  }
  func.func @transform_2(%arg0: i32) -> (i32, i32) {
    %c0_i32 = arith.constant 0 : i32
    %c0_i32_0 = arith.constant 0 : i32
    %c0_i32_1 = arith.constant 0 : i32
    return %c0_i32, %c0_i32_0 : i32, i32
  }
  func.func @transform_3(%arg0: i32) -> (i32, i32) {
    %c0_i32 = arith.constant 0 : i32
    %c0_i32_0 = arith.constant 0 : i32
    %c0_i32_1 = arith.constant 0 : i32
    return %c0_i32, %c0_i32_0 : i32, i32
  }
  func.func @transform_4(%arg0: i32) -> (i32, i32) {
    %c0_i32 = arith.constant 0 : i32
    %c0_i32_0 = arith.constant 0 : i32
    %c0_i32_1 = arith.constant 0 : i32
    return %c0_i32, %c0_i32_0 : i32, i32
  }
  func.func @transform_5(%arg0: i32) -> (i32, i32) {
    %c0_i32 = arith.constant 0 : i32
    %c0_i32_0 = arith.constant 0 : i32
    return %arg0, %c0_i32 : i32, i32
  }
}

</mosaic_0001>

<bundles_post_ra>
// kernel: tpu_custom_call.1
= control target key start
LH: loop header
LB: loop body
LE: loop exit
PB: predicated region body
PF: predicated region fallthrough
CT: control target
= control target key end

     0   :  { %10 = vsyncpa [#allocation4], 0  ;;  %s3895_s0 = inlined_call_operand.hbm [shape: f32[16,128], index: 0, kind: input, shape index: {}]   ;;  %s3896_s1 = inlined_call_operand.hbm [shape: f32[128,1024], index: 1, kind: input, shape index: {}]   ;;  %s3897_s2 = inlined_call_operand.hbm [shape: f32[1,1024], index: 2, kind: input, shape index: {}]   ;;  %s3898_s3 = inlined_call_operand.hbm [shape: f32[1024,128], index: 3, kind: input, shape index: {}]   ;;  %s3899_s4 = inlined_call_operand.vmem [shape: f32[1,128], index: 4, kind: input, shape index: {}]   ;;  %s3900_s5 = inlined_call_operand.hbm [shape: f32[16,128], index: 5, kind: output, shape index: {}]  }
   0x1   :  { %11 = vsyncpa [#allocation7], 0 }
   0x2   :  { %12 = vsyncpa [#allocation10], 0 }
   0x3   :  { %13 = vsyncpa [#allocation5], 0  ;;  %s2888_s18 = smov [#allocation6]   ;;  %s2770_s22 = scalar_lea.hbm %s3896_s1, 16384 }
   0x4   :  { %s31_s19 = sshll.u32 %s2888_s18, 4  ;;  %p2771_p0 = scmp.ne.s32.totalorder %s3896_s1, %s2770_s22  ;;  %s32_s19 = int_to_ptr.vmem [resolvable:$true] %s31_s19 }
   0x5   :  { %p2774_p1 = scmp.lt.u32.totalorder %s2770_s22, %s3896_s1 }
   0x7   :  { %p2776_p2 = pnand %p2774_p1, %p2771_p0 }
   0x9   :  { %2779 = shalt.err (!%p2776_p2)
}
   0xa   :  { %s2780_s27 = scalar_lea.vmem %s32_s19, 16384  ;;  %p2785_p4 = scmp.lt.s32.totalorder %s32_s19, %s32_s19 }
   0xb   :  { %p2781_p3 = scmp.ne.s32.totalorder %s32_s19, %s2780_s27  ;;  %p2786_p5 = scmp.lt.s32.totalorder %s2780_s27, %s2780_s27 }
   0xd   :  { %p2787_p6 = por %p2786_p5, %p2785_p4 }
   0xf   :  { %p2788_p7 = pnand %p2787_p6, %p2781_p3 }
  0x11   :  { %2791 = shalt.err (!%p2788_p7)
}
  0x12   :  { %s2889_s28 = smov 1024   ;;  %s2890_s29 = smov 64  }
  0x13   :  { %37 = dma.hbm_to_vmem [thread:$0]  %s3896_s1, 16384, %s32_s19, [#allocation7], %s2889_s28, %s2889_s28, %s2890_s29  }
  0x14   :  { %s2891_s7 = smov [#allocation3]   ;;  %s2792_s11 = scalar_lea.hbm %s3895_s0, 256 }
  0x15   :  { %s19_s8 = sshll.u32 %s2891_s7, 4  ;;  %p2793_p8 = scmp.ne.s32.totalorder %s3895_s0, %s2792_s11  ;;  %s20_s8 = int_to_ptr.vmem [resolvable:$true] %s19_s8 }
  0x16   :  { %p2796_p9 = scmp.lt.u32.totalorder %s2792_s11, %s3895_s0 }
  0x18   :  { %p2798_p10 = pnand %p2796_p9, %p2793_p8 }
  0x1a   :  { %2801 = shalt.err (!%p2798_p10)
}
  0x1b   :  { %s2802_s16 = scalar_lea.vmem %s20_s8, 256  ;;  %p2807_p12 = scmp.lt.s32.totalorder %s20_s8, %s20_s8 }
  0x1c   :  { %p2803_p11 = scmp.ne.s32.totalorder %s20_s8, %s2802_s16  ;;  %p2808_p13 = scmp.lt.s32.totalorder %s2802_s16, %s2802_s16 }
  0x1e   :  { %p2809_p0 = por %p2808_p13, %p2807_p12 }
  0x20   :  { %p2810_p1 = pnand %p2809_p0, %p2803_p11 }
  0x22   :  { %2813 = shalt.err (!%p2810_p1)
}
  0x23   :  { %s2892_s1 = smov 128   ;;  %s2893_s17 = smov 8  }
  0x24   :  { %25 = dma.hbm_to_vmem [thread:$0]  %s3895_s0, 256, %s20_s8, [#allocation4], %s2892_s1, %s2892_s1, %s2893_s17  }
  0x25   :  { %s2894_s20 = smov [#allocation8]   ;;  %s2895_s22 = smov [#allocation9]  }
  0x26   :  { %s44_s21 = sshll.u32 %s2894_s20, 4  ;;  %s53_s23 = sshll.u32 %s2895_s22, 4  ;;  %s45_s21 = int_to_ptr.vmem [resolvable:$true] %s44_s21  ;;  %s2955_s23 = int_to_ptr.vmem [resolvable:$true] %s53_s23 }
  0x27   :  { %s2814_s26 = scalar_lea.hbm %s3897_s2, 128 }
  0x28   :  { %p2815_p2 = scmp.ne.s32.totalorder %s3897_s2, %s2814_s26  ;;  %p2818_p3 = scmp.lt.u32.totalorder %s2814_s26, %s3897_s2 }
  0x2a   :  { %p2820_p4 = pnand %p2818_p3, %p2815_p2 }
  0x2c   :  { %2823 = shalt.err (!%p2820_p4)
}
  0x2d   :  { %s2824_s0 = scalar_lea.vmem %s45_s21, 128  ;;  %p2829_p6 = scmp.lt.s32.totalorder %s45_s21, %s45_s21 }
  0x2e   :  { %p2825_p5 = scmp.ne.s32.totalorder %s45_s21, %s2824_s0  ;;  %p2830_p7 = scmp.lt.s32.totalorder %s2824_s0, %s2824_s0 }
  0x30   :  { %p2831_p8 = por %p2830_p7, %p2829_p6 }
  0x32   :  { %p2832_p9 = pnand %p2831_p8, %p2825_p5 }
  0x34   :  { %2835 = shalt.err (!%p2832_p9)
}
  0x35   :  { %47 = dma.hbm_to_vmem [thread:$0]  %s3897_s2, 128, %s45_s21, [#allocation7]  }
  0x36   :  { %s2836_s10 = scalar_lea.hbm %s3898_s3, 16384 }
  0x37   :  { %p2837_p10 = scmp.ne.s32.totalorder %s3898_s3, %s2836_s10  ;;  %p2840_p11 = scmp.lt.u32.totalorder %s2836_s10, %s3898_s3 }
  0x39   :  { %p2842_p12 = pnand %p2840_p11, %p2837_p10 }
  0x3b   :  { %2845 = shalt.err (!%p2842_p12)
}
  0x3c   :  { %s2846_s15 = scalar_lea.vmem %s2955_s23, 16384  ;;  %p2851_p0 = scmp.lt.s32.totalorder %s2955_s23, %s2955_s23 }
  0x3d   :  { %p2847_p13 = scmp.ne.s32.totalorder %s2955_s23, %s2846_s15  ;;  %p2852_p1 = scmp.lt.s32.totalorder %s2846_s15, %s2846_s15 }
  0x3f   :  { %p2853_p2 = por %p2852_p1, %p2851_p0 }
  0x41   :  { %p2854_p3 = pnand %p2853_p2, %p2847_p13 }
  0x43   :  { %2857 = shalt.err (!%p2854_p3)
}
  0x44   :  { %59 = dma.hbm_to_vmem [thread:$0]  %s3898_s3, 16384, %s2955_s23, [#allocation10], %s2892_s1, %s2892_s1, %s2893_s17  }
  0x45   :  { %2880 = dma.done.wait [#allocation4], 256  }
  0x46   :  { %2881 = vsyncadd [#allocation4], 4294967040 }
  0x47   :  { %2882 = dma.done.wait [#allocation7], 16512  }
  0x48   :  { %2883 = vsyncadd [#allocation7], 4294950784 }
  0x49   :  { %2884 = dma.done.wait [#allocation10], 16384  }
  0x4a   :  { %2885 = vsyncadd [#allocation10], 4294950912  ;;  %v2896_v0 = vmov 0.0   ;;  %v77_v1 = vld [vmem:[#allocation6 + $0x8] sm:$0xff]  ;;  %v79_v3 = vld [vmem:[#allocation6 + $0x18] sm:$0xff] }
  0x4b   :  { %310 = vmatprep.mubr.f32.mxu0 %v2896_v0  ;;  %387 = vmatprep.mubr.f32.mxu1 %v2896_v0  ;;  %v85_v2 = vld [vmem:[#allocation6 + $0x48] sm:$0xff]  ;;  %v87_v5 = vld [vmem:[#allocation6 + $0x58] sm:$0xff]  ;;  %v76_v6 = vld [vmem:[#allocation6] sm:$0xff] }
  0x4c   :  { %v2504_v4 = vpack.c.bf16 %v85_v2, %v77_v1  ;;  %v84_v7 = vld [vmem:[#allocation6 + $0x40] sm:$0xff]  ;;  %v2536_v8 = vpack.c.bf16 %v87_v5, %v79_v3  ;;  %v78_v10 = vld [vmem:[#allocation6 + $0x10] sm:$0xff]  ;;  %v93_v12 = vld [vmem:[#allocation6 + $0x88] sm:$0xff] }
  0x4d   :  { %v2506_v9 = vpack.c.bf16 %v84_v7, %v76_v6  ;;  %v86_v11 = vld [vmem:[#allocation6 + $0x50] sm:$0xff]  ;;  %v101_v14 = vld [vmem:[#allocation6 + $0xc8] sm:$0xff]  ;;  %v95_v15 = vld [vmem:[#allocation6 + $0x98] sm:$0xff] }
  0x4e   :  { %2505 = vmatprep.subr.bf16.mxu0 %v2504_v4  ;;  %v2538_v13 = vpack.c.bf16 %v86_v11, %v78_v10  ;;  %v103_v16 = vld [vmem:[#allocation6 + $0xd8] sm:$0xff]  ;;  %2537 = vmatprep.subr.bf16.mxu1 %v2536_v8  ;;  %v2508_v17 = vpack.c.bf16 %v101_v14, %v93_v12  ;;  %v92_v19 = vld [vmem:[#allocation6 + $0x80] sm:$0xff]  ;;  %v94_v21 = vld [vmem:[#allocation6 + $0x90] sm:$0xff] }
  0x4f   :  { %2507 = vmatpush1.bf16.msra.mxu0 %v2506_v9  ;;  %v2540_v18 = vpack.c.bf16 %v103_v16, %v95_v15  ;;  %v100_v20 = vld [vmem:[#allocation6 + $0xc0] sm:$0xff]  ;;  %v102_v23 = vld [vmem:[#allocation6 + $0xd0] sm:$0xff]  ;;  %v109_v24 = vld [vmem:[#allocation6 + $0x108] sm:$0xff] }
  0x50   :  { %2539 = vmatpush1.bf16.msra.mxu1 %v2538_v13  ;;  %v2510_v22 = vpack.c.bf16 %v100_v20, %v92_v19  ;;  %v117_v25 = vld [vmem:[#allocation6 + $0x148] sm:$0xff]  ;;  %2509 = vmatprep.subr.bf16.mxu0 %v2508_v17  ;;  %v2542_v26 = vpack.c.bf16 %v102_v23, %v94_v21  ;;  %v111_v28 = vld [vmem:[#allocation6 + $0x118] sm:$0xff]  ;;  %v108_v30 = vld [vmem:[#allocation6 + $0x100] sm:$0xff] }
  0x51   :  { %2541 = vmatprep.subr.bf16.mxu1 %v2540_v18  ;;  %v2512_v27 = vpack.c.bf16 %v117_v25, %v109_v24  ;;  %v119_v29 = vld [vmem:[#allocation6 + $0x158] sm:$0xff]  ;;  %v116_v32 = vld [vmem:[#allocation6 + $0x140] sm:$0xff]  ;;  %v110_v33 = vld [vmem:[#allocation6 + $0x110] sm:$0xff] }
  0x52   :  { %v2544_v31 = vpack.c.bf16 %v119_v29, %v111_v28  ;;  %v118_v34 = vld [vmem:[#allocation6 + $0x150] sm:$0xff]  ;;  %v2514_v35 = vpack.c.bf16 %v116_v32, %v108_v30  ;;  %v125_v36 = vld [vmem:[#allocation6 + $0x188] sm:$0xff]  ;;  %v127_v38 = vld [vmem:[#allocation6 + $0x198] sm:$0xff] }
  0x53   :  { %2511 = vmatpush1.bf16.msra.mxu0 %v2510_v22  ;;  %v133_v37 = vld [vmem:[#allocation6 + $0x1c8] sm:$0xff]  ;;  %v2546_v39 = vpack.c.bf16 %v118_v34, %v110_v33  ;;  %v135_v41 = vld [vmem:[#allocation6 + $0x1d8] sm:$0xff]  ;;  %v124_v42 = vld [vmem:[#allocation6 + $0x180] sm:$0xff] }
  0x54   :  { %2543 = vmatpush1.bf16.msra.mxu1 %v2542_v26  ;;  %2513 = vmatprep.subr.bf16.mxu0 %v2512_v27  ;;  %v2516_v40 = vpack.c.bf16 %v133_v37, %v125_v36  ;;  %v132_v43 = vld [vmem:[#allocation6 + $0x1c0] sm:$0xff]  ;;  %v2548_v44 = vpack.c.bf16 %v135_v41, %v127_v38  ;;  %v126_v45 = vld [vmem:[#allocation6 + $0x190] sm:$0xff]  ;;  %v141_v47 = vld [vmem:[#allocation6 + $0x208] sm:$0xff] }
  0x55   :  { %2545 = vmatprep.subr.bf16.mxu1 %v2544_v31  ;;  %v134_v46 = vld [vmem:[#allocation6 + $0x1d0] sm:$0xff]  ;;  %v149_v48 = vld [vmem:[#allocation6 + $0x248] sm:$0xff]  ;;  %v143_v49 = vld [vmem:[#allocation6 + $0x218] sm:$0xff]  ;;  %v2518_v51 = vpack.c.bf16 %v132_v43, %v124_v42 }
  0x56   :  { %v151_v50 = vld [vmem:[#allocation6 + $0x258] sm:$0xff]  ;;  %v2550_v52 = vpack.c.bf16 %v134_v46, %v126_v45  ;;  %v2520_v53 = vpack.c.bf16 %v149_v48, %v141_v47  ;;  %v140_v54 = vld [vmem:[#allocation6 + $0x200] sm:$0xff]  ;;  %v142_v56 = vld [vmem:[#allocation6 + $0x210] sm:$0xff] }
  0x57   :  { %2515 = vmatpush1.bf16.msra.mxu0 %v2514_v35  ;;  %v148_v55 = vld [vmem:[#allocation6 + $0x240] sm:$0xff]  ;;  %v2552_v57 = vpack.c.bf16 %v151_v50, %v143_v49  ;;  %v150_v58 = vld [vmem:[#allocation6 + $0x250] sm:$0xff]  ;;  %v157_v59 = vld [vmem:[#allocation6 + $0x288] sm:$0xff] }
  0x58   :  { %2547 = vmatpush1.bf16.msra.mxu1 %v2546_v39  ;;  %2517 = vmatprep.subr.bf16.mxu0 %v2516_v40  ;;  %v165_v60 = vld [vmem:[#allocation6 + $0x2c8] sm:$0xff]  ;;  %v159_v61 = vld [vmem:[#allocation6 + $0x298] sm:$0xff]  ;;  %v2522_v63 = vpack.c.bf16 %v148_v55, %v140_v54  ;;  %v2554_v1 = vpack.c.bf16 %v150_v58, %v142_v56  ;;  %v156_v3 = vld [vmem:[#allocation6 + $0x280] sm:$0xff] }
  0x59   :  { %2549 = vmatprep.subr.bf16.mxu1 %v2548_v44  ;;  %v167_v62 = vld [vmem:[#allocation6 + $0x2d8] sm:$0xff]  ;;  %v2524_v2 = vpack.c.bf16 %v165_v60, %v157_v59  ;;  %v164_v4 = vld [vmem:[#allocation6 + $0x2c0] sm:$0xff]  ;;  %v158_v5 = vld [vmem:[#allocation6 + $0x290] sm:$0xff] }
  0x5a   :  { %v2556_v6 = vpack.c.bf16 %v167_v62, %v159_v61  ;;  %v166_v7 = vld [vmem:[#allocation6 + $0x2d0] sm:$0xff]  ;;  %v173_v8 = vld [vmem:[#allocation6 + $0x308] sm:$0xff]  ;;  %v175_v10 = vld [vmem:[#allocation6 + $0x318] sm:$0xff]  ;;  %v2526_v12 = vpack.c.bf16 %v164_v4, %v156_v3 }
  0x5b   :  { %2519 = vmatpush1.bf16.msra.mxu0 %v2518_v51  ;;  %v181_v9 = vld [vmem:[#allocation6 + $0x348] sm:$0xff]  ;;  %v183_v11 = vld [vmem:[#allocation6 + $0x358] sm:$0xff]  ;;  %v2558_v13 = vpack.c.bf16 %v166_v7, %v158_v5  ;;  %v172_v15 = vld [vmem:[#allocation6 + $0x300] sm:$0xff] }
  0x5c   :  { %2551 = vmatpush1.bf16.msra.mxu1 %v2550_v52  ;;  %2521 = vmatprep.subr.bf16.mxu0 %v2520_v53  ;;  %v2528_v14 = vpack.c.bf16 %v181_v9, %v173_v8  ;;  %v180_v16 = vld [vmem:[#allocation6 + $0x340] sm:$0xff]  ;;  %v174_v17 = vld [vmem:[#allocation6 + $0x310] sm:$0xff]  ;;  %v2560_v18 = vpack.c.bf16 %v183_v11, %v175_v10  ;;  %v189_v20 = vld [vmem:[#allocation6 + $0x388] sm:$0xff] }
  0x5d   :  { %2553 = vmatprep.subr.bf16.mxu1 %v2552_v57  ;;  %v182_v19 = vld [vmem:[#allocation6 + $0x350] sm:$0xff]  ;;  %v197_v21 = vld [vmem:[#allocation6 + $0x3c8] sm:$0xff]  ;;  %v191_v22 = vld [vmem:[#allocation6 + $0x398] sm:$0xff]  ;;  %v2530_v24 = vpack.c.bf16 %v180_v16, %v172_v15 }
  0x5e   :  { %v199_v23 = vld [vmem:[#allocation6 + $0x3d8] sm:$0xff]  ;;  %v2562_v25 = vpack.c.bf16 %v182_v19, %v174_v17  ;;  %v2532_v26 = vpack.c.bf16 %v197_v21, %v189_v20  ;;  %v188_v27 = vld [vmem:[#allocation6 + $0x380] sm:$0xff]  ;;  %v190_v29 = vld [vmem:[#allocation6 + $0x390] sm:$0xff] }
  0x5f   :  { %2523 = vmatpush1.bf16.msra.mxu0 %v2522_v63  ;;  %v196_v28 = vld [vmem:[#allocation6 + $0x3c0] sm:$0xff]  ;;  %v2564_v30 = vpack.c.bf16 %v199_v23, %v191_v22  ;;  %v198_v31 = vld [vmem:[#allocation6 + $0x3d0] sm:$0xff]  ;;  %v81_v32 = vld [vmem:[#allocation6 + $0x28] sm:$0xff] }
  0x60   :  { %2555 = vmatpush1.bf16.msra.mxu1 %v2554_v1  ;;  %2525 = vmatprep.subr.bf16.mxu0 %v2524_v2  ;;  %v89_v33 = vld [vmem:[#allocation6 + $0x68] sm:$0xff]  ;;  %v83_v34 = vld [vmem:[#allocation6 + $0x38] sm:$0xff]  ;;  %v2534_v36 = vpack.c.bf16 %v196_v28, %v188_v27  ;;  %v2566_v37 = vpack.c.bf16 %v198_v31, %v190_v29  ;;  %v80_v39 = vld [vmem:[#allocation6 + $0x20] sm:$0xff] }
  0x61   :  { %2557 = vmatprep.subr.bf16.mxu1 %v2556_v6  ;;  %v91_v35 = vld [vmem:[#allocation6 + $0x78] sm:$0xff]  ;;  %v2568_v38 = vpack.c.bf16 %v89_v33, %v81_v32  ;;  %v88_v40 = vld [vmem:[#allocation6 + $0x60] sm:$0xff]  ;;  %v82_v41 = vld [vmem:[#allocation6 + $0x30] sm:$0xff] }
  0x62   :  { %v2600_v42 = vpack.c.bf16 %v91_v35, %v83_v34  ;;  %v90_v43 = vld [vmem:[#allocation6 + $0x70] sm:$0xff]  ;;  %v97_v44 = vld [vmem:[#allocation6 + $0xa8] sm:$0xff]  ;;  %v99_v46 = vld [vmem:[#allocation6 + $0xb8] sm:$0xff]  ;;  %v2570_v49 = vpack.c.bf16 %v88_v40, %v80_v39 }
  0x63   :  { %2527 = vmatpush1.bf16.msra.mxu0 %v2526_v12  ;;  %v105_v45 = vld [vmem:[#allocation6 + $0xe8] sm:$0xff]  ;;  %v107_v47 = vld [vmem:[#allocation6 + $0xf8] sm:$0xff]  ;;  %v2991_v48 = vld [vmem:[#allocation3] sm:$0xff]  ;;  %v2602_v50 = vpack.c.bf16 %v90_v43, %v82_v41 }
  0x64   :  { %2559 = vmatpush1.bf16.msra.mxu1 %v2558_v13  ;;  %2529 = vmatprep.subr.bf16.mxu0 %v2528_v14  ;;  %v2572_v51 = vpack.c.bf16 %v105_v45, %v97_v44  ;;  %v96_v52 = vld [vmem:[#allocation6 + $0xa0] sm:$0xff]  ;;  %v98_v54 = vld [vmem:[#allocation6 + $0xb0] sm:$0xff]  ;;  %v2604_v55 = vpack.c.bf16 %v107_v47, %v99_v46  ;;  %v113_v57 = vld [vmem:[#allocation6 + $0x128] sm:$0xff] }
  0x65   :  { %2561 = vmatprep.subr.bf16.mxu1 %v2560_v18  ;;  %v104_v53 = vld [vmem:[#allocation6 + $0xe0] sm:$0xff]  ;;  %v106_v56 = vld [vmem:[#allocation6 + $0xf0] sm:$0xff]  ;;  %v121_v58 = vld [vmem:[#allocation6 + $0x168] sm:$0xff] }
  0x66   :  { %v115_v59 = vld [vmem:[#allocation6 + $0x138] sm:$0xff]  ;;  %v2574_v61 = vpack.c.bf16 %v104_v53, %v96_v52  ;;  %v2606_v62 = vpack.c.bf16 %v106_v56, %v98_v54  ;;  %v2576_v63 = vpack.c.bf16 %v121_v58, %v113_v57  ;;  %v112_v1 = vld [vmem:[#allocation6 + $0x120] sm:$0xff]  ;;  %v114_v3 = vld [vmem:[#allocation6 + $0x130] sm:$0xff] }
  0x67   :  { %2531 = vmatpush1.bf16.msra.mxu0 %v2530_v24  ;;  %v123_v60 = vld [vmem:[#allocation6 + $0x178] sm:$0xff]  ;;  %v120_v2 = vld [vmem:[#allocation6 + $0x160] sm:$0xff]  ;;  %v122_v5 = vld [vmem:[#allocation6 + $0x170] sm:$0xff] }
  0x68   :  { %2563 = vmatpush1.bf16.msra.mxu1 %v2562_v25  ;;  %2533 = vmatprep.subr.bf16.mxu0 %v2532_v26  ;;  %v2608_v4 = vpack.c.bf16 %v123_v60, %v115_v59  ;;  %v129_v6 = vld [vmem:[#allocation6 + $0x1a8] sm:$0xff]  ;;  %v131_v8 = vld [vmem:[#allocation6 + $0x1b8] sm:$0xff]  ;;  %v2578_v10 = vpack.c.bf16 %v120_v2, %v112_v1  ;;  %v2610_v12 = vpack.c.bf16 %v122_v5, %v114_v3  ;;  %v128_v14 = vld [vmem:[#allocation6 + $0x1a0] sm:$0xff] }
  0x69   :  { %2565 = vmatprep.subr.bf16.mxu1 %v2564_v30  ;;  %v137_v7 = vld [vmem:[#allocation6 + $0x1e8] sm:$0xff]  ;;  %v139_v9 = vld [vmem:[#allocation6 + $0x1f8] sm:$0xff]  ;;  %v136_v15 = vld [vmem:[#allocation6 + $0x1e0] sm:$0xff] }
  0x6a   :  { %v2997_v11 = vld [vmem:[#allocation3 + $0x8] sm:$0xff]  ;;  %v2580_v13 = vpack.c.bf16 %v137_v7, %v129_v6  ;;  %v130_v16 = vld [vmem:[#allocation6 + $0x1b0] sm:$0xff]  ;;  %v2612_v17 = vpack.c.bf16 %v139_v9, %v131_v8  ;;  %v145_v19 = vld [vmem:[#allocation6 + $0x228] sm:$0xff]  ;;  %v2582_v23 = vpack.c.bf16 %v136_v15, %v128_v14 }
  0x6b   :  { %2535 = vmatpush1.bf16.msra.mxu0 %v2534_v36  ;;  %v138_v18 = vld [vmem:[#allocation6 + $0x1f0] sm:$0xff]  ;;  %v153_v20 = vld [vmem:[#allocation6 + $0x268] sm:$0xff]  ;;  %v147_v21 = vld [vmem:[#allocation6 + $0x238] sm:$0xff] }
  0x6c   :  { %2567 = vmatpush1.bf16.msra.mxu1 %v2566_v37  ;;  %2569 = vmatprep.subr.bf16.mxu0 %v2568_v38  ;;  %v155_v22 = vld [vmem:[#allocation6 + $0x278] sm:$0xff]  ;;  %v2614_v24 = vpack.c.bf16 %v138_v18, %v130_v16  ;;  %v2584_v25 = vpack.c.bf16 %v153_v20, %v145_v19  ;;  %v144_v26 = vld [vmem:[#allocation6 + $0x220] sm:$0xff]  ;;  %v146_v28 = vld [vmem:[#allocation6 + $0x230] sm:$0xff]  ;;  %v206_v16 = vlaneseq }
  0x6d   :  { %2601 = vmatprep.subr.bf16.mxu1 %v2600_v42  ;;  %v152_v27 = vld [vmem:[#allocation6 + $0x260] sm:$0xff]  ;;  %v2616_v29 = vpack.c.bf16 %v155_v22, %v147_v21  ;;  %v154_v30 = vld [vmem:[#allocation6 + $0x270] sm:$0xff]  ;;  %v161_v31 = vld [vmem:[#allocation6 + $0x2a8] sm:$0xff] }
  0x6e   :  { %311 = vmatmul.mubr.f32.vlgmr.msra.gmra.mrb[0].mxu0 %v2991_v48  ;;  %v169_v32 = vld [vmem:[#allocation6 + $0x2e8] sm:$0xff]  ;;  %v163_v33 = vld [vmem:[#allocation6 + $0x2b8] sm:$0xff]  ;;  %v2586_v35 = vpack.c.bf16 %v152_v27, %v144_v26  ;;  %v2618_v36 = vpack.c.bf16 %v154_v30, %v146_v28  ;;  %v160_v38 = vld [vmem:[#allocation6 + $0x2a0] sm:$0xff] }
  0x6f   :  { %388 = vmatmul.mubr.f32.vlgmr.msra.gmra.mrb[0].mxu1 %v2991_v48  ;;  %2571 = vmatpush1.bf16.msra.mxu0 %v2570_v49  ;;  %v171_v34 = vld [vmem:[#allocation6 + $0x2f8] sm:$0xff]  ;;  %v2588_v37 = vpack.c.bf16 %v169_v32, %v161_v31  ;;  %v168_v39 = vld [vmem:[#allocation6 + $0x2e0] sm:$0xff]  ;;  %v162_v40 = vld [vmem:[#allocation6 + $0x2b0] sm:$0xff] }
  0x70   :  { %2603 = vmatpush1.bf16.msra.mxu1 %v2602_v50  ;;  %2573 = vmatprep.subr.bf16.mxu0 %v2572_v51  ;;  %v2620_v41 = vpack.c.bf16 %v171_v34, %v163_v33  ;;  %v170_v42 = vld [vmem:[#allocation6 + $0x2f0] sm:$0xff]  ;;  %v177_v43 = vld [vmem:[#allocation6 + $0x328] sm:$0xff]  ;;  %v179_v45 = vld [vmem:[#allocation6 + $0x338] sm:$0xff]  ;;  %v2590_v47 = vpack.c.bf16 %v168_v39, %v160_v38 }
  0x71   :  { %2605 = vmatprep.subr.bf16.mxu1 %v2604_v55  ;;  %316 = vmatprep.mubr.f32.mxu0 %v2896_v0  ;;  %v185_v44 = vld [vmem:[#allocation6 + $0x368] sm:$0xff]  ;;  %v187_v46 = vld [vmem:[#allocation6 + $0x378] sm:$0xff]  ;;  %v2622_v49 = vpack.c.bf16 %v170_v42, %v162_v40  ;;  %v176_v51 = vld [vmem:[#allocation6 + $0x320] sm:$0xff] }
  0x72   :  { %393 = vmatprep.mubr.f32.mxu1 %v2896_v0  ;;  %317 = vmatmul.mubr.f32.gmra.mrb[2].mxu0 %v2997_v11  ;;  %v2592_v50 = vpack.c.bf16 %v185_v44, %v177_v43  ;;  %v184_v52 = vld [vmem:[#allocation6 + $0x360] sm:$0xff]  ;;  %v178_v53 = vld [vmem:[#allocation6 + $0x330] sm:$0xff]  ;;  %v2624_v54 = vpack.c.bf16 %v187_v46, %v179_v45  ;;  %v193_v56 = vld [vmem:[#allocation6 + $0x3a8] sm:$0xff] }
  0x73   :  { %2575 = vmatpush1.bf16.msra.mxu0 %v2574_v61  ;;  %394 = vmatmul.mubr.f32.gmra.mrb[2].mxu1 %v2997_v11  ;;  %v186_v55 = vld [vmem:[#allocation6 + $0x370] sm:$0xff]  ;;  %v201_v57 = vld [vmem:[#allocation6 + $0x3e8] sm:$0xff]  ;;  %v195_v58 = vld [vmem:[#allocation6 + $0x3b8] sm:$0xff]  ;;  %v2594_v60 = vpack.c.bf16 %v184_v52, %v176_v51 }
  0x74   :  { %2607 = vmatpush1.bf16.msra.mxu1 %v2606_v62  ;;  %2577 = vmatprep.subr.bf16.mxu0 %v2576_v63  ;;  %v203_v59 = vld [vmem:[#allocation6 + $0x3f8] sm:$0xff]  ;;  %v2626_v61 = vpack.c.bf16 %v186_v55, %v178_v53  ;;  %v2596_v62 = vpack.c.bf16 %v201_v57, %v193_v56  ;;  %v192_v63 = vld [vmem:[#allocation6 + $0x3a0] sm:$0xff]  ;;  %v194_v3 = vld [vmem:[#allocation6 + $0x3b0] sm:$0xff] }
  0x75   :  { %2609 = vmatprep.subr.bf16.mxu1 %v2608_v4  ;;  %464 = vmatprep.mubr.f32.mxu0 %v2896_v0  ;;  %v200_v1 = vld [vmem:[#allocation6 + $0x3e0] sm:$0xff]  ;;  %v2628_v2 = vpack.c.bf16 %v203_v59, %v195_v58  ;;  %v202_v4 = vld [vmem:[#allocation6 + $0x3f0] sm:$0xff] }
  0x76   :  { %541 = vmatprep.mubr.f32.mxu1 %v2896_v0  ;;  %v2598_v5 = vpack.c.bf16 %v200_v1, %v192_v63  ;;  %v2630_v6 = vpack.c.bf16 %v202_v4, %v194_v3  ;;  %v204_v19 = vld [vmem:[#allocation8] sm:$0xff] }
  0x77   :  { %2579 = vmatpush1.bf16.msra.mxu0 %v2578_v10 }
  0x78   :  { %2611 = vmatpush1.bf16.msra.mxu1 %v2610_v12  ;;  %2581 = vmatprep.subr.bf16.mxu0 %v2580_v13 }
  0x79   :  { %2613 = vmatprep.subr.bf16.mxu1 %v2612_v17  ;;  %v207_v17 = vshrl.u32 %v206_v16, 7 }
  0x7b   :  { %2583 = vmatpush1.bf16.msra.mxu0 %v2582_v23  ;;  %v208_v18 = vsub.s32 0, %v207_v17  ;;  %v216_v20 = vsub.s32 2, %v207_v17  ;;  %v212_v21 = vsub.s32 1, %v207_v17  ;;  %v228_v22 = vsub.s32 5, %v207_v17 }
  0x7c   :  { %2615 = vmatpush1.bf16.msra.mxu1 %v2614_v24  ;;  %2585 = vmatprep.subr.bf16.mxu0 %v2584_v25  ;;  %v220_v23 = vsub.s32 3, %v207_v17  ;;  %v236_v24 = vsub.s32 7, %v207_v17 }
  0x7d   :  { %2617 = vmatprep.subr.bf16.mxu1 %v2616_v29  ;;  %v217_v26 = vrot.slane %v204_v19, %v216_v20  ;;  %v213_v27 = vrot.slane %v204_v19, %v212_v21  ;;  %v229_v29 = vrot.slane %v204_v19, %v228_v22 }
  0x7e   :  { %v221_v30 = vrot.slane %v204_v19, %v220_v23  ;;  %v237_v31 = vrot.slane %v204_v19, %v236_v24 }
  0x7f   :  { %2587 = vmatpush1.bf16.msra.mxu0 %v2586_v35 }
  0x80   :  { %2619 = vmatpush1.bf16.msra.mxu1 %v2618_v36  ;;  %2589 = vmatprep.subr.bf16.mxu0 %v2588_v37 }
  0x81   :  { %2621 = vmatprep.subr.bf16.mxu1 %v2620_v41 }
  0x83   :  { %2591 = vmatpush1.bf16.msra.mxu0 %v2590_v47 }
  0x84   :  { %2623 = vmatpush1.bf16.msra.mxu1 %v2622_v49  ;;  %2593 = vmatprep.subr.bf16.mxu0 %v2592_v50 }
  0x85   :  { %2625 = vmatprep.subr.bf16.mxu1 %v2624_v54 }
  0x87   :  { %2595 = vmatpush1.bf16.msra.mxu0 %v2594_v60 }
  0x88   :  { %2627 = vmatpush1.bf16.msra.mxu1 %v2626_v61  ;;  %2597 = vmatprep.subr.bf16.mxu0 %v2596_v62 }
  0x89   :  { %2629 = vmatprep.subr.bf16.mxu1 %v2628_v2 }
  0x8b   :  { %2599 = vmatpush1.bf16.msra.mxu0 %v2598_v5 }
  0x8c   :  { %2631 = vmatpush1.bf16.msra.mxu1 %v2630_v6 }
  0x8e   :  { %465 = vmatmul.mubr.f32.vlgmr.msra.gmra.mrb[4].mxu0 %v2991_v48 }
  0x8f   :  { %542 = vmatmul.mubr.f32.vlgmr.msra.gmra.mrb[4].mxu1 %v2991_v48  ;;  %470 = vmatprep.mubr.f32.mxu0 %v2896_v0  ;;  %v224_v48 = vsub.s32 4, %v207_v17 }
  0x90   :  { %547 = vmatprep.mubr.f32.mxu1 %v2896_v0  ;;  %v232_v0 = vsub.s32 6, %v207_v17 }
  0x91   :  { %v225_v25 = vrot.slane %v204_v19, %v224_v48 }
  0x92   :  { %471 = vmatmul.mubr.f32.gmra.mrb[6].mxu0 %v2997_v11  ;;  %v233_v28 = vrot.slane %v204_v19, %v232_v0 }
  0x93   :  { %548 = vmatmul.mubr.f32.gmra.mrb[6].mxu1 %v2997_v11  ;;  %v209_v11 = vrot.slane %v204_v19, %v208_v18 }
 0x141   :  { %v312_v7 = vpop.f32.mrb[0].mxu0 }
 0x142   :  { %v389_v8 = vpop.f32.mrb[0].mxu1  ;;  %v314_v9 = vpop.f32.mrb[1].mxu0  ;;  %v3009_v33 = vadd.f32 %v312_v7, %v209_v11 }
 0x143   :  { %v391_v10 = vpop.f32.mrb[1].mxu1  ;;  %v3013_v37 = vadd.f32 %v389_v8, %v217_v26  ;;  %v3015_v38 = vadd.f32 %v314_v9, %v213_v27 }
 0x144   :  { %v3021_v42 = vadd.f32 %v391_v10, %v221_v30 }
 0x145   :  { %v318_v12 = vpop.f32.mrb[2].mxu0 }
 0x146   :  { %v395_v13 = vpop.f32.mrb[2].mxu1  ;;  %v320_v14 = vpop.f32.mrb[3].mxu0  ;;  %v3031_v49 = vadd.f32 %v318_v12, %v209_v11 }
 0x147   :  { %v397_v15 = vpop.f32.mrb[3].mxu1  ;;  %v3033_v50 = vadd.f32 %v395_v13, %v217_v26  ;;  %v3039_v55 = vadd.f32 %v320_v14, %v213_v27 }
 0x148   :  { %v3045_v60 = vadd.f32 %v397_v15, %v221_v30 }
 0x161   :  { %v466_v32 = vpop.f32.mrb[4].mxu0 }
 0x162   :  { %v3011_v34 = vadd.f32 %v466_v32, %v225_v25  ;;  %v543_v35 = vpop.f32.mrb[4].mxu1  ;;  %v468_v36 = vpop.f32.mrb[5].mxu0 }
 0x163   :  { %v3017_v39 = vadd.f32 %v543_v35, %v233_v28  ;;  %v3019_v40 = vadd.f32 %v468_v36, %v229_v29  ;;  %v545_v41 = vpop.f32.mrb[5].mxu1 }
 0x164   :  { %v3023_v43 = vadd.f32 %v545_v41, %v237_v31  ;;  %v595_v44 = vmax.f32 %v3009_v33, %v3011_v34 }
 0x165   :  { %v472_v45 = vpop.f32.mrb[6].mxu0  ;;  %v596_v46 = vmax.f32 %v3015_v38, %v3019_v40  ;;  %v597_v47 = vmax.f32 %v3013_v37, %v3017_v39 }
 0x166   :  { %v3035_v51 = vadd.f32 %v472_v45, %v225_v25  ;;  %v549_v52 = vpop.f32.mrb[6].mxu1  ;;  %v474_v53 = vpop.f32.mrb[7].mxu0  ;;  %v598_v54 = vmax.f32 %v3021_v42, %v3023_v43 }
 0x167   :  { %v3041_v56 = vadd.f32 %v549_v52, %v233_v28  ;;  %v3043_v57 = vadd.f32 %v474_v53, %v229_v29  ;;  %v551_v58 = vpop.f32.mrb[7].mxu1  ;;  %v599_v59 = vmax.f32 %v595_v44, %v596_v46 }
 0x168   :  { %v3047_v61 = vadd.f32 %v551_v58, %v237_v31  ;;  %v600_v62 = vmax.f32 %v597_v47, %v598_v54  ;;  %v604_v63 = vmax.f32 %v3031_v49, %v3035_v51 }
 0x169   :  { %v605_v1 = vmax.f32 %v3039_v55, %v3043_v57  ;;  %v606_v2 = vmax.f32 %v3033_v50, %v3041_v56 }
 0x16a   :  { %v601_v3 = vmax.f32 %v599_v59, %v600_v62  ;;  %v607_v4 = vmax.f32 %v3045_v60, %v3047_v61 }
 0x16b   :  { %v608_v5 = vmax.f32 %v604_v63, %v605_v1 }
 0x16c   :  { %602 = vmax.xlane.f32.xlu0 %v601_v3  ;;  %v609_v6 = vmax.f32 %v606_v2, %v607_v4 }
 0x16e   :  { %v610_v7 = vmax.f32 %v608_v5, %v609_v6 }
 0x170   :  { %611 = vmax.xlane.f32.xlu0 %v610_v7 }
 0x1f9   :  { %v603_v8 = vpop.xlane.xlu0 %602 }
 0x1fa   :  { %vm613_vm0 = vcmp.lt.f32.partialorder %v3009_v33, %v603_v8  ;;  %vm614_vm1 = vcmp.lt.f32.partialorder %v3015_v38, %v603_v8  ;;  %vm615_vm2 = vcmp.lt.f32.partialorder %v3013_v37, %v603_v8  ;;  %vm616_vm3 = vcmp.lt.f32.partialorder %v3021_v42, %v603_v8 }
 0x1fb   :  { %vm617_vm4 = vcmp.lt.f32.partialorder %v3011_v34, %v603_v8  ;;  %vm618_vm5 = vcmp.lt.f32.partialorder %v3019_v40, %v603_v8  ;;  %vm619_vm6 = vcmp.lt.f32.partialorder %v3017_v39, %v603_v8  ;;  %vm620_vm7 = vcmp.lt.f32.partialorder %v3023_v43, %v603_v8 }
 0x1fc   :  { %v621_v9 = vsel %vm613_vm0, %v3009_v33, -inf  ;;  %v622_v10 = vsel %vm614_vm1, %v3015_v38, -inf  ;;  %v623_v12 = vsel %vm615_vm2, %v3013_v37, -inf  ;;  %v624_v13 = vsel %vm616_vm3, %v3021_v42, -inf }
 0x1fd   :  { %v612_v14 = vpop.xlane.xlu0 %611  ;;  %v625_v15 = vsel %vm617_vm4, %v3011_v34, -inf  ;;  %v626_v16 = vsel %vm618_vm5, %v3019_v40, -inf  ;;  %v627_v17 = vsel %vm619_vm6, %v3017_v39, -inf  ;;  %v628_v18 = vsel %vm620_vm7, %v3023_v43, -inf }
 0x1fe   :  { %v629_v48 = vmax.f32 %v621_v9, %v625_v15  ;;  %v630_v19 = vmax.f32 %v622_v10, %v626_v16  ;;  %v631_v20 = vmax.f32 %v623_v12, %v627_v17  ;;  %v632_v21 = vmax.f32 %v624_v13, %v628_v18 }
 0x1ff   :  { %vm638_vm8 = vcmp.lt.f32.partialorder %v3031_v49, %v612_v14  ;;  %vm639_vm9 = vcmp.lt.f32.partialorder %v3039_v55, %v612_v14  ;;  %vm640_vm10 = vcmp.lt.f32.partialorder %v3033_v50, %v612_v14  ;;  %vm641_vm11 = vcmp.lt.f32.partialorder %v3045_v60, %v612_v14 }
 0x200   :  { %v633_v0 = vmax.f32 %v629_v48, %v630_v19  ;;  %v634_v22 = vmax.f32 %v631_v20, %v632_v21  ;;  %vm642_vm12 = vcmp.lt.f32.partialorder %v3035_v51, %v612_v14  ;;  %vm643_vm13 = vcmp.lt.f32.partialorder %v3043_v57, %v612_v14 }
 0x201   :  { %vm644_vm14 = vcmp.lt.f32.partialorder %v3041_v56, %v612_v14  ;;  %vm645_vm15 = vcmp.lt.f32.partialorder %v3047_v61, %v612_v14  ;;  %v646_v23 = vsel %vm638_vm8, %v3031_v49, -inf  ;;  %v647_v24 = vsel %vm639_vm9, %v3039_v55, -inf }
 0x202   :  { %v635_v11 = vmax.f32 %v633_v0, %v634_v22  ;;  %v648_v25 = vsel %vm640_vm10, %v3033_v50, -inf  ;;  %v649_v26 = vsel %vm641_vm11, %v3045_v60, -inf  ;;  %v650_v27 = vsel %vm642_vm12, %v3035_v51, -inf }
 0x203   :  { %v651_v28 = vsel %vm643_vm13, %v3043_v57, -inf  ;;  %v652_v29 = vsel %vm644_vm14, %v3041_v56, -inf  ;;  %v653_v30 = vsel %vm645_vm15, %v3047_v61, -inf  ;;  %v654_v31 = vmax.f32 %v646_v23, %v650_v27 }
 0x204   :  { %636 = vmax.xlane.f32.xlu1 %v635_v11  ;;  %v655_v32 = vmax.f32 %v647_v24, %v651_v28  ;;  %v656_v35 = vmax.f32 %v648_v25, %v652_v29  ;;  %v657_v36 = vmax.f32 %v649_v26, %v653_v30 }
 0x206   :  { %v658_v41 = vmax.f32 %v654_v31, %v655_v32  ;;  %v659_v44 = vmax.f32 %v656_v35, %v657_v36 }
 0x208   :  { %v660_v45 = vmax.f32 %v658_v41, %v659_v44 }
 0x20a   :  { %661 = vmax.xlane.f32.xlu1 %v660_v45 }
 0x291   :  { %v637_v46 = vpop.xlane.xlu1 %636 }
 0x292   :  { %vm663_vm0 = vcmp.lt.f32.partialorder %v3009_v33, %v637_v46  ;;  %vm664_vm1 = vcmp.lt.f32.partialorder %v3015_v38, %v637_v46  ;;  %vm665_vm2 = vcmp.lt.f32.partialorder %v3013_v37, %v637_v46  ;;  %vm666_vm3 = vcmp.lt.f32.partialorder %v3021_v42, %v637_v46 }
 0x293   :  { %vm667_vm4 = vcmp.lt.f32.partialorder %v3011_v34, %v637_v46  ;;  %vm668_vm5 = vcmp.lt.f32.partialorder %v3019_v40, %v637_v46  ;;  %vm669_vm6 = vcmp.lt.f32.partialorder %v3017_v39, %v637_v46  ;;  %vm670_vm7 = vcmp.lt.f32.partialorder %v3023_v43, %v637_v46 }
 0x294   :  { %v671_v47 = vsel %vm663_vm0, %v3009_v33, -inf  ;;  %v672_v52 = vsel %vm664_vm1, %v3015_v38, -inf  ;;  %v673_v53 = vsel %vm665_vm2, %v3013_v37, -inf  ;;  %v674_v54 = vsel %vm666_vm3, %v3021_v42, -inf }
 0x295   :  { %v675_v58 = vsel %vm667_vm4, %v3011_v34, -inf  ;;  %v676_v59 = vsel %vm668_vm5, %v3019_v40, -inf  ;;  %v677_v62 = vsel %vm669_vm6, %v3017_v39, -inf  ;;  %v678_v63 = vsel %vm670_vm7, %v3023_v43, -inf }
 0x296   :  { %v679_v1 = vmax.f32 %v671_v47, %v675_v58  ;;  %v680_v2 = vmax.f32 %v672_v52, %v676_v59  ;;  %v681_v3 = vmax.f32 %v673_v53, %v677_v62  ;;  %v682_v4 = vmax.f32 %v674_v54, %v678_v63 }
 0x297   :  { %v662_v5 = vpop.xlane.xlu1 %661 }
 0x298   :  { %v683_v6 = vmax.f32 %v679_v1, %v680_v2  ;;  %v684_v7 = vmax.f32 %v681_v3, %v682_v4  ;;  %vm688_vm8 = vcmp.lt.f32.partialorder %v3031_v49, %v662_v5  ;;  %vm689_vm9 = vcmp.lt.f32.partialorder %v3039_v55, %v662_v5 }
 0x299   :  { %vm690_vm10 = vcmp.lt.f32.partialorder %v3033_v50, %v662_v5  ;;  %vm691_vm11 = vcmp.lt.f32.partialorder %v3045_v60, %v662_v5  ;;  %vm692_vm12 = vcmp.lt.f32.partialorder %v3035_v51, %v662_v5  ;;  %vm693_vm13 = vcmp.lt.f32.partialorder %v3043_v57, %v662_v5 }
 0x29a   :  { %v685_v8 = vmax.f32 %v683_v6, %v684_v7  ;;  %vm694_vm14 = vcmp.lt.f32.partialorder %v3041_v56, %v662_v5  ;;  %vm695_vm15 = vcmp.lt.f32.partialorder %v3047_v61, %v662_v5  ;;  %v696_v9 = vsel %vm688_vm8, %v3031_v49, -inf }
 0x29b   :  { %v697_v10 = vsel %vm689_vm9, %v3039_v55, -inf  ;;  %v698_v12 = vsel %vm690_vm10, %v3033_v50, -inf  ;;  %v699_v13 = vsel %vm691_vm11, %v3045_v60, -inf  ;;  %v700_v14 = vsel %vm692_vm12, %v3035_v51, -inf }
 0x29c   :  { %686 = vmax.xlane.f32.xlu0 %v685_v8  ;;  %v701_v15 = vsel %vm693_vm13, %v3043_v57, -inf  ;;  %v702_v16 = vsel %vm694_vm14, %v3041_v56, -inf  ;;  %v703_v17 = vsel %vm695_vm15, %v3047_v61, -inf  ;;  %v704_v18 = vmax.f32 %v696_v9, %v700_v14 }
 0x29d   :  { %v705_v48 = vmax.f32 %v697_v10, %v701_v15  ;;  %v706_v19 = vmax.f32 %v698_v12, %v702_v16  ;;  %v707_v20 = vmax.f32 %v699_v13, %v703_v17 }
 0x29f   :  { %v708_v21 = vmax.f32 %v704_v18, %v705_v48  ;;  %v709_v0 = vmax.f32 %v706_v19, %v707_v20 }
 0x2a1   :  { %v710_v22 = vmax.f32 %v708_v21, %v709_v0 }
 0x2a3   :  { %711 = vmax.xlane.f32.xlu1 %v710_v22 }
 0x329   :  { %v687_v23 = vpop.xlane.xlu0 %686 }
 0x32a   :  { %vm713_vm0 = vcmp.lt.f32.partialorder %v3009_v33, %v687_v23  ;;  %vm714_vm1 = vcmp.lt.f32.partialorder %v3015_v38, %v687_v23  ;;  %vm715_vm2 = vcmp.lt.f32.partialorder %v3013_v37, %v687_v23  ;;  %vm716_vm3 = vcmp.lt.f32.partialorder %v3021_v42, %v687_v23 }
 0x32b   :  { %vm717_vm4 = vcmp.lt.f32.partialorder %v3011_v34, %v687_v23  ;;  %vm718_vm5 = vcmp.lt.f32.partialorder %v3019_v40, %v687_v23  ;;  %vm719_vm6 = vcmp.lt.f32.partialorder %v3017_v39, %v687_v23  ;;  %vm720_vm7 = vcmp.lt.f32.partialorder %v3023_v43, %v687_v23 }
 0x32c   :  { %v721_v24 = vsel %vm713_vm0, %v3009_v33, -inf  ;;  %v722_v11 = vsel %vm714_vm1, %v3015_v38, -inf  ;;  %v723_v25 = vsel %vm715_vm2, %v3013_v37, -inf  ;;  %v724_v26 = vsel %vm716_vm3, %v3021_v42, -inf }
 0x32d   :  { %v725_v27 = vsel %vm717_vm4, %v3011_v34, -inf  ;;  %v726_v28 = vsel %vm718_vm5, %v3019_v40, -inf  ;;  %v727_v29 = vsel %vm719_vm6, %v3017_v39, -inf  ;;  %v728_v30 = vsel %vm720_vm7, %v3023_v43, -inf }
 0x32e   :  { %v729_v31 = vmax.f32 %v721_v24, %v725_v27  ;;  %v730_v32 = vmax.f32 %v722_v11, %v726_v28  ;;  %v731_v35 = vmax.f32 %v723_v25, %v727_v29  ;;  %v732_v36 = vmax.f32 %v724_v26, %v728_v30 }
 0x330   :  { %v712_v41 = vpop.xlane.xlu1 %711  ;;  %v733_v44 = vmax.f32 %v729_v31, %v730_v32  ;;  %v734_v45 = vmax.f32 %v731_v35, %v732_v36 }
 0x331   :  { %vm738_vm8 = vcmp.lt.f32.partialorder %v3031_v49, %v712_v41  ;;  %vm739_vm9 = vcmp.lt.f32.partialorder %v3039_v55, %v712_v41  ;;  %vm740_vm10 = vcmp.lt.f32.partialorder %v3033_v50, %v712_v41  ;;  %vm741_vm11 = vcmp.lt.f32.partialorder %v3045_v60, %v712_v41 }
 0x332   :  { %v735_v46 = vmax.f32 %v733_v44, %v734_v45  ;;  %vm742_vm12 = vcmp.lt.f32.partialorder %v3035_v51, %v712_v41  ;;  %vm743_vm13 = vcmp.lt.f32.partialorder %v3043_v57, %v712_v41  ;;  %vm744_vm14 = vcmp.lt.f32.partialorder %v3041_v56, %v712_v41 }
 0x333   :  { %vm745_vm15 = vcmp.lt.f32.partialorder %v3047_v61, %v712_v41  ;;  %v746_v47 = vsel %vm738_vm8, %v3031_v49, -inf  ;;  %v747_v52 = vsel %vm739_vm9, %v3039_v55, -inf  ;;  %v748_v53 = vsel %vm740_vm10, %v3033_v50, -inf }
 0x334   :  { %736 = vmax.xlane.f32.xlu0 %v735_v46  ;;  %v749_v54 = vsel %vm741_vm11, %v3045_v60, -inf  ;;  %v750_v58 = vsel %vm742_vm12, %v3035_v51, -inf  ;;  %v751_v59 = vsel %vm743_vm13, %v3043_v57, -inf  ;;  %v752_v62 = vsel %vm744_vm14, %v3041_v56, -inf }
 0x335   :  { %v753_v63 = vsel %vm745_vm15, %v3047_v61, -inf  ;;  %v754_v1 = vmax.f32 %v746_v47, %v750_v58  ;;  %v755_v2 = vmax.f32 %v747_v52, %v751_v59  ;;  %v756_v3 = vmax.f32 %v748_v53, %v752_v62 }
 0x336   :  { %v757_v4 = vmax.f32 %v749_v54, %v753_v63 }
 0x337   :  { %v758_v5 = vmax.f32 %v754_v1, %v755_v2 }
 0x338   :  { %v759_v6 = vmax.f32 %v756_v3, %v757_v4 }
 0x33a   :  { %v760_v7 = vmax.f32 %v758_v5, %v759_v6 }
 0x33c   :  { %761 = vmax.xlane.f32.xlu1 %v760_v7 }
 0x3c1   :  { %v737_v8 = vpop.xlane.xlu0 %736 }
 0x3c2   :  { %vm763_vm0 = vcmp.lt.f32.partialorder %v3009_v33, %v737_v8  ;;  %vm764_vm1 = vcmp.lt.f32.partialorder %v3015_v38, %v737_v8  ;;  %vm765_vm2 = vcmp.lt.f32.partialorder %v3013_v37, %v737_v8  ;;  %vm766_vm3 = vcmp.lt.f32.partialorder %v3021_v42, %v737_v8 }
 0x3c3   :  { %vm767_vm4 = vcmp.lt.f32.partialorder %v3011_v34, %v737_v8  ;;  %vm768_vm5 = vcmp.lt.f32.partialorder %v3019_v40, %v737_v8  ;;  %vm769_vm6 = vcmp.lt.f32.partialorder %v3017_v39, %v737_v8  ;;  %vm770_vm7 = vcmp.lt.f32.partialorder %v3023_v43, %v737_v8 }
 0x3c4   :  { %v771_v9 = vsel %vm763_vm0, %v3009_v33, -inf  ;;  %v772_v10 = vsel %vm764_vm1, %v3015_v38, -inf  ;;  %v773_v12 = vsel %vm765_vm2, %v3013_v37, -inf  ;;  %v774_v13 = vsel %vm766_vm3, %v3021_v42, -inf }
 0x3c5   :  { %v775_v14 = vsel %vm767_vm4, %v3011_v34, -inf  ;;  %v776_v15 = vsel %vm768_vm5, %v3019_v40, -inf  ;;  %v777_v16 = vsel %vm769_vm6, %v3017_v39, -inf  ;;  %v778_v17 = vsel %vm770_vm7, %v3023_v43, -inf }
 0x3c6   :  { %v779_v18 = vmax.f32 %v771_v9, %v775_v14  ;;  %v780_v48 = vmax.f32 %v772_v10, %v776_v15  ;;  %v781_v19 = vmax.f32 %v773_v12, %v777_v16  ;;  %v782_v20 = vmax.f32 %v774_v13, %v778_v17 }
 0x3c8   :  { %v783_v21 = vmax.f32 %v779_v18, %v780_v48  ;;  %v784_v0 = vmax.f32 %v781_v19, %v782_v20 }
 0x3c9   :  { %v762_v22 = vpop.xlane.xlu1 %761 }
 0x3ca   :  { %v785_v23 = vmax.f32 %v783_v21, %v784_v0  ;;  %vm788_vm8 = vcmp.lt.f32.partialorder %v3031_v49, %v762_v22  ;;  %vm789_vm9 = vcmp.lt.f32.partialorder %v3039_v55, %v762_v22  ;;  %vm790_vm10 = vcmp.lt.f32.partialorder %v3033_v50, %v762_v22 }
 0x3cb   :  { %vm791_vm11 = vcmp.lt.f32.partialorder %v3045_v60, %v762_v22  ;;  %vm792_vm12 = vcmp.lt.f32.partialorder %v3035_v51, %v762_v22  ;;  %vm793_vm13 = vcmp.lt.f32.partialorder %v3043_v57, %v762_v22  ;;  %vm794_vm14 = vcmp.lt.f32.partialorder %v3041_v56, %v762_v22 }
 0x3cc   :  { %786 = vmax.xlane.f32.xlu0 %v785_v23  ;;  %vm795_vm15 = vcmp.lt.f32.partialorder %v3047_v61, %v762_v22  ;;  %v796_v24 = vsel %vm788_vm8, %v3031_v49, -inf  ;;  %v797_v11 = vsel %vm789_vm9, %v3039_v55, -inf  ;;  %v798_v25 = vsel %vm790_vm10, %v3033_v50, -inf }
 0x3cd   :  { %v799_v26 = vsel %vm791_vm11, %v3045_v60, -inf  ;;  %v800_v27 = vsel %vm792_vm12, %v3035_v51, -inf  ;;  %v801_v28 = vsel %vm793_vm13, %v3043_v57, -inf  ;;  %v802_v29 = vsel %vm794_vm14, %v3041_v56, -inf }
 0x3ce   :  { %v803_v30 = vsel %vm795_vm15, %v3047_v61, -inf  ;;  %v804_v31 = vmax.f32 %v796_v24, %v800_v27  ;;  %v805_v32 = vmax.f32 %v797_v11, %v801_v28  ;;  %v806_v35 = vmax.f32 %v798_v25, %v802_v29 }
 0x3cf   :  { %v807_v36 = vmax.f32 %v799_v26, %v803_v30 }
 0x3d0   :  { %v808_v41 = vmax.f32 %v804_v31, %v805_v32 }
 0x3d1   :  { %v809_v44 = vmax.f32 %v806_v35, %v807_v36 }
 0x3d3   :  { %v810_v45 = vmax.f32 %v808_v41, %v809_v44 }
 0x3d5   :  { %811 = vmax.xlane.f32.xlu1 %v810_v45 }
 0x459   :  { %v787_v46 = vpop.xlane.xlu0 %786 }
 0x45a   :  { %vm813_vm0 = vcmp.lt.f32.partialorder %v3009_v33, %v787_v46  ;;  %vm814_vm1 = vcmp.lt.f32.partialorder %v3015_v38, %v787_v46  ;;  %vm815_vm2 = vcmp.lt.f32.partialorder %v3013_v37, %v787_v46  ;;  %vm816_vm3 = vcmp.lt.f32.partialorder %v3021_v42, %v787_v46 }
 0x45b   :  { %vm817_vm4 = vcmp.lt.f32.partialorder %v3011_v34, %v787_v46  ;;  %vm818_vm5 = vcmp.lt.f32.partialorder %v3019_v40, %v787_v46  ;;  %vm819_vm6 = vcmp.lt.f32.partialorder %v3017_v39, %v787_v46  ;;  %vm820_vm7 = vcmp.lt.f32.partialorder %v3023_v43, %v787_v46 }
 0x45c   :  { %v821_v47 = vsel %vm813_vm0, %v3009_v33, -inf  ;;  %v822_v52 = vsel %vm814_vm1, %v3015_v38, -inf  ;;  %v823_v53 = vsel %vm815_vm2, %v3013_v37, -inf  ;;  %v824_v54 = vsel %vm816_vm3, %v3021_v42, -inf }
 0x45d   :  { %v825_v58 = vsel %vm817_vm4, %v3011_v34, -inf  ;;  %v826_v59 = vsel %vm818_vm5, %v3019_v40, -inf  ;;  %v827_v62 = vsel %vm819_vm6, %v3017_v39, -inf  ;;  %v828_v63 = vsel %vm820_vm7, %v3023_v43, -inf }
 0x45e   :  { %v829_v1 = vmax.f32 %v821_v47, %v825_v58  ;;  %v830_v2 = vmax.f32 %v822_v52, %v826_v59  ;;  %v831_v3 = vmax.f32 %v823_v53, %v827_v62  ;;  %v832_v4 = vmax.f32 %v824_v54, %v828_v63 }
 0x460   :  { %v833_v5 = vmax.f32 %v829_v1, %v830_v2  ;;  %v834_v6 = vmax.f32 %v831_v3, %v832_v4 }
 0x462   :  { %v812_v7 = vpop.xlane.xlu1 %811  ;;  %v835_v8 = vmax.f32 %v833_v5, %v834_v6 }
 0x463   :  { %vm838_vm8 = vcmp.lt.f32.partialorder %v3031_v49, %v812_v7  ;;  %vm839_vm9 = vcmp.lt.f32.partialorder %v3039_v55, %v812_v7  ;;  %vm840_vm10 = vcmp.lt.f32.partialorder %v3033_v50, %v812_v7  ;;  %vm841_vm11 = vcmp.lt.f32.partialorder %v3045_v60, %v812_v7 }
 0x464   :  { %836 = vmax.xlane.f32.xlu0 %v835_v8  ;;  %vm842_vm12 = vcmp.lt.f32.partialorder %v3035_v51, %v812_v7  ;;  %vm843_vm13 = vcmp.lt.f32.partialorder %v3043_v57, %v812_v7  ;;  %vm844_vm14 = vcmp.lt.f32.partialorder %v3041_v56, %v812_v7  ;;  %vm845_vm15 = vcmp.lt.f32.partialorder %v3047_v61, %v812_v7 }
 0x465   :  { %v846_v9 = vsel %vm838_vm8, %v3031_v49, -inf  ;;  %v847_v10 = vsel %vm839_vm9, %v3039_v55, -inf  ;;  %v848_v12 = vsel %vm840_vm10, %v3033_v50, -inf  ;;  %v849_v13 = vsel %vm841_vm11, %v3045_v60, -inf }
 0x466   :  { %v850_v14 = vsel %vm842_vm12, %v3035_v51, -inf  ;;  %v851_v15 = vsel %vm843_vm13, %v3043_v57, -inf  ;;  %v852_v16 = vsel %vm844_vm14, %v3041_v56, -inf  ;;  %v853_v17 = vsel %vm845_vm15, %v3047_v61, -inf }
 0x467   :  { %v854_v18 = vmax.f32 %v846_v9, %v850_v14  ;;  %v855_v48 = vmax.f32 %v847_v10, %v851_v15  ;;  %v856_v19 = vmax.f32 %v848_v12, %v852_v16  ;;  %v857_v20 = vmax.f32 %v849_v13, %v853_v17 }
 0x469   :  { %v858_v21 = vmax.f32 %v854_v18, %v855_v48  ;;  %v859_v0 = vmax.f32 %v856_v19, %v857_v20 }
 0x46b   :  { %v860_v22 = vmax.f32 %v858_v21, %v859_v0 }
 0x46d   :  { %861 = vmax.xlane.f32.xlu1 %v860_v22 }
 0x4f1   :  { %v837_v23 = vpop.xlane.xlu0 %836 }
 0x4f2   :  { %vm863_vm0 = vcmp.lt.f32.partialorder %v3009_v33, %v837_v23  ;;  %vm864_vm1 = vcmp.lt.f32.partialorder %v3015_v38, %v837_v23  ;;  %vm865_vm2 = vcmp.lt.f32.partialorder %v3013_v37, %v837_v23  ;;  %vm866_vm3 = vcmp.lt.f32.partialorder %v3021_v42, %v837_v23 }
 0x4f3   :  { %vm867_vm4 = vcmp.lt.f32.partialorder %v3011_v34, %v837_v23  ;;  %vm868_vm5 = vcmp.lt.f32.partialorder %v3019_v40, %v837_v23  ;;  %vm869_vm6 = vcmp.lt.f32.partialorder %v3017_v39, %v837_v23  ;;  %vm870_vm7 = vcmp.lt.f32.partialorder %v3023_v43, %v837_v23 }
 0x4f4   :  { %v871_v24 = vsel %vm863_vm0, %v3009_v33, -inf  ;;  %v872_v11 = vsel %vm864_vm1, %v3015_v38, -inf  ;;  %v873_v25 = vsel %vm865_vm2, %v3013_v37, -inf  ;;  %v874_v26 = vsel %vm866_vm3, %v3021_v42, -inf }
 0x4f5   :  { %v875_v27 = vsel %vm867_vm4, %v3011_v34, -inf  ;;  %v876_v28 = vsel %vm868_vm5, %v3019_v40, -inf  ;;  %v877_v29 = vsel %vm869_vm6, %v3017_v39, -inf  ;;  %v878_v30 = vsel %vm870_vm7, %v3023_v43, -inf }
 0x4f6   :  { %v879_v31 = vmax.f32 %v871_v24, %v875_v27  ;;  %v880_v32 = vmax.f32 %v872_v11, %v876_v28  ;;  %v881_v35 = vmax.f32 %v873_v25, %v877_v29  ;;  %v882_v36 = vmax.f32 %v874_v26, %v878_v30 }
 0x4f8   :  { %v883_v41 = vmax.f32 %v879_v31, %v880_v32  ;;  %v884_v44 = vmax.f32 %v881_v35, %v882_v36 }
 0x4fa   :  { %v862_v45 = vpop.xlane.xlu1 %861  ;;  %v885_v46 = vmax.f32 %v883_v41, %v884_v44 }
 0x4fb   :  { %vm888_vm8 = vcmp.lt.f32.partialorder %v3031_v49, %v862_v45  ;;  %vm889_vm9 = vcmp.lt.f32.partialorder %v3039_v55, %v862_v45  ;;  %vm890_vm10 = vcmp.lt.f32.partialorder %v3033_v50, %v862_v45  ;;  %vm891_vm11 = vcmp.lt.f32.partialorder %v3045_v60, %v862_v45 }
 0x4fc   :  { %886 = vmax.xlane.f32.xlu0 %v885_v46  ;;  %vm892_vm12 = vcmp.lt.f32.partialorder %v3035_v51, %v862_v45  ;;  %vm893_vm13 = vcmp.lt.f32.partialorder %v3043_v57, %v862_v45  ;;  %vm894_vm14 = vcmp.lt.f32.partialorder %v3041_v56, %v862_v45  ;;  %vm895_vm15 = vcmp.lt.f32.partialorder %v3047_v61, %v862_v45 }
 0x4fd   :  { %v896_v47 = vsel %vm888_vm8, %v3031_v49, -inf  ;;  %v897_v52 = vsel %vm889_vm9, %v3039_v55, -inf  ;;  %v898_v53 = vsel %vm890_vm10, %v3033_v50, -inf  ;;  %v899_v54 = vsel %vm891_vm11, %v3045_v60, -inf }
 0x4fe   :  { %v900_v58 = vsel %vm892_vm12, %v3035_v51, -inf  ;;  %v901_v59 = vsel %vm893_vm13, %v3043_v57, -inf  ;;  %v902_v62 = vsel %vm894_vm14, %v3041_v56, -inf  ;;  %v903_v63 = vsel %vm895_vm15, %v3047_v61, -inf }
 0x4ff   :  { %v904_v1 = vmax.f32 %v896_v47, %v900_v58  ;;  %v905_v2 = vmax.f32 %v897_v52, %v901_v59  ;;  %v906_v3 = vmax.f32 %v898_v53, %v902_v62  ;;  %v907_v4 = vmax.f32 %v899_v54, %v903_v63 }
 0x501   :  { %v908_v5 = vmax.f32 %v904_v1, %v905_v2  ;;  %v909_v6 = vmax.f32 %v906_v3, %v907_v4 }
 0x503   :  { %v910_v7 = vmax.f32 %v908_v5, %v909_v6 }
 0x505   :  { %911 = vmax.xlane.f32.xlu1 %v910_v7 }
 0x589   :  { %v887_v8 = vpop.xlane.xlu0 %886 }
 0x58a   :  { %vm913_vm0 = vcmp.lt.f32.partialorder %v3009_v33, %v887_v8  ;;  %vm914_vm1 = vcmp.lt.f32.partialorder %v3015_v38, %v887_v8  ;;  %vm915_vm2 = vcmp.lt.f32.partialorder %v3013_v37, %v887_v8  ;;  %vm916_vm3 = vcmp.lt.f32.partialorder %v3021_v42, %v887_v8 }
 0x58b   :  { %vm917_vm4 = vcmp.lt.f32.partialorder %v3011_v34, %v887_v8  ;;  %vm918_vm5 = vcmp.lt.f32.partialorder %v3019_v40, %v887_v8  ;;  %vm919_vm6 = vcmp.lt.f32.partialorder %v3017_v39, %v887_v8  ;;  %vm920_vm7 = vcmp.lt.f32.partialorder %v3023_v43, %v887_v8 }
 0x58c   :  { %v921_v9 = vsel %vm913_vm0, %v3009_v33, -inf  ;;  %v922_v10 = vsel %vm914_vm1, %v3015_v38, -inf  ;;  %v923_v12 = vsel %vm915_vm2, %v3013_v37, -inf  ;;  %v924_v13 = vsel %vm916_vm3, %v3021_v42, -inf }
 0x58d   :  { %v925_v14 = vsel %vm917_vm4, %v3011_v34, -inf  ;;  %v926_v15 = vsel %vm918_vm5, %v3019_v40, -inf  ;;  %v927_v16 = vsel %vm919_vm6, %v3017_v39, -inf  ;;  %v928_v17 = vsel %vm920_vm7, %v3023_v43, -inf }
 0x58e   :  { %v929_v18 = vmax.f32 %v921_v9, %v925_v14  ;;  %v930_v48 = vmax.f32 %v922_v10, %v926_v15  ;;  %v931_v19 = vmax.f32 %v923_v12, %v927_v16  ;;  %v932_v20 = vmax.f32 %v924_v13, %v928_v17 }
 0x590   :  { %v933_v21 = vmax.f32 %v929_v18, %v930_v48  ;;  %v934_v0 = vmax.f32 %v931_v19, %v932_v20 }
 0x592   :  { %v912_v22 = vpop.xlane.xlu1 %911  ;;  %v935_v23 = vmax.f32 %v933_v21, %v934_v0 }
 0x593   :  { %vm938_vm8 = vcmp.lt.f32.partialorder %v3031_v49, %v912_v22  ;;  %vm939_vm9 = vcmp.lt.f32.partialorder %v3039_v55, %v912_v22  ;;  %vm940_vm10 = vcmp.lt.f32.partialorder %v3033_v50, %v912_v22  ;;  %vm941_vm11 = vcmp.lt.f32.partialorder %v3045_v60, %v912_v22 }
 0x594   :  { %936 = vmax.xlane.f32.xlu0 %v935_v23  ;;  %vm942_vm12 = vcmp.lt.f32.partialorder %v3035_v51, %v912_v22  ;;  %vm943_vm13 = vcmp.lt.f32.partialorder %v3043_v57, %v912_v22  ;;  %vm944_vm14 = vcmp.lt.f32.partialorder %v3041_v56, %v912_v22  ;;  %vm945_vm15 = vcmp.lt.f32.partialorder %v3047_v61, %v912_v22 }
 0x595   :  { %v946_v24 = vsel %vm938_vm8, %v3031_v49, -inf  ;;  %v947_v11 = vsel %vm939_vm9, %v3039_v55, -inf  ;;  %v948_v25 = vsel %vm940_vm10, %v3033_v50, -inf  ;;  %v949_v26 = vsel %vm941_vm11, %v3045_v60, -inf }
 0x596   :  { %v950_v27 = vsel %vm942_vm12, %v3035_v51, -inf  ;;  %v951_v28 = vsel %vm943_vm13, %v3043_v57, -inf  ;;  %v952_v29 = vsel %vm944_vm14, %v3041_v56, -inf  ;;  %v953_v30 = vsel %vm945_vm15, %v3047_v61, -inf }
 0x597   :  { %v954_v31 = vmax.f32 %v946_v24, %v950_v27  ;;  %v955_v32 = vmax.f32 %v947_v11, %v951_v28  ;;  %v956_v35 = vmax.f32 %v948_v25, %v952_v29  ;;  %v957_v36 = vmax.f32 %v949_v26, %v953_v30 }
 0x599   :  { %v958_v41 = vmax.f32 %v954_v31, %v955_v32  ;;  %v959_v44 = vmax.f32 %v956_v35, %v957_v36 }
 0x59b   :  { %v960_v45 = vmax.f32 %v958_v41, %v959_v44 }
 0x59d   :  { %961 = vmax.xlane.f32.xlu1 %v960_v45 }
 0x621   :  { %v937_v46 = vpop.xlane.xlu0 %936 }
 0x622   :  { %vm963_vm0 = vcmp.lt.f32.partialorder %v3009_v33, %v937_v46  ;;  %vm964_vm1 = vcmp.lt.f32.partialorder %v3015_v38, %v937_v46  ;;  %vm965_vm2 = vcmp.lt.f32.partialorder %v3013_v37, %v937_v46  ;;  %vm966_vm3 = vcmp.lt.f32.partialorder %v3021_v42, %v937_v46 }
 0x623   :  { %vm967_vm4 = vcmp.lt.f32.partialorder %v3011_v34, %v937_v46  ;;  %vm968_vm5 = vcmp.lt.f32.partialorder %v3019_v40, %v937_v46  ;;  %vm969_vm6 = vcmp.lt.f32.partialorder %v3017_v39, %v937_v46  ;;  %vm970_vm7 = vcmp.lt.f32.partialorder %v3023_v43, %v937_v46 }
 0x624   :  { %v971_v47 = vsel %vm963_vm0, %v3009_v33, -inf  ;;  %v972_v52 = vsel %vm964_vm1, %v3015_v38, -inf  ;;  %v973_v53 = vsel %vm965_vm2, %v3013_v37, -inf  ;;  %v974_v54 = vsel %vm966_vm3, %v3021_v42, -inf }
 0x625   :  { %v975_v58 = vsel %vm967_vm4, %v3011_v34, -inf  ;;  %v976_v59 = vsel %vm968_vm5, %v3019_v40, -inf  ;;  %v977_v62 = vsel %vm969_vm6, %v3017_v39, -inf  ;;  %v978_v63 = vsel %vm970_vm7, %v3023_v43, -inf }
 0x626   :  { %v979_v1 = vmax.f32 %v971_v47, %v975_v58  ;;  %v980_v2 = vmax.f32 %v972_v52, %v976_v59  ;;  %v981_v3 = vmax.f32 %v973_v53, %v977_v62  ;;  %v982_v4 = vmax.f32 %v974_v54, %v978_v63 }
 0x628   :  { %v983_v5 = vmax.f32 %v979_v1, %v980_v2  ;;  %v984_v6 = vmax.f32 %v981_v3, %v982_v4 }
 0x62a   :  { %v962_v7 = vpop.xlane.xlu1 %961  ;;  %v985_v8 = vmax.f32 %v983_v5, %v984_v6 }
 0x62b   :  { %vm988_vm8 = vcmp.lt.f32.partialorder %v3031_v49, %v962_v7  ;;  %vm989_vm9 = vcmp.lt.f32.partialorder %v3039_v55, %v962_v7  ;;  %vm990_vm10 = vcmp.lt.f32.partialorder %v3033_v50, %v962_v7  ;;  %vm991_vm11 = vcmp.lt.f32.partialorder %v3045_v60, %v962_v7 }
 0x62c   :  { %986 = vmax.xlane.f32.xlu0 %v985_v8  ;;  %vm992_vm12 = vcmp.lt.f32.partialorder %v3035_v51, %v962_v7  ;;  %vm993_vm13 = vcmp.lt.f32.partialorder %v3043_v57, %v962_v7  ;;  %vm994_vm14 = vcmp.lt.f32.partialorder %v3041_v56, %v962_v7  ;;  %vm995_vm15 = vcmp.lt.f32.partialorder %v3047_v61, %v962_v7 }
 0x62d   :  { %v996_v9 = vsel %vm988_vm8, %v3031_v49, -inf  ;;  %v997_v10 = vsel %vm989_vm9, %v3039_v55, -inf  ;;  %v998_v12 = vsel %vm990_vm10, %v3033_v50, -inf  ;;  %v999_v13 = vsel %vm991_vm11, %v3045_v60, -inf }
 0x62e   :  { %v1000_v14 = vsel %vm992_vm12, %v3035_v51, -inf  ;;  %v1001_v15 = vsel %vm993_vm13, %v3043_v57, -inf  ;;  %v1002_v16 = vsel %vm994_vm14, %v3041_v56, -inf  ;;  %v1003_v17 = vsel %vm995_vm15, %v3047_v61, -inf }
 0x62f   :  { %v1004_v18 = vmax.f32 %v996_v9, %v1000_v14  ;;  %v1005_v48 = vmax.f32 %v997_v10, %v1001_v15  ;;  %v1006_v19 = vmax.f32 %v998_v12, %v1002_v16  ;;  %v1007_v20 = vmax.f32 %v999_v13, %v1003_v17 }
 0x631   :  { %v1008_v21 = vmax.f32 %v1004_v18, %v1005_v48  ;;  %v1009_v0 = vmax.f32 %v1006_v19, %v1007_v20 }
 0x633   :  { %v1010_v22 = vmax.f32 %v1008_v21, %v1009_v0 }
 0x635   :  { %1011 = vmax.xlane.f32.xlu1 %v1010_v22 }
 0x6b9   :  { %v987_v23 = vpop.xlane.xlu0 %986 }
 0x6ba   :  { %vm1013_vm0 = vcmp.lt.f32.partialorder %v3009_v33, %v987_v23  ;;  %vm1014_vm1 = vcmp.lt.f32.partialorder %v3015_v38, %v987_v23  ;;  %vm1015_vm2 = vcmp.lt.f32.partialorder %v3013_v37, %v987_v23  ;;  %vm1016_vm3 = vcmp.lt.f32.partialorder %v3021_v42, %v987_v23 }
 0x6bb   :  { %vm1017_vm4 = vcmp.lt.f32.partialorder %v3011_v34, %v987_v23  ;;  %vm1018_vm5 = vcmp.lt.f32.partialorder %v3019_v40, %v987_v23  ;;  %vm1019_vm6 = vcmp.lt.f32.partialorder %v3017_v39, %v987_v23  ;;  %vm1020_vm7 = vcmp.lt.f32.partialorder %v3023_v43, %v987_v23 }
 0x6bc   :  { %v1021_v24 = vsel %vm1013_vm0, %v3009_v33, -inf  ;;  %v1022_v11 = vsel %vm1014_vm1, %v3015_v38, -inf  ;;  %v1023_v25 = vsel %vm1015_vm2, %v3013_v37, -inf  ;;  %v1024_v26 = vsel %vm1016_vm3, %v3021_v42, -inf }
 0x6bd   :  { %v1025_v27 = vsel %vm1017_vm4, %v3011_v34, -inf  ;;  %v1026_v28 = vsel %vm1018_vm5, %v3019_v40, -inf  ;;  %v1027_v29 = vsel %vm1019_vm6, %v3017_v39, -inf  ;;  %v1028_v30 = vsel %vm1020_vm7, %v3023_v43, -inf }
 0x6be   :  { %v1029_v31 = vmax.f32 %v1021_v24, %v1025_v27  ;;  %v1030_v32 = vmax.f32 %v1022_v11, %v1026_v28  ;;  %v1031_v35 = vmax.f32 %v1023_v25, %v1027_v29  ;;  %v1032_v36 = vmax.f32 %v1024_v26, %v1028_v30 }
 0x6c0   :  { %v1033_v41 = vmax.f32 %v1029_v31, %v1030_v32  ;;  %v1034_v44 = vmax.f32 %v1031_v35, %v1032_v36 }
 0x6c2   :  { %v1012_v45 = vpop.xlane.xlu1 %1011  ;;  %v1035_v46 = vmax.f32 %v1033_v41, %v1034_v44 }
 0x6c3   :  { %vm1038_vm8 = vcmp.lt.f32.partialorder %v3031_v49, %v1012_v45  ;;  %vm1039_vm9 = vcmp.lt.f32.partialorder %v3039_v55, %v1012_v45  ;;  %vm1040_vm10 = vcmp.lt.f32.partialorder %v3033_v50, %v1012_v45  ;;  %vm1041_vm11 = vcmp.lt.f32.partialorder %v3045_v60, %v1012_v45 }
 0x6c4   :  { %1036 = vmax.xlane.f32.xlu0 %v1035_v46  ;;  %vm1042_vm12 = vcmp.lt.f32.partialorder %v3035_v51, %v1012_v45  ;;  %vm1043_vm13 = vcmp.lt.f32.partialorder %v3043_v57, %v1012_v45  ;;  %vm1044_vm14 = vcmp.lt.f32.partialorder %v3041_v56, %v1012_v45  ;;  %vm1045_vm15 = vcmp.lt.f32.partialorder %v3047_v61, %v1012_v45 }
 0x6c5   :  { %v1046_v47 = vsel %vm1038_vm8, %v3031_v49, -inf  ;;  %v1047_v52 = vsel %vm1039_vm9, %v3039_v55, -inf  ;;  %v1048_v53 = vsel %vm1040_vm10, %v3033_v50, -inf  ;;  %v1049_v54 = vsel %vm1041_vm11, %v3045_v60, -inf }
 0x6c6   :  { %v1050_v58 = vsel %vm1042_vm12, %v3035_v51, -inf  ;;  %v1051_v59 = vsel %vm1043_vm13, %v3043_v57, -inf  ;;  %v1052_v62 = vsel %vm1044_vm14, %v3041_v56, -inf  ;;  %v1053_v63 = vsel %vm1045_vm15, %v3047_v61, -inf }
 0x6c7   :  { %v1054_v1 = vmax.f32 %v1046_v47, %v1050_v58  ;;  %v1055_v2 = vmax.f32 %v1047_v52, %v1051_v59  ;;  %v1056_v3 = vmax.f32 %v1048_v53, %v1052_v62  ;;  %v1057_v4 = vmax.f32 %v1049_v54, %v1053_v63 }
 0x6c9   :  { %v1058_v5 = vmax.f32 %v1054_v1, %v1055_v2  ;;  %v1059_v6 = vmax.f32 %v1056_v3, %v1057_v4 }
 0x6cb   :  { %v1060_v7 = vmax.f32 %v1058_v5, %v1059_v6 }
 0x6cd   :  { %1061 = vmax.xlane.f32.xlu1 %v1060_v7 }
 0x751   :  { %v1037_v8 = vpop.xlane.xlu0 %1036 }
 0x752   :  { %vm1063_vm0 = vcmp.lt.f32.partialorder %v3009_v33, %v1037_v8  ;;  %vm1064_vm1 = vcmp.lt.f32.partialorder %v3015_v38, %v1037_v8  ;;  %vm1065_vm2 = vcmp.lt.f32.partialorder %v3013_v37, %v1037_v8  ;;  %vm1066_vm3 = vcmp.lt.f32.partialorder %v3021_v42, %v1037_v8 }
 0x753   :  { %vm1067_vm4 = vcmp.lt.f32.partialorder %v3011_v34, %v1037_v8  ;;  %vm1068_vm5 = vcmp.lt.f32.partialorder %v3019_v40, %v1037_v8  ;;  %vm1069_vm6 = vcmp.lt.f32.partialorder %v3017_v39, %v1037_v8  ;;  %vm1070_vm7 = vcmp.lt.f32.partialorder %v3023_v43, %v1037_v8 }
 0x754   :  { %v1071_v9 = vsel %vm1063_vm0, %v3009_v33, -inf  ;;  %v1072_v10 = vsel %vm1064_vm1, %v3015_v38, -inf  ;;  %v1073_v12 = vsel %vm1065_vm2, %v3013_v37, -inf  ;;  %v1074_v13 = vsel %vm1066_vm3, %v3021_v42, -inf }
 0x755   :  { %v1075_v14 = vsel %vm1067_vm4, %v3011_v34, -inf  ;;  %v1076_v15 = vsel %vm1068_vm5, %v3019_v40, -inf  ;;  %v1077_v16 = vsel %vm1069_vm6, %v3017_v39, -inf  ;;  %v1078_v17 = vsel %vm1070_vm7, %v3023_v43, -inf }
 0x756   :  { %v1079_v18 = vmax.f32 %v1071_v9, %v1075_v14  ;;  %v1080_v48 = vmax.f32 %v1072_v10, %v1076_v15  ;;  %v1081_v19 = vmax.f32 %v1073_v12, %v1077_v16  ;;  %v1082_v20 = vmax.f32 %v1074_v13, %v1078_v17 }
 0x758   :  { %v1083_v21 = vmax.f32 %v1079_v18, %v1080_v48  ;;  %v1084_v0 = vmax.f32 %v1081_v19, %v1082_v20 }
 0x75a   :  { %v1062_v22 = vpop.xlane.xlu1 %1061  ;;  %v1085_v23 = vmax.f32 %v1083_v21, %v1084_v0 }
 0x75b   :  { %vm1088_vm8 = vcmp.lt.f32.partialorder %v3031_v49, %v1062_v22  ;;  %vm1089_vm9 = vcmp.lt.f32.partialorder %v3039_v55, %v1062_v22  ;;  %vm1090_vm10 = vcmp.lt.f32.partialorder %v3033_v50, %v1062_v22  ;;  %vm1091_vm11 = vcmp.lt.f32.partialorder %v3045_v60, %v1062_v22 }
 0x75c   :  { %1086 = vmax.xlane.f32.xlu0 %v1085_v23  ;;  %vm1092_vm12 = vcmp.lt.f32.partialorder %v3035_v51, %v1062_v22  ;;  %vm1093_vm13 = vcmp.lt.f32.partialorder %v3043_v57, %v1062_v22  ;;  %vm1094_vm14 = vcmp.lt.f32.partialorder %v3041_v56, %v1062_v22  ;;  %vm1095_vm15 = vcmp.lt.f32.partialorder %v3047_v61, %v1062_v22 }
 0x75d   :  { %v1096_v24 = vsel %vm1088_vm8, %v3031_v49, -inf  ;;  %v1097_v11 = vsel %vm1089_vm9, %v3039_v55, -inf  ;;  %v1098_v25 = vsel %vm1090_vm10, %v3033_v50, -inf  ;;  %v1099_v26 = vsel %vm1091_vm11, %v3045_v60, -inf }
 0x75e   :  { %v1100_v27 = vsel %vm1092_vm12, %v3035_v51, -inf  ;;  %v1101_v28 = vsel %vm1093_vm13, %v3043_v57, -inf  ;;  %v1102_v29 = vsel %vm1094_vm14, %v3041_v56, -inf  ;;  %v1103_v30 = vsel %vm1095_vm15, %v3047_v61, -inf }
 0x75f   :  { %v1104_v31 = vmax.f32 %v1096_v24, %v1100_v27  ;;  %v1105_v32 = vmax.f32 %v1097_v11, %v1101_v28  ;;  %v1106_v35 = vmax.f32 %v1098_v25, %v1102_v29  ;;  %v1107_v36 = vmax.f32 %v1099_v26, %v1103_v30 }
 0x761   :  { %v1108_v41 = vmax.f32 %v1104_v31, %v1105_v32  ;;  %v1109_v44 = vmax.f32 %v1106_v35, %v1107_v36 }
 0x763   :  { %v1110_v45 = vmax.f32 %v1108_v41, %v1109_v44 }
 0x765   :  { %1111 = vmax.xlane.f32.xlu1 %v1110_v45 }
 0x7e9   :  { %v1087_v46 = vpop.xlane.xlu0 %1086 }
 0x7ea   :  { %vm1113_vm0 = vcmp.lt.f32.partialorder %v3009_v33, %v1087_v46  ;;  %vm1114_vm1 = vcmp.lt.f32.partialorder %v3015_v38, %v1087_v46  ;;  %vm1115_vm2 = vcmp.lt.f32.partialorder %v3013_v37, %v1087_v46  ;;  %vm1116_vm3 = vcmp.lt.f32.partialorder %v3021_v42, %v1087_v46 }
 0x7eb   :  { %vm1117_vm4 = vcmp.lt.f32.partialorder %v3011_v34, %v1087_v46  ;;  %vm1118_vm5 = vcmp.lt.f32.partialorder %v3019_v40, %v1087_v46  ;;  %vm1119_vm6 = vcmp.lt.f32.partialorder %v3017_v39, %v1087_v46  ;;  %vm1120_vm7 = vcmp.lt.f32.partialorder %v3023_v43, %v1087_v46 }
 0x7ec   :  { %v1121_v47 = vsel %vm1113_vm0, %v3009_v33, -inf  ;;  %v1122_v52 = vsel %vm1114_vm1, %v3015_v38, -inf  ;;  %v1123_v53 = vsel %vm1115_vm2, %v3013_v37, -inf  ;;  %v1124_v54 = vsel %vm1116_vm3, %v3021_v42, -inf }
 0x7ed   :  { %v1125_v58 = vsel %vm1117_vm4, %v3011_v34, -inf  ;;  %v1126_v59 = vsel %vm1118_vm5, %v3019_v40, -inf  ;;  %v1127_v62 = vsel %vm1119_vm6, %v3017_v39, -inf  ;;  %v1128_v63 = vsel %vm1120_vm7, %v3023_v43, -inf }
 0x7ee   :  { %v1129_v1 = vmax.f32 %v1121_v47, %v1125_v58  ;;  %v1130_v2 = vmax.f32 %v1122_v52, %v1126_v59  ;;  %v1131_v3 = vmax.f32 %v1123_v53, %v1127_v62  ;;  %v1132_v4 = vmax.f32 %v1124_v54, %v1128_v63 }
 0x7f0   :  { %v1133_v5 = vmax.f32 %v1129_v1, %v1130_v2  ;;  %v1134_v6 = vmax.f32 %v1131_v3, %v1132_v4 }
 0x7f2   :  { %v1112_v7 = vpop.xlane.xlu1 %1111  ;;  %v1135_v8 = vmax.f32 %v1133_v5, %v1134_v6 }
 0x7f3   :  { %vm1138_vm8 = vcmp.lt.f32.partialorder %v3031_v49, %v1112_v7  ;;  %vm1139_vm9 = vcmp.lt.f32.partialorder %v3039_v55, %v1112_v7  ;;  %vm1140_vm10 = vcmp.lt.f32.partialorder %v3033_v50, %v1112_v7  ;;  %vm1141_vm11 = vcmp.lt.f32.partialorder %v3045_v60, %v1112_v7 }
 0x7f4   :  { %1136 = vmax.xlane.f32.xlu0 %v1135_v8  ;;  %vm1142_vm12 = vcmp.lt.f32.partialorder %v3035_v51, %v1112_v7  ;;  %vm1143_vm13 = vcmp.lt.f32.partialorder %v3043_v57, %v1112_v7  ;;  %vm1144_vm14 = vcmp.lt.f32.partialorder %v3041_v56, %v1112_v7  ;;  %vm1145_vm15 = vcmp.lt.f32.partialorder %v3047_v61, %v1112_v7 }
 0x7f5   :  { %v1146_v9 = vsel %vm1138_vm8, %v3031_v49, -inf  ;;  %v1147_v10 = vsel %vm1139_vm9, %v3039_v55, -inf  ;;  %v1148_v12 = vsel %vm1140_vm10, %v3033_v50, -inf  ;;  %v1149_v13 = vsel %vm1141_vm11, %v3045_v60, -inf }
 0x7f6   :  { %v1150_v14 = vsel %vm1142_vm12, %v3035_v51, -inf  ;;  %v1151_v15 = vsel %vm1143_vm13, %v3043_v57, -inf  ;;  %v1152_v16 = vsel %vm1144_vm14, %v3041_v56, -inf  ;;  %v1153_v17 = vsel %vm1145_vm15, %v3047_v61, -inf }
 0x7f7   :  { %v1154_v18 = vmax.f32 %v1146_v9, %v1150_v14  ;;  %v1155_v48 = vmax.f32 %v1147_v10, %v1151_v15  ;;  %v1156_v19 = vmax.f32 %v1148_v12, %v1152_v16  ;;  %v1157_v20 = vmax.f32 %v1149_v13, %v1153_v17 }
 0x7f9   :  { %v1158_v21 = vmax.f32 %v1154_v18, %v1155_v48  ;;  %v1159_v0 = vmax.f32 %v1156_v19, %v1157_v20 }
 0x7fb   :  { %v1160_v22 = vmax.f32 %v1158_v21, %v1159_v0 }
 0x7fd   :  { %1161 = vmax.xlane.f32.xlu1 %v1160_v22 }
 0x881   :  { %v1137_v23 = vpop.xlane.xlu0 %1136 }
 0x882   :  { %vm1163_vm0 = vcmp.lt.f32.partialorder %v3009_v33, %v1137_v23  ;;  %vm1164_vm1 = vcmp.lt.f32.partialorder %v3015_v38, %v1137_v23  ;;  %vm1165_vm2 = vcmp.lt.f32.partialorder %v3013_v37, %v1137_v23  ;;  %vm1166_vm3 = vcmp.lt.f32.partialorder %v3021_v42, %v1137_v23 }
 0x883   :  { %vm1167_vm4 = vcmp.lt.f32.partialorder %v3011_v34, %v1137_v23  ;;  %vm1168_vm5 = vcmp.lt.f32.partialorder %v3019_v40, %v1137_v23  ;;  %vm1169_vm6 = vcmp.lt.f32.partialorder %v3017_v39, %v1137_v23  ;;  %vm1170_vm7 = vcmp.lt.f32.partialorder %v3023_v43, %v1137_v23 }
 0x884   :  { %v1171_v24 = vsel %vm1163_vm0, %v3009_v33, -inf  ;;  %v1172_v11 = vsel %vm1164_vm1, %v3015_v38, -inf  ;;  %v1173_v25 = vsel %vm1165_vm2, %v3013_v37, -inf  ;;  %v1174_v26 = vsel %vm1166_vm3, %v3021_v42, -inf }
 0x885   :  { %v1175_v27 = vsel %vm1167_vm4, %v3011_v34, -inf  ;;  %v1176_v28 = vsel %vm1168_vm5, %v3019_v40, -inf  ;;  %v1177_v29 = vsel %vm1169_vm6, %v3017_v39, -inf  ;;  %v1178_v30 = vsel %vm1170_vm7, %v3023_v43, -inf }
 0x886   :  { %v1179_v31 = vmax.f32 %v1171_v24, %v1175_v27  ;;  %v1180_v32 = vmax.f32 %v1172_v11, %v1176_v28  ;;  %v1181_v35 = vmax.f32 %v1173_v25, %v1177_v29  ;;  %v1182_v36 = vmax.f32 %v1174_v26, %v1178_v30 }
 0x888   :  { %v1183_v41 = vmax.f32 %v1179_v31, %v1180_v32  ;;  %v1184_v44 = vmax.f32 %v1181_v35, %v1182_v36 }
 0x88a   :  { %v1162_v45 = vpop.xlane.xlu1 %1161  ;;  %v1185_v46 = vmax.f32 %v1183_v41, %v1184_v44 }
 0x88b   :  { %vm1188_vm8 = vcmp.lt.f32.partialorder %v3031_v49, %v1162_v45  ;;  %vm1189_vm9 = vcmp.lt.f32.partialorder %v3039_v55, %v1162_v45  ;;  %vm1190_vm10 = vcmp.lt.f32.partialorder %v3033_v50, %v1162_v45  ;;  %vm1191_vm11 = vcmp.lt.f32.partialorder %v3045_v60, %v1162_v45 }
 0x88c   :  { %1186 = vmax.xlane.f32.xlu0 %v1185_v46  ;;  %vm1192_vm12 = vcmp.lt.f32.partialorder %v3035_v51, %v1162_v45  ;;  %vm1193_vm13 = vcmp.lt.f32.partialorder %v3043_v57, %v1162_v45  ;;  %vm1194_vm14 = vcmp.lt.f32.partialorder %v3041_v56, %v1162_v45  ;;  %vm1195_vm15 = vcmp.lt.f32.partialorder %v3047_v61, %v1162_v45 }
 0x88d   :  { %v1196_v47 = vsel %vm1188_vm8, %v3031_v49, -inf  ;;  %v1197_v52 = vsel %vm1189_vm9, %v3039_v55, -inf  ;;  %v1198_v53 = vsel %vm1190_vm10, %v3033_v50, -inf  ;;  %v1199_v54 = vsel %vm1191_vm11, %v3045_v60, -inf }
 0x88e   :  { %v1200_v58 = vsel %vm1192_vm12, %v3035_v51, -inf  ;;  %v1201_v59 = vsel %vm1193_vm13, %v3043_v57, -inf  ;;  %v1202_v62 = vsel %vm1194_vm14, %v3041_v56, -inf  ;;  %v1203_v63 = vsel %vm1195_vm15, %v3047_v61, -inf }
 0x88f   :  { %v1204_v1 = vmax.f32 %v1196_v47, %v1200_v58  ;;  %v1205_v2 = vmax.f32 %v1197_v52, %v1201_v59  ;;  %v1206_v3 = vmax.f32 %v1198_v53, %v1202_v62  ;;  %v1207_v4 = vmax.f32 %v1199_v54, %v1203_v63 }
 0x891   :  { %v1208_v5 = vmax.f32 %v1204_v1, %v1205_v2  ;;  %v1209_v6 = vmax.f32 %v1206_v3, %v1207_v4 }
 0x893   :  { %v1210_v7 = vmax.f32 %v1208_v5, %v1209_v6 }
 0x895   :  { %1211 = vmax.xlane.f32.xlu1 %v1210_v7 }
 0x919   :  { %v1187_v8 = vpop.xlane.xlu0 %1186 }
 0x91a   :  { %vm1213_vm0 = vcmp.lt.f32.partialorder %v3009_v33, %v1187_v8  ;;  %vm1214_vm1 = vcmp.lt.f32.partialorder %v3015_v38, %v1187_v8  ;;  %vm1215_vm2 = vcmp.lt.f32.partialorder %v3013_v37, %v1187_v8  ;;  %vm1216_vm3 = vcmp.lt.f32.partialorder %v3021_v42, %v1187_v8 }
 0x91b   :  { %vm1217_vm4 = vcmp.lt.f32.partialorder %v3011_v34, %v1187_v8  ;;  %vm1218_vm5 = vcmp.lt.f32.partialorder %v3019_v40, %v1187_v8  ;;  %vm1219_vm6 = vcmp.lt.f32.partialorder %v3017_v39, %v1187_v8  ;;  %vm1220_vm7 = vcmp.lt.f32.partialorder %v3023_v43, %v1187_v8 }
 0x91c   :  { %v1221_v9 = vsel %vm1213_vm0, %v3009_v33, -inf  ;;  %v1222_v10 = vsel %vm1214_vm1, %v3015_v38, -inf  ;;  %v1223_v12 = vsel %vm1215_vm2, %v3013_v37, -inf  ;;  %v1224_v13 = vsel %vm1216_vm3, %v3021_v42, -inf }
 0x91d   :  { %v1225_v14 = vsel %vm1217_vm4, %v3011_v34, -inf  ;;  %v1226_v15 = vsel %vm1218_vm5, %v3019_v40, -inf  ;;  %v1227_v16 = vsel %vm1219_vm6, %v3017_v39, -inf  ;;  %v1228_v17 = vsel %vm1220_vm7, %v3023_v43, -inf }
 0x91e   :  { %v1229_v18 = vmax.f32 %v1221_v9, %v1225_v14  ;;  %v1230_v48 = vmax.f32 %v1222_v10, %v1226_v15  ;;  %v1231_v19 = vmax.f32 %v1223_v12, %v1227_v16  ;;  %v1232_v20 = vmax.f32 %v1224_v13, %v1228_v17 }
 0x920   :  { %v1233_v21 = vmax.f32 %v1229_v18, %v1230_v48  ;;  %v1234_v0 = vmax.f32 %v1231_v19, %v1232_v20 }
 0x922   :  { %v1212_v22 = vpop.xlane.xlu1 %1211  ;;  %v1235_v23 = vmax.f32 %v1233_v21, %v1234_v0 }
 0x923   :  { %vm1238_vm8 = vcmp.lt.f32.partialorder %v3031_v49, %v1212_v22  ;;  %vm1239_vm9 = vcmp.lt.f32.partialorder %v3039_v55, %v1212_v22  ;;  %vm1240_vm10 = vcmp.lt.f32.partialorder %v3033_v50, %v1212_v22  ;;  %vm1241_vm11 = vcmp.lt.f32.partialorder %v3045_v60, %v1212_v22 }
 0x924   :  { %1236 = vmax.xlane.f32.xlu0 %v1235_v23  ;;  %vm1242_vm12 = vcmp.lt.f32.partialorder %v3035_v51, %v1212_v22  ;;  %vm1243_vm13 = vcmp.lt.f32.partialorder %v3043_v57, %v1212_v22  ;;  %vm1244_vm14 = vcmp.lt.f32.partialorder %v3041_v56, %v1212_v22  ;;  %vm1245_vm15 = vcmp.lt.f32.partialorder %v3047_v61, %v1212_v22 }
 0x925   :  { %v1246_v24 = vsel %vm1238_vm8, %v3031_v49, -inf  ;;  %v1247_v11 = vsel %vm1239_vm9, %v3039_v55, -inf  ;;  %v1248_v25 = vsel %vm1240_vm10, %v3033_v50, -inf  ;;  %v1249_v26 = vsel %vm1241_vm11, %v3045_v60, -inf }
 0x926   :  { %v1250_v27 = vsel %vm1242_vm12, %v3035_v51, -inf  ;;  %v1251_v28 = vsel %vm1243_vm13, %v3043_v57, -inf  ;;  %v1252_v29 = vsel %vm1244_vm14, %v3041_v56, -inf  ;;  %v1253_v30 = vsel %vm1245_vm15, %v3047_v61, -inf }
 0x927   :  { %v1254_v31 = vmax.f32 %v1246_v24, %v1250_v27  ;;  %v1255_v32 = vmax.f32 %v1247_v11, %v1251_v28  ;;  %v1256_v35 = vmax.f32 %v1248_v25, %v1252_v29  ;;  %v1257_v36 = vmax.f32 %v1249_v26, %v1253_v30 }
 0x929   :  { %v1258_v41 = vmax.f32 %v1254_v31, %v1255_v32  ;;  %v1259_v44 = vmax.f32 %v1256_v35, %v1257_v36 }
 0x92b   :  { %v1260_v45 = vmax.f32 %v1258_v41, %v1259_v44 }
 0x92d   :  { %1261 = vmax.xlane.f32.xlu1 %v1260_v45 }
 0x9b1   :  { %v1237_v46 = vpop.xlane.xlu0 %1236 }
 0x9b2   :  { %vm1263_vm0 = vcmp.lt.f32.partialorder %v3009_v33, %v1237_v46  ;;  %vm1264_vm1 = vcmp.lt.f32.partialorder %v3015_v38, %v1237_v46  ;;  %vm1265_vm2 = vcmp.lt.f32.partialorder %v3013_v37, %v1237_v46  ;;  %vm1266_vm3 = vcmp.lt.f32.partialorder %v3021_v42, %v1237_v46 }
 0x9b3   :  { %vm1267_vm4 = vcmp.lt.f32.partialorder %v3011_v34, %v1237_v46  ;;  %vm1268_vm5 = vcmp.lt.f32.partialorder %v3019_v40, %v1237_v46  ;;  %vm1269_vm6 = vcmp.lt.f32.partialorder %v3017_v39, %v1237_v46  ;;  %vm1270_vm7 = vcmp.lt.f32.partialorder %v3023_v43, %v1237_v46 }
 0x9b4   :  { %v1271_v47 = vsel %vm1263_vm0, %v3009_v33, -inf  ;;  %v1272_v52 = vsel %vm1264_vm1, %v3015_v38, -inf  ;;  %v1273_v53 = vsel %vm1265_vm2, %v3013_v37, -inf  ;;  %v1274_v54 = vsel %vm1266_vm3, %v3021_v42, -inf }
 0x9b5   :  { %v1275_v58 = vsel %vm1267_vm4, %v3011_v34, -inf  ;;  %v1276_v59 = vsel %vm1268_vm5, %v3019_v40, -inf  ;;  %v1277_v62 = vsel %vm1269_vm6, %v3017_v39, -inf  ;;  %v1278_v63 = vsel %vm1270_vm7, %v3023_v43, -inf }
 0x9b6   :  { %v1279_v1 = vmax.f32 %v1271_v47, %v1275_v58  ;;  %v1280_v2 = vmax.f32 %v1272_v52, %v1276_v59  ;;  %v1281_v3 = vmax.f32 %v1273_v53, %v1277_v62  ;;  %v1282_v4 = vmax.f32 %v1274_v54, %v1278_v63 }
 0x9b8   :  { %v1283_v5 = vmax.f32 %v1279_v1, %v1280_v2  ;;  %v1284_v6 = vmax.f32 %v1281_v3, %v1282_v4 }
 0x9ba   :  { %v1262_v7 = vpop.xlane.xlu1 %1261  ;;  %v1285_v8 = vmax.f32 %v1283_v5, %v1284_v6 }
 0x9bb   :  { %vm1288_vm8 = vcmp.lt.f32.partialorder %v3031_v49, %v1262_v7  ;;  %vm1289_vm9 = vcmp.lt.f32.partialorder %v3039_v55, %v1262_v7  ;;  %vm1290_vm10 = vcmp.lt.f32.partialorder %v3033_v50, %v1262_v7  ;;  %vm1291_vm11 = vcmp.lt.f32.partialorder %v3045_v60, %v1262_v7 }
 0x9bc   :  { %1286 = vmax.xlane.f32.xlu0 %v1285_v8  ;;  %vm1292_vm12 = vcmp.lt.f32.partialorder %v3035_v51, %v1262_v7  ;;  %vm1293_vm13 = vcmp.lt.f32.partialorder %v3043_v57, %v1262_v7  ;;  %vm1294_vm14 = vcmp.lt.f32.partialorder %v3041_v56, %v1262_v7  ;;  %vm1295_vm15 = vcmp.lt.f32.partialorder %v3047_v61, %v1262_v7 }
 0x9bd   :  { %v1296_v9 = vsel %vm1288_vm8, %v3031_v49, -inf  ;;  %v1297_v10 = vsel %vm1289_vm9, %v3039_v55, -inf  ;;  %v1298_v12 = vsel %vm1290_vm10, %v3033_v50, -inf  ;;  %v1299_v13 = vsel %vm1291_vm11, %v3045_v60, -inf }
 0x9be   :  { %v1300_v14 = vsel %vm1292_vm12, %v3035_v51, -inf  ;;  %v1301_v15 = vsel %vm1293_vm13, %v3043_v57, -inf  ;;  %v1302_v16 = vsel %vm1294_vm14, %v3041_v56, -inf  ;;  %v1303_v17 = vsel %vm1295_vm15, %v3047_v61, -inf }
 0x9bf   :  { %v1304_v18 = vmax.f32 %v1296_v9, %v1300_v14  ;;  %v1305_v48 = vmax.f32 %v1297_v10, %v1301_v15  ;;  %v1306_v19 = vmax.f32 %v1298_v12, %v1302_v16  ;;  %v1307_v20 = vmax.f32 %v1299_v13, %v1303_v17 }
 0x9c1   :  { %v1308_v21 = vmax.f32 %v1304_v18, %v1305_v48  ;;  %v1309_v0 = vmax.f32 %v1306_v19, %v1307_v20 }
 0x9c3   :  { %v1310_v22 = vmax.f32 %v1308_v21, %v1309_v0 }
 0x9c5   :  { %1311 = vmax.xlane.f32.xlu1 %v1310_v22 }
 0xa49   :  { %v1287_v23 = vpop.xlane.xlu0 %1286 }
 0xa4a   :  { %vm1313_vm0 = vcmp.lt.f32.partialorder %v3009_v33, %v1287_v23  ;;  %vm1314_vm1 = vcmp.lt.f32.partialorder %v3015_v38, %v1287_v23  ;;  %vm1315_vm2 = vcmp.lt.f32.partialorder %v3013_v37, %v1287_v23  ;;  %vm1316_vm3 = vcmp.lt.f32.partialorder %v3021_v42, %v1287_v23 }
 0xa4b   :  { %vm1317_vm4 = vcmp.lt.f32.partialorder %v3011_v34, %v1287_v23  ;;  %vm1318_vm5 = vcmp.lt.f32.partialorder %v3019_v40, %v1287_v23  ;;  %vm1319_vm6 = vcmp.lt.f32.partialorder %v3017_v39, %v1287_v23  ;;  %vm1320_vm7 = vcmp.lt.f32.partialorder %v3023_v43, %v1287_v23 }
 0xa4c   :  { %v1321_v24 = vsel %vm1313_vm0, %v3009_v33, -inf  ;;  %v1322_v11 = vsel %vm1314_vm1, %v3015_v38, -inf  ;;  %v1323_v25 = vsel %vm1315_vm2, %v3013_v37, -inf  ;;  %v1324_v26 = vsel %vm1316_vm3, %v3021_v42, -inf }
 0xa4d   :  { %v1325_v27 = vsel %vm1317_vm4, %v3011_v34, -inf  ;;  %v1326_v28 = vsel %vm1318_vm5, %v3019_v40, -inf  ;;  %v1327_v29 = vsel %vm1319_vm6, %v3017_v39, -inf  ;;  %v1328_v30 = vsel %vm1320_vm7, %v3023_v43, -inf }
 0xa4e   :  { %v1329_v31 = vmax.f32 %v1321_v24, %v1325_v27  ;;  %v1330_v32 = vmax.f32 %v1322_v11, %v1326_v28  ;;  %v1331_v35 = vmax.f32 %v1323_v25, %v1327_v29  ;;  %v1332_v36 = vmax.f32 %v1324_v26, %v1328_v30 }
 0xa50   :  { %v1333_v41 = vmax.f32 %v1329_v31, %v1330_v32  ;;  %v1334_v44 = vmax.f32 %v1331_v35, %v1332_v36 }
 0xa52   :  { %v1312_v45 = vpop.xlane.xlu1 %1311  ;;  %v1335_v46 = vmax.f32 %v1333_v41, %v1334_v44 }
 0xa53   :  { %vm1338_vm8 = vcmp.lt.f32.partialorder %v3031_v49, %v1312_v45  ;;  %vm1339_vm9 = vcmp.lt.f32.partialorder %v3039_v55, %v1312_v45  ;;  %vm1340_vm10 = vcmp.lt.f32.partialorder %v3033_v50, %v1312_v45  ;;  %vm1341_vm11 = vcmp.lt.f32.partialorder %v3045_v60, %v1312_v45 }
 0xa54   :  { %1336 = vmax.xlane.f32.xlu0 %v1335_v46  ;;  %vm1342_vm12 = vcmp.lt.f32.partialorder %v3035_v51, %v1312_v45  ;;  %vm1343_vm13 = vcmp.lt.f32.partialorder %v3043_v57, %v1312_v45  ;;  %vm1344_vm14 = vcmp.lt.f32.partialorder %v3041_v56, %v1312_v45  ;;  %vm1345_vm15 = vcmp.lt.f32.partialorder %v3047_v61, %v1312_v45 }
 0xa55   :  { %v1346_v47 = vsel %vm1338_vm8, %v3031_v49, -inf  ;;  %v1347_v52 = vsel %vm1339_vm9, %v3039_v55, -inf  ;;  %v1348_v53 = vsel %vm1340_vm10, %v3033_v50, -inf  ;;  %v1349_v54 = vsel %vm1341_vm11, %v3045_v60, -inf }
 0xa56   :  { %v1350_v58 = vsel %vm1342_vm12, %v3035_v51, -inf  ;;  %v1351_v59 = vsel %vm1343_vm13, %v3043_v57, -inf  ;;  %v1352_v62 = vsel %vm1344_vm14, %v3041_v56, -inf  ;;  %v1353_v63 = vsel %vm1345_vm15, %v3047_v61, -inf }
 0xa57   :  { %v1354_v1 = vmax.f32 %v1346_v47, %v1350_v58  ;;  %v1355_v2 = vmax.f32 %v1347_v52, %v1351_v59  ;;  %v1356_v3 = vmax.f32 %v1348_v53, %v1352_v62  ;;  %v1357_v4 = vmax.f32 %v1349_v54, %v1353_v63 }
 0xa59   :  { %v1358_v5 = vmax.f32 %v1354_v1, %v1355_v2  ;;  %v1359_v6 = vmax.f32 %v1356_v3, %v1357_v4 }
 0xa5b   :  { %v1360_v7 = vmax.f32 %v1358_v5, %v1359_v6 }
 0xa5d   :  { %1361 = vmax.xlane.f32.xlu1 %v1360_v7 }
 0xae1   :  { %v1337_v8 = vpop.xlane.xlu0 %1336 }
 0xae2   :  { %vm1363_vm0 = vcmp.lt.f32.partialorder %v3009_v33, %v1337_v8  ;;  %vm1364_vm1 = vcmp.lt.f32.partialorder %v3015_v38, %v1337_v8  ;;  %vm1365_vm2 = vcmp.lt.f32.partialorder %v3013_v37, %v1337_v8  ;;  %vm1366_vm3 = vcmp.lt.f32.partialorder %v3021_v42, %v1337_v8 }
 0xae3   :  { %vm1367_vm4 = vcmp.lt.f32.partialorder %v3011_v34, %v1337_v8  ;;  %vm1368_vm5 = vcmp.lt.f32.partialorder %v3019_v40, %v1337_v8  ;;  %vm1369_vm6 = vcmp.lt.f32.partialorder %v3017_v39, %v1337_v8  ;;  %vm1370_vm7 = vcmp.lt.f32.partialorder %v3023_v43, %v1337_v8 }
 0xae4   :  { %v1371_v9 = vsel %vm1363_vm0, %v3009_v33, -inf  ;;  %v1372_v10 = vsel %vm1364_vm1, %v3015_v38, -inf  ;;  %v1373_v12 = vsel %vm1365_vm2, %v3013_v37, -inf  ;;  %v1374_v13 = vsel %vm1366_vm3, %v3021_v42, -inf }
 0xae5   :  { %v1375_v14 = vsel %vm1367_vm4, %v3011_v34, -inf  ;;  %v1376_v15 = vsel %vm1368_vm5, %v3019_v40, -inf  ;;  %v1377_v16 = vsel %vm1369_vm6, %v3017_v39, -inf  ;;  %v1378_v17 = vsel %vm1370_vm7, %v3023_v43, -inf }
 0xae6   :  { %v1379_v18 = vmax.f32 %v1371_v9, %v1375_v14  ;;  %v1380_v48 = vmax.f32 %v1372_v10, %v1376_v15  ;;  %v1381_v19 = vmax.f32 %v1373_v12, %v1377_v16  ;;  %v1382_v20 = vmax.f32 %v1374_v13, %v1378_v17 }
 0xae8   :  { %v1383_v21 = vmax.f32 %v1379_v18, %v1380_v48  ;;  %v1384_v0 = vmax.f32 %v1381_v19, %v1382_v20 }
 0xaea   :  { %v1362_v22 = vpop.xlane.xlu1 %1361  ;;  %v1385_v23 = vmax.f32 %v1383_v21, %v1384_v0 }
 0xaeb   :  { %vm1388_vm8 = vcmp.lt.f32.partialorder %v3031_v49, %v1362_v22  ;;  %vm1389_vm9 = vcmp.lt.f32.partialorder %v3039_v55, %v1362_v22  ;;  %vm1390_vm10 = vcmp.lt.f32.partialorder %v3033_v50, %v1362_v22  ;;  %vm1391_vm11 = vcmp.lt.f32.partialorder %v3045_v60, %v1362_v22 }
 0xaec   :  { %1386 = vmax.xlane.f32.xlu0 %v1385_v23  ;;  %vm1392_vm12 = vcmp.lt.f32.partialorder %v3035_v51, %v1362_v22  ;;  %vm1393_vm13 = vcmp.lt.f32.partialorder %v3043_v57, %v1362_v22  ;;  %vm1394_vm14 = vcmp.lt.f32.partialorder %v3041_v56, %v1362_v22  ;;  %vm1395_vm15 = vcmp.lt.f32.partialorder %v3047_v61, %v1362_v22 }
 0xaed   :  { %v1396_v24 = vsel %vm1388_vm8, %v3031_v49, -inf  ;;  %v1397_v11 = vsel %vm1389_vm9, %v3039_v55, -inf  ;;  %v1398_v25 = vsel %vm1390_vm10, %v3033_v50, -inf  ;;  %v1399_v26 = vsel %vm1391_vm11, %v3045_v60, -inf }
 0xaee   :  { %v1400_v27 = vsel %vm1392_vm12, %v3035_v51, -inf  ;;  %v1401_v28 = vsel %vm1393_vm13, %v3043_v57, -inf  ;;  %v1402_v29 = vsel %vm1394_vm14, %v3041_v56, -inf  ;;  %v1403_v30 = vsel %vm1395_vm15, %v3047_v61, -inf }
 0xaef   :  { %v1404_v31 = vmax.f32 %v1396_v24, %v1400_v27  ;;  %v1405_v32 = vmax.f32 %v1397_v11, %v1401_v28  ;;  %v1406_v35 = vmax.f32 %v1398_v25, %v1402_v29  ;;  %v1407_v36 = vmax.f32 %v1399_v26, %v1403_v30 }
 0xaf1   :  { %v1408_v41 = vmax.f32 %v1404_v31, %v1405_v32  ;;  %v1409_v44 = vmax.f32 %v1406_v35, %v1407_v36 }
 0xaf3   :  { %v1410_v45 = vmax.f32 %v1408_v41, %v1409_v44 }
 0xaf5   :  { %1411 = vmax.xlane.f32.xlu1 %v1410_v45 }
 0xb79   :  { %v1387_v46 = vpop.xlane.xlu0 %1386 }
 0xb7a   :  { %vm1413_vm0 = vcmp.lt.f32.partialorder %v3009_v33, %v1387_v46  ;;  %vm1414_vm1 = vcmp.lt.f32.partialorder %v3015_v38, %v1387_v46  ;;  %vm1415_vm2 = vcmp.lt.f32.partialorder %v3013_v37, %v1387_v46  ;;  %vm1416_vm3 = vcmp.lt.f32.partialorder %v3021_v42, %v1387_v46 }
 0xb7b   :  { %vm1417_vm4 = vcmp.lt.f32.partialorder %v3011_v34, %v1387_v46  ;;  %vm1418_vm5 = vcmp.lt.f32.partialorder %v3019_v40, %v1387_v46  ;;  %vm1419_vm6 = vcmp.lt.f32.partialorder %v3017_v39, %v1387_v46  ;;  %vm1420_vm7 = vcmp.lt.f32.partialorder %v3023_v43, %v1387_v46 }
 0xb7c   :  { %v1421_v47 = vsel %vm1413_vm0, %v3009_v33, -inf  ;;  %v1422_v52 = vsel %vm1414_vm1, %v3015_v38, -inf  ;;  %v1423_v53 = vsel %vm1415_vm2, %v3013_v37, -inf  ;;  %v1424_v54 = vsel %vm1416_vm3, %v3021_v42, -inf }
 0xb7d   :  { %v1425_v58 = vsel %vm1417_vm4, %v3011_v34, -inf  ;;  %v1426_v59 = vsel %vm1418_vm5, %v3019_v40, -inf  ;;  %v1427_v62 = vsel %vm1419_vm6, %v3017_v39, -inf  ;;  %v1428_v63 = vsel %vm1420_vm7, %v3023_v43, -inf }
 0xb7e   :  { %v1429_v1 = vmax.f32 %v1421_v47, %v1425_v58  ;;  %v1430_v2 = vmax.f32 %v1422_v52, %v1426_v59  ;;  %v1431_v3 = vmax.f32 %v1423_v53, %v1427_v62  ;;  %v1432_v4 = vmax.f32 %v1424_v54, %v1428_v63 }
 0xb80   :  { %v1433_v5 = vmax.f32 %v1429_v1, %v1430_v2  ;;  %v1434_v6 = vmax.f32 %v1431_v3, %v1432_v4 }
 0xb82   :  { %v1412_v7 = vpop.xlane.xlu1 %1411  ;;  %v1435_v8 = vmax.f32 %v1433_v5, %v1434_v6 }
 0xb83   :  { %vm1438_vm8 = vcmp.lt.f32.partialorder %v3031_v49, %v1412_v7  ;;  %vm1439_vm9 = vcmp.lt.f32.partialorder %v3039_v55, %v1412_v7  ;;  %vm1440_vm10 = vcmp.lt.f32.partialorder %v3033_v50, %v1412_v7  ;;  %vm1441_vm11 = vcmp.lt.f32.partialorder %v3045_v60, %v1412_v7 }
 0xb84   :  { %1436 = vmax.xlane.f32.xlu0 %v1435_v8  ;;  %vm1442_vm12 = vcmp.lt.f32.partialorder %v3035_v51, %v1412_v7  ;;  %vm1443_vm13 = vcmp.lt.f32.partialorder %v3043_v57, %v1412_v7  ;;  %vm1444_vm14 = vcmp.lt.f32.partialorder %v3041_v56, %v1412_v7  ;;  %vm1445_vm15 = vcmp.lt.f32.partialorder %v3047_v61, %v1412_v7 }
 0xb85   :  { %v1446_v9 = vsel %vm1438_vm8, %v3031_v49, -inf  ;;  %v1447_v10 = vsel %vm1439_vm9, %v3039_v55, -inf  ;;  %v1448_v12 = vsel %vm1440_vm10, %v3033_v50, -inf  ;;  %v1449_v13 = vsel %vm1441_vm11, %v3045_v60, -inf }
 0xb86   :  { %v1450_v14 = vsel %vm1442_vm12, %v3035_v51, -inf  ;;  %v1451_v15 = vsel %vm1443_vm13, %v3043_v57, -inf  ;;  %v1452_v16 = vsel %vm1444_vm14, %v3041_v56, -inf  ;;  %v1453_v17 = vsel %vm1445_vm15, %v3047_v61, -inf }
 0xb87   :  { %v1454_v18 = vmax.f32 %v1446_v9, %v1450_v14  ;;  %v1455_v48 = vmax.f32 %v1447_v10, %v1451_v15  ;;  %v1456_v19 = vmax.f32 %v1448_v12, %v1452_v16  ;;  %v1457_v20 = vmax.f32 %v1449_v13, %v1453_v17 }
 0xb89   :  { %v1458_v21 = vmax.f32 %v1454_v18, %v1455_v48  ;;  %v1459_v0 = vmax.f32 %v1456_v19, %v1457_v20 }
 0xb8b   :  { %v1460_v22 = vmax.f32 %v1458_v21, %v1459_v0 }
 0xb8d   :  { %1461 = vmax.xlane.f32.xlu1 %v1460_v22 }
 0xc11   :  { %v1437_v23 = vpop.xlane.xlu0 %1436 }
 0xc12   :  { %vm1463_vm0 = vcmp.lt.f32.partialorder %v3009_v33, %v1437_v23  ;;  %vm1464_vm1 = vcmp.lt.f32.partialorder %v3015_v38, %v1437_v23  ;;  %vm1465_vm2 = vcmp.lt.f32.partialorder %v3013_v37, %v1437_v23  ;;  %vm1466_vm3 = vcmp.lt.f32.partialorder %v3021_v42, %v1437_v23 }
 0xc13   :  { %vm1467_vm4 = vcmp.lt.f32.partialorder %v3011_v34, %v1437_v23  ;;  %vm1468_vm5 = vcmp.lt.f32.partialorder %v3019_v40, %v1437_v23  ;;  %vm1469_vm6 = vcmp.lt.f32.partialorder %v3017_v39, %v1437_v23  ;;  %vm1470_vm7 = vcmp.lt.f32.partialorder %v3023_v43, %v1437_v23 }
 0xc14   :  { %v1471_v24 = vsel %vm1463_vm0, %v3009_v33, -inf  ;;  %v1472_v11 = vsel %vm1464_vm1, %v3015_v38, -inf  ;;  %v1473_v25 = vsel %vm1465_vm2, %v3013_v37, -inf  ;;  %v1474_v26 = vsel %vm1466_vm3, %v3021_v42, -inf }
 0xc15   :  { %v1475_v27 = vsel %vm1467_vm4, %v3011_v34, -inf  ;;  %v1476_v28 = vsel %vm1468_vm5, %v3019_v40, -inf  ;;  %v1477_v29 = vsel %vm1469_vm6, %v3017_v39, -inf  ;;  %v1478_v30 = vsel %vm1470_vm7, %v3023_v43, -inf }
 0xc16   :  { %v1479_v31 = vmax.f32 %v1471_v24, %v1475_v27  ;;  %v1480_v32 = vmax.f32 %v1472_v11, %v1476_v28  ;;  %v1481_v35 = vmax.f32 %v1473_v25, %v1477_v29  ;;  %v1482_v36 = vmax.f32 %v1474_v26, %v1478_v30 }
 0xc18   :  { %v1483_v41 = vmax.f32 %v1479_v31, %v1480_v32  ;;  %v1484_v44 = vmax.f32 %v1481_v35, %v1482_v36 }
 0xc1a   :  { %v1462_v45 = vpop.xlane.xlu1 %1461  ;;  %v1485_v46 = vmax.f32 %v1483_v41, %v1484_v44 }
 0xc1b   :  { %vm1488_vm8 = vcmp.lt.f32.partialorder %v3031_v49, %v1462_v45  ;;  %vm1489_vm9 = vcmp.lt.f32.partialorder %v3039_v55, %v1462_v45  ;;  %vm1490_vm10 = vcmp.lt.f32.partialorder %v3033_v50, %v1462_v45  ;;  %vm1491_vm11 = vcmp.lt.f32.partialorder %v3045_v60, %v1462_v45 }
 0xc1c   :  { %1486 = vmax.xlane.f32.xlu0 %v1485_v46  ;;  %vm1492_vm12 = vcmp.lt.f32.partialorder %v3035_v51, %v1462_v45  ;;  %vm1493_vm13 = vcmp.lt.f32.partialorder %v3043_v57, %v1462_v45  ;;  %vm1494_vm14 = vcmp.lt.f32.partialorder %v3041_v56, %v1462_v45  ;;  %vm1495_vm15 = vcmp.lt.f32.partialorder %v3047_v61, %v1462_v45 }
 0xc1d   :  { %v1496_v47 = vsel %vm1488_vm8, %v3031_v49, -inf  ;;  %v1497_v52 = vsel %vm1489_vm9, %v3039_v55, -inf  ;;  %v1498_v53 = vsel %vm1490_vm10, %v3033_v50, -inf  ;;  %v1499_v54 = vsel %vm1491_vm11, %v3045_v60, -inf }
 0xc1e   :  { %v1500_v58 = vsel %vm1492_vm12, %v3035_v51, -inf  ;;  %v1501_v59 = vsel %vm1493_vm13, %v3043_v57, -inf  ;;  %v1502_v62 = vsel %vm1494_vm14, %v3041_v56, -inf  ;;  %v1503_v63 = vsel %vm1495_vm15, %v3047_v61, -inf }
 0xc1f   :  { %v1504_v1 = vmax.f32 %v1496_v47, %v1500_v58  ;;  %v1505_v2 = vmax.f32 %v1497_v52, %v1501_v59  ;;  %v1506_v3 = vmax.f32 %v1498_v53, %v1502_v62  ;;  %v1507_v4 = vmax.f32 %v1499_v54, %v1503_v63 }
 0xc21   :  { %v1508_v5 = vmax.f32 %v1504_v1, %v1505_v2  ;;  %v1509_v6 = vmax.f32 %v1506_v3, %v1507_v4 }
 0xc23   :  { %v1510_v7 = vmax.f32 %v1508_v5, %v1509_v6 }
 0xc25   :  { %1511 = vmax.xlane.f32.xlu1 %v1510_v7 }
 0xca9   :  { %v1487_v8 = vpop.xlane.xlu0 %1486 }
 0xcaa   :  { %vm1513_vm0 = vcmp.lt.f32.partialorder %v3009_v33, %v1487_v8  ;;  %vm1514_vm1 = vcmp.lt.f32.partialorder %v3015_v38, %v1487_v8  ;;  %vm1515_vm2 = vcmp.lt.f32.partialorder %v3013_v37, %v1487_v8  ;;  %vm1516_vm3 = vcmp.lt.f32.partialorder %v3021_v42, %v1487_v8 }
 0xcab   :  { %vm1517_vm4 = vcmp.lt.f32.partialorder %v3011_v34, %v1487_v8  ;;  %vm1518_vm5 = vcmp.lt.f32.partialorder %v3019_v40, %v1487_v8  ;;  %vm1519_vm6 = vcmp.lt.f32.partialorder %v3017_v39, %v1487_v8  ;;  %vm1520_vm7 = vcmp.lt.f32.partialorder %v3023_v43, %v1487_v8 }
 0xcac   :  { %v1521_v9 = vsel %vm1513_vm0, %v3009_v33, -inf  ;;  %v1522_v10 = vsel %vm1514_vm1, %v3015_v38, -inf  ;;  %v1523_v12 = vsel %vm1515_vm2, %v3013_v37, -inf  ;;  %v1524_v13 = vsel %vm1516_vm3, %v3021_v42, -inf }
 0xcad   :  { %v1525_v14 = vsel %vm1517_vm4, %v3011_v34, -inf  ;;  %v1526_v15 = vsel %vm1518_vm5, %v3019_v40, -inf  ;;  %v1527_v16 = vsel %vm1519_vm6, %v3017_v39, -inf  ;;  %v1528_v17 = vsel %vm1520_vm7, %v3023_v43, -inf }
 0xcae   :  { %v1529_v18 = vmax.f32 %v1521_v9, %v1525_v14  ;;  %v1530_v48 = vmax.f32 %v1522_v10, %v1526_v15  ;;  %v1531_v19 = vmax.f32 %v1523_v12, %v1527_v16  ;;  %v1532_v20 = vmax.f32 %v1524_v13, %v1528_v17 }
 0xcb0   :  { %v1533_v21 = vmax.f32 %v1529_v18, %v1530_v48  ;;  %v1534_v0 = vmax.f32 %v1531_v19, %v1532_v20 }
 0xcb2   :  { %v1512_v22 = vpop.xlane.xlu1 %1511  ;;  %v1535_v23 = vmax.f32 %v1533_v21, %v1534_v0 }
 0xcb3   :  { %vm1538_vm8 = vcmp.lt.f32.partialorder %v3031_v49, %v1512_v22  ;;  %vm1539_vm9 = vcmp.lt.f32.partialorder %v3039_v55, %v1512_v22  ;;  %vm1540_vm10 = vcmp.lt.f32.partialorder %v3033_v50, %v1512_v22  ;;  %vm1541_vm11 = vcmp.lt.f32.partialorder %v3045_v60, %v1512_v22 }
 0xcb4   :  { %1536 = vmax.xlane.f32.xlu0 %v1535_v23  ;;  %vm1542_vm12 = vcmp.lt.f32.partialorder %v3035_v51, %v1512_v22  ;;  %vm1543_vm13 = vcmp.lt.f32.partialorder %v3043_v57, %v1512_v22  ;;  %vm1544_vm14 = vcmp.lt.f32.partialorder %v3041_v56, %v1512_v22  ;;  %vm1545_vm15 = vcmp.lt.f32.partialorder %v3047_v61, %v1512_v22 }
 0xcb5   :  { %v1546_v24 = vsel %vm1538_vm8, %v3031_v49, -inf  ;;  %v1547_v11 = vsel %vm1539_vm9, %v3039_v55, -inf  ;;  %v1548_v25 = vsel %vm1540_vm10, %v3033_v50, -inf  ;;  %v1549_v26 = vsel %vm1541_vm11, %v3045_v60, -inf }
 0xcb6   :  { %v1550_v27 = vsel %vm1542_vm12, %v3035_v51, -inf  ;;  %v1551_v28 = vsel %vm1543_vm13, %v3043_v57, -inf  ;;  %v1552_v29 = vsel %vm1544_vm14, %v3041_v56, -inf  ;;  %v1553_v30 = vsel %vm1545_vm15, %v3047_v61, -inf }
 0xcb7   :  { %v1554_v31 = vmax.f32 %v1546_v24, %v1550_v27  ;;  %v1555_v32 = vmax.f32 %v1547_v11, %v1551_v28  ;;  %v1556_v35 = vmax.f32 %v1548_v25, %v1552_v29  ;;  %v1557_v36 = vmax.f32 %v1549_v26, %v1553_v30 }
 0xcb9   :  { %v1558_v41 = vmax.f32 %v1554_v31, %v1555_v32  ;;  %v1559_v44 = vmax.f32 %v1556_v35, %v1557_v36 }
 0xcbb   :  { %v1560_v45 = vmax.f32 %v1558_v41, %v1559_v44 }
 0xcbd   :  { %1561 = vmax.xlane.f32.xlu1 %v1560_v45 }
 0xd41   :  { %v1537_v46 = vpop.xlane.xlu0 %1536 }
 0xd42   :  { %vm1563_vm0 = vcmp.lt.f32.partialorder %v3009_v33, %v1537_v46  ;;  %vm1564_vm1 = vcmp.lt.f32.partialorder %v3015_v38, %v1537_v46  ;;  %vm1565_vm2 = vcmp.lt.f32.partialorder %v3013_v37, %v1537_v46  ;;  %vm1566_vm3 = vcmp.lt.f32.partialorder %v3021_v42, %v1537_v46 }
 0xd43   :  { %vm1567_vm4 = vcmp.lt.f32.partialorder %v3011_v34, %v1537_v46  ;;  %vm1568_vm5 = vcmp.lt.f32.partialorder %v3019_v40, %v1537_v46  ;;  %vm1569_vm6 = vcmp.lt.f32.partialorder %v3017_v39, %v1537_v46  ;;  %vm1570_vm7 = vcmp.lt.f32.partialorder %v3023_v43, %v1537_v46 }
 0xd44   :  { %v1571_v47 = vsel %vm1563_vm0, %v3009_v33, -inf  ;;  %v1572_v52 = vsel %vm1564_vm1, %v3015_v38, -inf  ;;  %v1573_v53 = vsel %vm1565_vm2, %v3013_v37, -inf  ;;  %v1574_v54 = vsel %vm1566_vm3, %v3021_v42, -inf }
 0xd45   :  { %v1575_v58 = vsel %vm1567_vm4, %v3011_v34, -inf  ;;  %v1576_v59 = vsel %vm1568_vm5, %v3019_v40, -inf  ;;  %v1577_v62 = vsel %vm1569_vm6, %v3017_v39, -inf  ;;  %v1578_v63 = vsel %vm1570_vm7, %v3023_v43, -inf }
 0xd46   :  { %v1579_v1 = vmax.f32 %v1571_v47, %v1575_v58  ;;  %v1580_v2 = vmax.f32 %v1572_v52, %v1576_v59  ;;  %v1581_v3 = vmax.f32 %v1573_v53, %v1577_v62  ;;  %v1582_v4 = vmax.f32 %v1574_v54, %v1578_v63 }
 0xd48   :  { %v1583_v5 = vmax.f32 %v1579_v1, %v1580_v2  ;;  %v1584_v6 = vmax.f32 %v1581_v3, %v1582_v4 }
 0xd4a   :  { %v1562_v7 = vpop.xlane.xlu1 %1561  ;;  %v1585_v8 = vmax.f32 %v1583_v5, %v1584_v6 }
 0xd4b   :  { %vm1588_vm8 = vcmp.lt.f32.partialorder %v3031_v49, %v1562_v7  ;;  %vm1589_vm9 = vcmp.lt.f32.partialorder %v3039_v55, %v1562_v7  ;;  %vm1590_vm10 = vcmp.lt.f32.partialorder %v3033_v50, %v1562_v7  ;;  %vm1591_vm11 = vcmp.lt.f32.partialorder %v3045_v60, %v1562_v7 }
 0xd4c   :  { %1586 = vmax.xlane.f32.xlu0 %v1585_v8  ;;  %vm1592_vm12 = vcmp.lt.f32.partialorder %v3035_v51, %v1562_v7  ;;  %vm1593_vm13 = vcmp.lt.f32.partialorder %v3043_v57, %v1562_v7  ;;  %vm1594_vm14 = vcmp.lt.f32.partialorder %v3041_v56, %v1562_v7  ;;  %vm1595_vm15 = vcmp.lt.f32.partialorder %v3047_v61, %v1562_v7 }
 0xd4d   :  { %v1596_v9 = vsel %vm1588_vm8, %v3031_v49, -inf  ;;  %v1597_v10 = vsel %vm1589_vm9, %v3039_v55, -inf  ;;  %v1598_v12 = vsel %vm1590_vm10, %v3033_v50, -inf  ;;  %v1599_v13 = vsel %vm1591_vm11, %v3045_v60, -inf }
 0xd4e   :  { %v1600_v14 = vsel %vm1592_vm12, %v3035_v51, -inf  ;;  %v1601_v15 = vsel %vm1593_vm13, %v3043_v57, -inf  ;;  %v1602_v16 = vsel %vm1594_vm14, %v3041_v56, -inf  ;;  %v1603_v17 = vsel %vm1595_vm15, %v3047_v61, -inf }
 0xd4f   :  { %v1604_v18 = vmax.f32 %v1596_v9, %v1600_v14  ;;  %v1605_v48 = vmax.f32 %v1597_v10, %v1601_v15  ;;  %v1606_v19 = vmax.f32 %v1598_v12, %v1602_v16  ;;  %v1607_v20 = vmax.f32 %v1599_v13, %v1603_v17 }
 0xd51   :  { %v1608_v21 = vmax.f32 %v1604_v18, %v1605_v48  ;;  %v1609_v0 = vmax.f32 %v1606_v19, %v1607_v20 }
 0xd53   :  { %v1610_v22 = vmax.f32 %v1608_v21, %v1609_v0 }
 0xd55   :  { %1611 = vmax.xlane.f32.xlu1 %v1610_v22 }
 0xdd9   :  { %v1587_v23 = vpop.xlane.xlu0 %1586 }
 0xdda   :  { %vm1613_vm0 = vcmp.lt.f32.partialorder %v3009_v33, %v1587_v23  ;;  %vm1614_vm1 = vcmp.lt.f32.partialorder %v3015_v38, %v1587_v23  ;;  %vm1615_vm2 = vcmp.lt.f32.partialorder %v3013_v37, %v1587_v23  ;;  %vm1616_vm3 = vcmp.lt.f32.partialorder %v3021_v42, %v1587_v23 }
 0xddb   :  { %vm1617_vm4 = vcmp.lt.f32.partialorder %v3011_v34, %v1587_v23  ;;  %vm1618_vm5 = vcmp.lt.f32.partialorder %v3019_v40, %v1587_v23  ;;  %vm1619_vm6 = vcmp.lt.f32.partialorder %v3017_v39, %v1587_v23  ;;  %vm1620_vm7 = vcmp.lt.f32.partialorder %v3023_v43, %v1587_v23 }
 0xddc   :  { %v1621_v24 = vsel %vm1613_vm0, %v3009_v33, -inf  ;;  %v1622_v11 = vsel %vm1614_vm1, %v3015_v38, -inf  ;;  %v1623_v25 = vsel %vm1615_vm2, %v3013_v37, -inf  ;;  %v1624_v26 = vsel %vm1616_vm3, %v3021_v42, -inf }
 0xddd   :  { %v1625_v27 = vsel %vm1617_vm4, %v3011_v34, -inf  ;;  %v1626_v28 = vsel %vm1618_vm5, %v3019_v40, -inf  ;;  %v1627_v29 = vsel %vm1619_vm6, %v3017_v39, -inf  ;;  %v1628_v30 = vsel %vm1620_vm7, %v3023_v43, -inf }
 0xdde   :  { %v1629_v31 = vmax.f32 %v1621_v24, %v1625_v27  ;;  %v1630_v32 = vmax.f32 %v1622_v11, %v1626_v28  ;;  %v1631_v35 = vmax.f32 %v1623_v25, %v1627_v29  ;;  %v1632_v36 = vmax.f32 %v1624_v26, %v1628_v30 }
 0xde0   :  { %v1633_v41 = vmax.f32 %v1629_v31, %v1630_v32  ;;  %v1634_v44 = vmax.f32 %v1631_v35, %v1632_v36 }
 0xde2   :  { %v1612_v45 = vpop.xlane.xlu1 %1611  ;;  %v1635_v46 = vmax.f32 %v1633_v41, %v1634_v44 }
 0xde3   :  { %vm1638_vm8 = vcmp.lt.f32.partialorder %v3031_v49, %v1612_v45  ;;  %vm1639_vm9 = vcmp.lt.f32.partialorder %v3039_v55, %v1612_v45  ;;  %vm1640_vm10 = vcmp.lt.f32.partialorder %v3033_v50, %v1612_v45  ;;  %vm1641_vm11 = vcmp.lt.f32.partialorder %v3045_v60, %v1612_v45 }
 0xde4   :  { %1636 = vmax.xlane.f32.xlu0 %v1635_v46  ;;  %vm1642_vm12 = vcmp.lt.f32.partialorder %v3035_v51, %v1612_v45  ;;  %vm1643_vm13 = vcmp.lt.f32.partialorder %v3043_v57, %v1612_v45  ;;  %vm1644_vm14 = vcmp.lt.f32.partialorder %v3041_v56, %v1612_v45  ;;  %vm1645_vm15 = vcmp.lt.f32.partialorder %v3047_v61, %v1612_v45 }
 0xde5   :  { %v1646_v47 = vsel %vm1638_vm8, %v3031_v49, -inf  ;;  %v1647_v52 = vsel %vm1639_vm9, %v3039_v55, -inf  ;;  %v1648_v53 = vsel %vm1640_vm10, %v3033_v50, -inf  ;;  %v1649_v54 = vsel %vm1641_vm11, %v3045_v60, -inf }
 0xde6   :  { %v1650_v58 = vsel %vm1642_vm12, %v3035_v51, -inf  ;;  %v1651_v59 = vsel %vm1643_vm13, %v3043_v57, -inf  ;;  %v1652_v62 = vsel %vm1644_vm14, %v3041_v56, -inf  ;;  %v1653_v63 = vsel %vm1645_vm15, %v3047_v61, -inf }
 0xde7   :  { %v1654_v1 = vmax.f32 %v1646_v47, %v1650_v58  ;;  %v1655_v2 = vmax.f32 %v1647_v52, %v1651_v59  ;;  %v1656_v3 = vmax.f32 %v1648_v53, %v1652_v62  ;;  %v1657_v4 = vmax.f32 %v1649_v54, %v1653_v63 }
 0xde9   :  { %v1658_v5 = vmax.f32 %v1654_v1, %v1655_v2  ;;  %v1659_v6 = vmax.f32 %v1656_v3, %v1657_v4 }
 0xdeb   :  { %v1660_v7 = vmax.f32 %v1658_v5, %v1659_v6 }
 0xded   :  { %1661 = vmax.xlane.f32.xlu1 %v1660_v7 }
 0xe71   :  { %v1637_v8 = vpop.xlane.xlu0 %1636 }
 0xe72   :  { %vm1663_vm0 = vcmp.lt.f32.partialorder %v3009_v33, %v1637_v8  ;;  %vm1664_vm1 = vcmp.lt.f32.partialorder %v3015_v38, %v1637_v8  ;;  %vm1665_vm2 = vcmp.lt.f32.partialorder %v3013_v37, %v1637_v8  ;;  %vm1666_vm3 = vcmp.lt.f32.partialorder %v3021_v42, %v1637_v8 }
 0xe73   :  { %vm1667_vm4 = vcmp.lt.f32.partialorder %v3011_v34, %v1637_v8  ;;  %vm1668_vm5 = vcmp.lt.f32.partialorder %v3019_v40, %v1637_v8  ;;  %vm1669_vm6 = vcmp.lt.f32.partialorder %v3017_v39, %v1637_v8  ;;  %vm1670_vm7 = vcmp.lt.f32.partialorder %v3023_v43, %v1637_v8 }
 0xe74   :  { %v1671_v9 = vsel %vm1663_vm0, %v3009_v33, -inf  ;;  %v1672_v10 = vsel %vm1664_vm1, %v3015_v38, -inf  ;;  %v1673_v12 = vsel %vm1665_vm2, %v3013_v37, -inf  ;;  %v1674_v13 = vsel %vm1666_vm3, %v3021_v42, -inf }
 0xe75   :  { %v1675_v14 = vsel %vm1667_vm4, %v3011_v34, -inf  ;;  %v1676_v15 = vsel %vm1668_vm5, %v3019_v40, -inf  ;;  %v1677_v16 = vsel %vm1669_vm6, %v3017_v39, -inf  ;;  %v1678_v17 = vsel %vm1670_vm7, %v3023_v43, -inf }
 0xe76   :  { %v1679_v18 = vmax.f32 %v1671_v9, %v1675_v14  ;;  %v1680_v48 = vmax.f32 %v1672_v10, %v1676_v15  ;;  %v1681_v19 = vmax.f32 %v1673_v12, %v1677_v16  ;;  %v1682_v20 = vmax.f32 %v1674_v13, %v1678_v17 }
 0xe78   :  { %v1683_v21 = vmax.f32 %v1679_v18, %v1680_v48  ;;  %v1684_v0 = vmax.f32 %v1681_v19, %v1682_v20 }
 0xe7a   :  { %v1662_v22 = vpop.xlane.xlu1 %1661  ;;  %v1685_v23 = vmax.f32 %v1683_v21, %v1684_v0 }
 0xe7b   :  { %vm1688_vm8 = vcmp.lt.f32.partialorder %v3031_v49, %v1662_v22  ;;  %vm1689_vm9 = vcmp.lt.f32.partialorder %v3039_v55, %v1662_v22  ;;  %vm1690_vm10 = vcmp.lt.f32.partialorder %v3033_v50, %v1662_v22  ;;  %vm1691_vm11 = vcmp.lt.f32.partialorder %v3045_v60, %v1662_v22 }
 0xe7c   :  { %1686 = vmax.xlane.f32.xlu0 %v1685_v23  ;;  %vm1692_vm12 = vcmp.lt.f32.partialorder %v3035_v51, %v1662_v22  ;;  %vm1693_vm13 = vcmp.lt.f32.partialorder %v3043_v57, %v1662_v22  ;;  %vm1694_vm14 = vcmp.lt.f32.partialorder %v3041_v56, %v1662_v22  ;;  %vm1695_vm15 = vcmp.lt.f32.partialorder %v3047_v61, %v1662_v22  ;;  %v1893_v23 = vld [vmem:[#allocation9 + $0x80] sm:$0xff] }
 0xe7d   :  { %v1696_v24 = vsel %vm1688_vm8, %v3031_v49, -inf  ;;  %v1697_v11 = vsel %vm1689_vm9, %v3039_v55, -inf  ;;  %v1698_v25 = vsel %vm1690_vm10, %v3033_v50, -inf  ;;  %v1699_v26 = vsel %vm1691_vm11, %v3045_v60, -inf }
 0xe7e   :  { %v1700_v27 = vsel %vm1692_vm12, %v3035_v51, -inf  ;;  %v1701_v28 = vsel %vm1693_vm13, %v3043_v57, -inf  ;;  %v1702_v29 = vsel %vm1694_vm14, %v3041_v56, -inf  ;;  %v1703_v30 = vsel %vm1695_vm15, %v3047_v61, -inf }
 0xe7f   :  { %v1704_v31 = vmax.f32 %v1696_v24, %v1700_v27  ;;  %v1705_v32 = vmax.f32 %v1697_v11, %v1701_v28  ;;  %v1706_v35 = vmax.f32 %v1698_v25, %v1702_v29  ;;  %v1707_v36 = vmax.f32 %v1699_v26, %v1703_v30  ;;  %v1894_v24 = vld [vmem:[#allocation9 + $0x88] sm:$0xff]  ;;  %v1925_v11 = vld [vmem:[#allocation9 + $0x180] sm:$0xff] }
 0xe80   :  { %v2632_v25 = vpack.c.bf16 %v1894_v24, %v1893_v23  ;;  %v1926_v26 = vld [vmem:[#allocation9 + $0x188] sm:$0xff]  ;;  %v1877_v27 = vld [vmem:[#allocation9] sm:$0xff] }
 0xe81   :  { %v1708_v41 = vmax.f32 %v1704_v31, %v1705_v32  ;;  %v1709_v44 = vmax.f32 %v1706_v35, %v1707_v36  ;;  %v1878_v28 = vld [vmem:[#allocation9 + $0x8] sm:$0xff]  ;;  %v2664_v29 = vpack.c.bf16 %v1926_v26, %v1925_v11  ;;  %v1909_v31 = vld [vmem:[#allocation9 + $0x100] sm:$0xff]  ;;  %v1895_v35 = vld [vmem:[#allocation9 + $0x90] sm:$0xff] }
 0xe82   :  { %v2634_v30 = vpack.c.bf16 %v1878_v28, %v1877_v27  ;;  %v1910_v32 = vld [vmem:[#allocation9 + $0x108] sm:$0xff]  ;;  %2633 = vmatprep.subr.bf16.mxu0 %v2632_v25  ;;  %v1933_v23 = vld [vmem:[#allocation9 + $0x1c0] sm:$0xff] }
 0xe83   :  { %v1710_v45 = vmax.f32 %v1708_v41, %v1709_v44  ;;  %v2666_v36 = vpack.c.bf16 %v1910_v32, %v1909_v31  ;;  %v1896_v41 = vld [vmem:[#allocation9 + $0x98] sm:$0xff]  ;;  %v1927_v44 = vld [vmem:[#allocation9 + $0x190] sm:$0xff]  ;;  %2665 = vmatprep.subr.bf16.mxu1 %v2664_v29  ;;  %v1934_v24 = vld [vmem:[#allocation9 + $0x1c8] sm:$0xff] }
 0xe84   :  { %2635 = vmatpush3.bf16.msra.mxu0 %v2634_v30  ;;  %v1885_v27 = vld [vmem:[#allocation9 + $0x40] sm:$0xff]  ;;  %v1886_v28 = vld [vmem:[#allocation9 + $0x48] sm:$0xff]  ;;  %v2680_v30 = vpack.c.bf16 %v1934_v24, %v1933_v23  ;;  %v1903_v32 = vld [vmem:[#allocation9 + $0xd0] sm:$0xff] }
 0xe85   :  { %1711 = vmax.xlane.f32.xlu1 %v1710_v45  ;;  %v1928_v45 = vld [vmem:[#allocation9 + $0x198] sm:$0xff]  ;;  %2667 = vmatpush3.bf16.msra.mxu1 %v2666_v36  ;;  %v1917_v29 = vld [vmem:[#allocation9 + $0x140] sm:$0xff]  ;;  %v1918_v31 = vld [vmem:[#allocation9 + $0x148] sm:$0xff] }
 0xe86   :  { %v1935_v36 = vld [vmem:[#allocation9 + $0x1d0] sm:$0xff] }
 0xf09   :  { %v1687_v46 = vpop.xlane.xlu0 %1686 }
 0xf0a   :  { %vm1713_vm0 = vcmp.lt.f32.partialorder %v3009_v33, %v1687_v46  ;;  %vm1714_vm1 = vcmp.lt.f32.partialorder %v3015_v38, %v1687_v46  ;;  %vm1715_vm2 = vcmp.lt.f32.partialorder %v3013_v37, %v1687_v46  ;;  %vm1716_vm3 = vcmp.lt.f32.partialorder %v3021_v42, %v1687_v46 }
 0xf0b   :  { %vm1717_vm4 = vcmp.lt.f32.partialorder %v3011_v34, %v1687_v46  ;;  %vm1718_vm5 = vcmp.lt.f32.partialorder %v3019_v40, %v1687_v46  ;;  %vm1719_vm6 = vcmp.lt.f32.partialorder %v3017_v39, %v1687_v46  ;;  %vm1720_vm7 = vcmp.lt.f32.partialorder %v3023_v43, %v1687_v46 }
 0xf0c   :  { %v1721_v47 = vsel %vm1713_vm0, %v3009_v33, -inf  ;;  %v1722_v52 = vsel %vm1714_vm1, %v3015_v38, -inf  ;;  %v1723_v53 = vsel %vm1715_vm2, %v3013_v37, -inf  ;;  %v1724_v54 = vsel %vm1716_vm3, %v3021_v42, -inf }
 0xf0d   :  { %v1725_v58 = vsel %vm1717_vm4, %v3011_v34, -inf  ;;  %v1726_v59 = vsel %vm1718_vm5, %v3019_v40, -inf  ;;  %v1727_v62 = vsel %vm1719_vm6, %v3017_v39, -inf  ;;  %v1728_v63 = vsel %vm1720_vm7, %v3023_v43, -inf }
 0xf0e   :  { %v1729_v1 = vmax.f32 %v1721_v47, %v1725_v58  ;;  %v1730_v2 = vmax.f32 %v1722_v52, %v1726_v59  ;;  %v1731_v3 = vmax.f32 %v1723_v53, %v1727_v62  ;;  %v1732_v4 = vmax.f32 %v1724_v54, %v1728_v63  ;;  %v1879_v52 = vld [vmem:[#allocation9 + $0x10] sm:$0xff]  ;;  %v1880_v53 = vld [vmem:[#allocation9 + $0x18] sm:$0xff]  ;;  %v1897_v62 = vld [vmem:[#allocation9 + $0xa0] sm:$0xff] }
 0xf0f   :  { %v2636_v46 = vpack.c.bf16 %v1896_v41, %v1895_v35  ;;  %v2668_v47 = vpack.c.bf16 %v1928_v45, %v1927_v44  ;;  %v1911_v54 = vld [vmem:[#allocation9 + $0x110] sm:$0xff]  ;;  %v2638_v58 = vpack.c.bf16 %v1880_v53, %v1879_v52  ;;  %v1912_v59 = vld [vmem:[#allocation9 + $0x118] sm:$0xff]  ;;  %v1898_v63 = vld [vmem:[#allocation9 + $0xa8] sm:$0xff]  ;;  %v2650_v44 = vpack.c.bf16 %v1886_v28, %v1885_v27 }
 0xf10   :  { %v1733_v5 = vmax.f32 %v1729_v1, %v1730_v2  ;;  %v1734_v6 = vmax.f32 %v1731_v3, %v1732_v4  ;;  %v2670_v1 = vpack.c.bf16 %v1912_v59, %v1911_v54  ;;  %v2640_v2 = vpack.c.bf16 %v1898_v63, %v1897_v62  ;;  %v1929_v3 = vld [vmem:[#allocation9 + $0x1a0] sm:$0xff]  ;;  %v1930_v4 = vld [vmem:[#allocation9 + $0x1a8] sm:$0xff]  ;;  %v1904_v35 = vld [vmem:[#allocation9 + $0xd8] sm:$0xff] }
 0xf11   :  { %2637 = vmatprep.subr.bf16.mxu0 %v2636_v46  ;;  %2669 = vmatprep.subr.bf16.mxu1 %v2668_v47  ;;  %v1936_v41 = vld [vmem:[#allocation9 + $0x1d8] sm:$0xff]  ;;  %v2682_v45 = vpack.c.bf16 %v1918_v31, %v1917_v29  ;;  %v2652_v46 = vpack.c.bf16 %v1904_v35, %v1903_v32  ;;  %v1887_v47 = vld [vmem:[#allocation9 + $0x50] sm:$0xff]  ;;  %v1905_v59 = vld [vmem:[#allocation9 + $0xe0] sm:$0xff] }
 0xf12   :  { %v1712_v7 = vpop.xlane.xlu1 %1711  ;;  %v1735_v8 = vmax.f32 %v1733_v5, %v1734_v6  ;;  %v1881_v5 = vld [vmem:[#allocation9 + $0x20] sm:$0xff]  ;;  %v2672_v6 = vpack.c.bf16 %v1930_v4, %v1929_v3  ;;  %2639 = vmatpush3.bf16.msra.mxu0 %v2638_v58  ;;  %2671 = vmatpush3.bf16.msra.mxu1 %v2670_v1  ;;  %v1888_v52 = vld [vmem:[#allocation9 + $0x58] sm:$0xff]  ;;  %v1919_v53 = vld [vmem:[#allocation9 + $0x150] sm:$0xff]  ;;  %v2684_v54 = vpack.c.bf16 %v1936_v41, %v1935_v36 }
 0xf13   :  { %vm1738_vm8 = vcmp.lt.f32.partialorder %v3031_v49, %v1712_v7  ;;  %vm1739_vm9 = vcmp.lt.f32.partialorder %v3039_v55, %v1712_v7  ;;  %vm1740_vm10 = vcmp.lt.f32.partialorder %v3033_v50, %v1712_v7  ;;  %vm1741_vm11 = vcmp.lt.f32.partialorder %v3045_v60, %v1712_v7  ;;  %2641 = vmatprep.subr.bf16.mxu0 %v2640_v2  ;;  %v1920_v58 = vld [vmem:[#allocation9 + $0x158] sm:$0xff]  ;;  %v1906_v62 = vld [vmem:[#allocation9 + $0xe8] sm:$0xff]  ;;  %v1937_v63 = vld [vmem:[#allocation9 + $0x1e0] sm:$0xff] }
 0xf14   :  { %1736 = vmax.xlane.f32.xlu0 %v1735_v8  ;;  %vm1742_vm12 = vcmp.lt.f32.partialorder %v3035_v51, %v1712_v7  ;;  %vm1743_vm13 = vcmp.lt.f32.partialorder %v3043_v57, %v1712_v7  ;;  %vm1744_vm14 = vcmp.lt.f32.partialorder %v3041_v56, %v1712_v7  ;;  %vm1745_vm15 = vcmp.lt.f32.partialorder %v3047_v61, %v1712_v7  ;;  %v1882_v7 = vld [vmem:[#allocation9 + $0x28] sm:$0xff]  ;;  %v1913_v8 = vld [vmem:[#allocation9 + $0x120] sm:$0xff] }
 0xf15   :  { %v1746_v9 = vsel %vm1738_vm8, %v3031_v49, -inf  ;;  %v1747_v10 = vsel %vm1739_vm9, %v3039_v55, -inf  ;;  %v1748_v12 = vsel %vm1740_vm10, %v3033_v50, -inf  ;;  %v1749_v13 = vsel %vm1741_vm11, %v3045_v60, -inf  ;;  %2673 = vmatprep.subr.bf16.mxu1 %v2672_v6  ;;  %v1938_v1 = vld [vmem:[#allocation9 + $0x1e8] sm:$0xff] }
 0xf16   :  { %v1750_v14 = vsel %vm1742_vm12, %v3035_v51, -inf  ;;  %v1751_v15 = vsel %vm1743_vm13, %v3043_v57, -inf  ;;  %v1752_v16 = vsel %vm1744_vm14, %v3041_v56, -inf  ;;  %v1753_v17 = vsel %vm1745_vm15, %v3047_v61, -inf  ;;  %v1890_v6 = vld [vmem:[#allocation9 + $0x68] sm:$0xff] }
 0xf17   :  { %v1754_v18 = vmax.f32 %v1746_v9, %v1750_v14  ;;  %v1755_v48 = vmax.f32 %v1747_v10, %v1751_v15  ;;  %v1756_v19 = vmax.f32 %v1748_v12, %v1752_v16  ;;  %v1757_v20 = vmax.f32 %v1749_v13, %v1753_v17  ;;  %v1914_v9 = vld [vmem:[#allocation9 + $0x128] sm:$0xff]  ;;  %v1899_v12 = vld [vmem:[#allocation9 + $0xb0] sm:$0xff]  ;;  %v1900_v13 = vld [vmem:[#allocation9 + $0xb8] sm:$0xff] }
 0xf18   :  { %v2642_v10 = vpack.c.bf16 %v1882_v7, %v1881_v5  ;;  %v1931_v14 = vld [vmem:[#allocation9 + $0x1b0] sm:$0xff]  ;;  %v2674_v15 = vpack.c.bf16 %v1914_v9, %v1913_v8  ;;  %v2644_v16 = vpack.c.bf16 %v1900_v13, %v1899_v12  ;;  %v1932_v17 = vld [vmem:[#allocation9 + $0x1b8] sm:$0xff]  ;;  %v2654_v2 = vpack.c.bf16 %v1888_v52, %v1887_v47  ;;  %v1889_v5 = vld [vmem:[#allocation9 + $0x60] sm:$0xff] }
 0xf19   :  { %v1758_v21 = vmax.f32 %v1754_v18, %v1755_v48  ;;  %v1759_v0 = vmax.f32 %v1756_v19, %v1757_v20  ;;  %v1883_v18 = vld [vmem:[#allocation9 + $0x30] sm:$0xff]  ;;  %v1884_v48 = vld [vmem:[#allocation9 + $0x38] sm:$0xff]  ;;  %v2676_v19 = vpack.c.bf16 %v1932_v17, %v1931_v14  ;;  %v2686_v3 = vpack.c.bf16 %v1920_v58, %v1919_v53  ;;  %v1921_v7 = vld [vmem:[#allocation9 + $0x160] sm:$0xff] }
 0xf1a   :  { %v1915_v20 = vld [vmem:[#allocation9 + $0x130] sm:$0xff]  ;;  %2643 = vmatpush3.bf16.msra.mxu0 %v2642_v10  ;;  %v2646_v11 = vpack.c.bf16 %v1884_v48, %v1883_v18  ;;  %2675 = vmatpush3.bf16.msra.mxu1 %v2674_v15  ;;  %v2656_v4 = vpack.c.bf16 %v1906_v62, %v1905_v59  ;;  %v2688_v8 = vpack.c.bf16 %v1938_v1, %v1937_v63  ;;  %v1922_v9 = vld [vmem:[#allocation9 + $0x168] sm:$0xff]  ;;  %v1908_v12 = vld [vmem:[#allocation9 + $0xf8] sm:$0xff] }
 0xf1b   :  { %v1760_v22 = vmax.f32 %v1758_v21, %v1759_v0  ;;  %v1916_v21 = vld [vmem:[#allocation9 + $0x138] sm:$0xff]  ;;  %v1901_v0 = vld [vmem:[#allocation9 + $0xc0] sm:$0xff]  ;;  %2645 = vmatprep.subr.bf16.mxu0 %v2644_v16  ;;  %2677 = vmatprep.subr.bf16.mxu1 %v2676_v19  ;;  %v1907_v10 = vld [vmem:[#allocation9 + $0xf0] sm:$0xff]  ;;  %v2658_v15 = vpack.c.bf16 %v1890_v6, %v1889_v5  ;;  %v2690_v16 = vpack.c.bf16 %v1922_v9, %v1921_v7 }
 0xf1c   :  { %v2678_v25 = vpack.c.bf16 %v1916_v21, %v1915_v20  ;;  %v1939_v13 = vld [vmem:[#allocation9 + $0x1f0] sm:$0xff]  ;;  %v1940_v14 = vld [vmem:[#allocation9 + $0x1f8] sm:$0xff]  ;;  %v2660_v17 = vpack.c.bf16 %v1908_v12, %v1907_v10  ;;  %v1958_v9 = vld [vmem:[#allocation9 + $0x288] sm:$0xff] }
 0xf1d   :  { %1761 = vmax.xlane.f32.xlu1 %v1760_v22  ;;  %v1902_v22 = vld [vmem:[#allocation9 + $0xc8] sm:$0xff]  ;;  %v1891_v18 = vld [vmem:[#allocation9 + $0x70] sm:$0xff]  ;;  %v1892_v48 = vld [vmem:[#allocation9 + $0x78] sm:$0xff]  ;;  %v2692_v19 = vpack.c.bf16 %v1940_v14, %v1939_v13 }
 0xf1e   :  { %v2648_v26 = vpack.c.bf16 %v1902_v22, %v1901_v0  ;;  %2647 = vmatpush3.bf16.msra.mxu0 %v2646_v11  ;;  %2679 = vmatpush3.bf16.msra.mxu1 %v2678_v25  ;;  %v1923_v20 = vld [vmem:[#allocation9 + $0x170] sm:$0xff]  ;;  %v1924_v21 = vld [vmem:[#allocation9 + $0x178] sm:$0xff]  ;;  %v2662_v0 = vpack.c.bf16 %v1892_v48, %v1891_v18  ;;  %v1989_v10 = vld [vmem:[#allocation9 + $0x380] sm:$0xff] }
 0xf1f   :  { %2681 = vmatprep.subr.bf16.mxu1 %v2680_v30  ;;  %v2694_v22 = vpack.c.bf16 %v1924_v21, %v1923_v20  ;;  %v1990_v13 = vld [vmem:[#allocation9 + $0x388] sm:$0xff]  ;;  %v1959_v48 = vld [vmem:[#allocation9 + $0x290] sm:$0xff]  ;;  %v1992_v21 = vld [vmem:[#allocation9 + $0x398] sm:$0xff] }
 0xf20   :  { %2649 = vmatprep.subr.bf16.mxu0 %v2648_v26  ;;  %v2728_v14 = vpack.c.bf16 %v1990_v13, %v1989_v10  ;;  %v1974_v18 = vld [vmem:[#allocation9 + $0x308] sm:$0xff]  ;;  %v1991_v20 = vld [vmem:[#allocation9 + $0x390] sm:$0xff]  ;;  %v1981_v10 = vld [vmem:[#allocation9 + $0x340] sm:$0xff] }
 0xf21   :  { %v1967_v13 = vld [vmem:[#allocation9 + $0x2d0] sm:$0xff] }
 0xf22   :  { %2651 = vmatpush3.bf16.msra.mxu0 %v2650_v44  ;;  %2683 = vmatpush3.bf16.msra.mxu1 %v2682_v45 }
 0xf23   :  { %2653 = vmatprep.subr.bf16.mxu0 %v2652_v46  ;;  %2685 = vmatprep.subr.bf16.mxu1 %v2684_v54 }
 0xf26   :  { %2655 = vmatpush3.bf16.msra.mxu0 %v2654_v2  ;;  %2687 = vmatpush3.bf16.msra.mxu1 %v2686_v3 }
 0xf27   :  { %2657 = vmatprep.subr.bf16.mxu0 %v2656_v4  ;;  %2689 = vmatprep.subr.bf16.mxu1 %v2688_v8  ;;  %v1957_v8 = vld [vmem:[#allocation9 + $0x280] sm:$0xff] }
 0xf28   :  { %v2696_v12 = vpack.c.bf16 %v1958_v9, %v1957_v8  ;;  %v1950_v8 = vld [vmem:[#allocation9 + $0x248] sm:$0xff] }
 0xf2a   :  { %2659 = vmatpush3.bf16.msra.mxu0 %v2658_v15  ;;  %2691 = vmatpush3.bf16.msra.mxu1 %v2690_v16  ;;  %v1941_v15 = vld [vmem:[#allocation9 + $0x200] sm:$0xff]  ;;  %v1942_v16 = vld [vmem:[#allocation9 + $0x208] sm:$0xff] }
 0xf2b   :  { %2661 = vmatprep.subr.bf16.mxu0 %v2660_v17  ;;  %2693 = vmatprep.subr.bf16.mxu1 %v2692_v19  ;;  %v1973_v17 = vld [vmem:[#allocation9 + $0x300] sm:$0xff]  ;;  %v1960_v19 = vld [vmem:[#allocation9 + $0x298] sm:$0xff] }
 0xf2e   :  { %2663 = vmatpush3.bf16.msra.mxu0 %v2662_v0  ;;  %2695 = vmatpush3.bf16.msra.mxu1 %v2694_v22  ;;  %v2698_v22 = vpack.c.bf16 %v1942_v16, %v1941_v15  ;;  %v1999_v15 = vld [vmem:[#allocation9 + $0x3d0] sm:$0xff]  ;;  %v2000_v16 = vld [vmem:[#allocation9 + $0x3d8] sm:$0xff] }
 0xf2f   :  { %2697 = vmatprep.subr.bf16.mxu0 %v2696_v12  ;;  %2729 = vmatprep.subr.bf16.mxu1 %v2728_v14  ;;  %v1982_v12 = vld [vmem:[#allocation9 + $0x348] sm:$0xff]  ;;  %v1968_v14 = vld [vmem:[#allocation9 + $0x2d8] sm:$0xff] }
 0xfa1   :  { %v1737_v23 = vpop.xlane.xlu0 %1736 }
 0xfa2   :  { %vm1763_vm0 = vcmp.lt.f32.partialorder %v3009_v33, %v1737_v23  ;;  %vm1764_vm1 = vcmp.lt.f32.partialorder %v3015_v38, %v1737_v23  ;;  %vm1765_vm2 = vcmp.lt.f32.partialorder %v3013_v37, %v1737_v23  ;;  %vm1766_vm3 = vcmp.lt.f32.partialorder %v3021_v42, %v1737_v23 }
 0xfa3   :  { %vm1767_vm4 = vcmp.lt.f32.partialorder %v3011_v34, %v1737_v23  ;;  %vm1768_vm5 = vcmp.lt.f32.partialorder %v3019_v40, %v1737_v23  ;;  %vm1769_vm6 = vcmp.lt.f32.partialorder %v3017_v39, %v1737_v23  ;;  %vm1770_vm7 = vcmp.lt.f32.partialorder %v3023_v43, %v1737_v23 }
 0xfa4   :  { %v1771_v24 = vsel %vm1763_vm0, %v3009_v33, -inf  ;;  %v1772_v11 = vsel %vm1764_vm1, %v3015_v38, -inf  ;;  %v1773_v25 = vsel %vm1765_vm2, %v3013_v37, -inf  ;;  %v1774_v26 = vsel %vm1766_vm3, %v3021_v42, -inf }
 0xfa5   :  { %v1775_v27 = vsel %vm1767_vm4, %v3011_v34, -inf  ;;  %v1776_v28 = vsel %vm1768_vm5, %v3019_v40, -inf  ;;  %v1777_v29 = vsel %vm1769_vm6, %v3017_v39, -inf  ;;  %v1778_v30 = vsel %vm1770_vm7, %v3023_v43, -inf }
 0xfa6   :  { %v1779_v31 = vmax.f32 %v1771_v24, %v1775_v27  ;;  %v1780_v32 = vmax.f32 %v1772_v11, %v1776_v28  ;;  %v1781_v35 = vmax.f32 %v1773_v25, %v1777_v29  ;;  %v1782_v36 = vmax.f32 %v1774_v26, %v1778_v30  ;;  %v1943_v25 = vld [vmem:[#allocation9 + $0x210] sm:$0xff]  ;;  %v1944_v26 = vld [vmem:[#allocation9 + $0x218] sm:$0xff]  ;;  %v1961_v29 = vld [vmem:[#allocation9 + $0x2a0] sm:$0xff] }
 0xfa7   :  { %v2730_v23 = vpack.c.bf16 %v1974_v18, %v1973_v17  ;;  %v2700_v24 = vpack.c.bf16 %v1960_v19, %v1959_v48  ;;  %v2732_v11 = vpack.c.bf16 %v1992_v21, %v1991_v20  ;;  %v1975_v27 = vld [vmem:[#allocation9 + $0x310] sm:$0xff]  ;;  %v1976_v28 = vld [vmem:[#allocation9 + $0x318] sm:$0xff]  ;;  %v1962_v30 = vld [vmem:[#allocation9 + $0x2a8] sm:$0xff]  ;;  %v2716_v48 = vpack.c.bf16 %v1968_v14, %v1967_v13 }
 0xfa8   :  { %v1783_v41 = vmax.f32 %v1779_v31, %v1780_v32  ;;  %v1784_v44 = vmax.f32 %v1781_v35, %v1782_v36  ;;  %v1993_v31 = vld [vmem:[#allocation9 + $0x3a0] sm:$0xff]  ;;  %v1994_v32 = vld [vmem:[#allocation9 + $0x3a8] sm:$0xff]  ;;  %v2702_v35 = vpack.c.bf16 %v1944_v26, %v1943_v25  ;;  %v2734_v36 = vpack.c.bf16 %v1976_v28, %v1975_v27  ;;  %v1951_v17 = vld [vmem:[#allocation9 + $0x250] sm:$0xff] }
 0xfa9   :  { %v1952_v18 = vld [vmem:[#allocation9 + $0x258] sm:$0xff]  ;;  %v2748_v19 = vpack.c.bf16 %v2000_v16, %v1999_v15  ;;  %v1983_v20 = vld [vmem:[#allocation9 + $0x350] sm:$0xff]  ;;  %v1953_v27 = vld [vmem:[#allocation9 + $0x260] sm:$0xff] }
 0xfaa   :  { %v1762_v45 = vpop.xlane.xlu1 %1761  ;;  %v1785_v46 = vmax.f32 %v1783_v41, %v1784_v44  ;;  %v2704_v41 = vpack.c.bf16 %v1962_v30, %v1961_v29  ;;  %v2736_v44 = vpack.c.bf16 %v1994_v32, %v1993_v31  ;;  %v1984_v21 = vld [vmem:[#allocation9 + $0x358] sm:$0xff]  ;;  %v2718_v25 = vpack.c.bf16 %v1952_v18, %v1951_v17  ;;  %v1954_v28 = vld [vmem:[#allocation9 + $0x268] sm:$0xff]  ;;  %v1985_v31 = vld [vmem:[#allocation9 + $0x360] sm:$0xff] }
 0xfab   :  { %vm1788_vm8 = vcmp.lt.f32.partialorder %v3031_v49, %v1762_v45  ;;  %vm1789_vm9 = vcmp.lt.f32.partialorder %v3039_v55, %v1762_v45  ;;  %vm1790_vm10 = vcmp.lt.f32.partialorder %v3033_v50, %v1762_v45  ;;  %vm1791_vm11 = vcmp.lt.f32.partialorder %v3045_v60, %v1762_v45  ;;  %v1986_v32 = vld [vmem:[#allocation9 + $0x368] sm:$0xff] }
 0xfac   :  { %1786 = vmax.xlane.f32.xlu0 %v1785_v46  ;;  %vm1792_vm12 = vcmp.lt.f32.partialorder %v3035_v51, %v1762_v45  ;;  %vm1793_vm13 = vcmp.lt.f32.partialorder %v3043_v57, %v1762_v45  ;;  %vm1794_vm14 = vcmp.lt.f32.partialorder %v3041_v56, %v1762_v45  ;;  %vm1795_vm15 = vcmp.lt.f32.partialorder %v3047_v61, %v1762_v45  ;;  %v1945_v45 = vld [vmem:[#allocation9 + $0x220] sm:$0xff]  ;;  %v1946_v46 = vld [vmem:[#allocation9 + $0x228] sm:$0xff] }
 0xfad   :  { %v1796_v47 = vsel %vm1788_vm8, %v3031_v49, -inf  ;;  %v1797_v52 = vsel %vm1789_vm9, %v3039_v55, -inf  ;;  %v1798_v53 = vsel %vm1790_vm10, %v3033_v50, -inf  ;;  %v1799_v54 = vsel %vm1791_vm11, %v3045_v60, -inf }
 0xfae   :  { %v1800_v58 = vsel %vm1792_vm12, %v3035_v51, -inf  ;;  %v1801_v59 = vsel %vm1793_vm13, %v3043_v57, -inf  ;;  %v1802_v62 = vsel %vm1794_vm14, %v3041_v56, -inf  ;;  %v1803_v63 = vsel %vm1795_vm15, %v3047_v61, -inf }
 0xfaf   :  { %v1804_v1 = vmax.f32 %v1796_v47, %v1800_v58  ;;  %v1805_v2 = vmax.f32 %v1797_v52, %v1801_v59  ;;  %v1806_v3 = vmax.f32 %v1798_v53, %v1802_v62  ;;  %v1807_v4 = vmax.f32 %v1799_v54, %v1803_v63  ;;  %v1978_v47 = vld [vmem:[#allocation9 + $0x328] sm:$0xff]  ;;  %v1964_v52 = vld [vmem:[#allocation9 + $0x2b8] sm:$0xff]  ;;  %v1995_v53 = vld [vmem:[#allocation9 + $0x3b0] sm:$0xff] }
 0xfb0   :  { %v1947_v59 = vld [vmem:[#allocation9 + $0x230] sm:$0xff]  ;;  %v1948_v62 = vld [vmem:[#allocation9 + $0x238] sm:$0xff]  ;;  %v2750_v26 = vpack.c.bf16 %v1984_v21, %v1983_v20 }
 0xfb1   :  { %v1808_v5 = vmax.f32 %v1804_v1, %v1805_v2  ;;  %v1809_v6 = vmax.f32 %v1806_v3, %v1807_v4  ;;  %v1979_v2 = vld [vmem:[#allocation9 + $0x330] sm:$0xff]  ;;  %v1980_v3 = vld [vmem:[#allocation9 + $0x338] sm:$0xff]  ;;  %v1965_v4 = vld [vmem:[#allocation9 + $0x2c0] sm:$0xff] }
 0xfb3   :  { %v1810_v7 = vmax.f32 %v1808_v5, %v1809_v6  ;;  %v1966_v5 = vld [vmem:[#allocation9 + $0x2c8] sm:$0xff]  ;;  %v1997_v6 = vld [vmem:[#allocation9 + $0x3c0] sm:$0xff] }
 0xfb5   :  { %1811 = vmax.xlane.f32.xlu1 %v1810_v7  ;;  %v2742_v7 = vpack.c.bf16 %v1980_v3, %v1979_v2 }
0x1039   :  { %v3825_v0 = vpop.xlane.xlu0 %1786 }
0x103a   :  { %vm1814_vm0 = vcmp.ge.f32.partialorder %v3015_v38, %v3825_v0  ;;  %vm1816_vm1 = vcmp.ge.f32.partialorder %v3021_v42, %v3825_v0  ;;  %vm1813_vm2 = vcmp.ge.f32.partialorder %v3009_v33, %v3825_v0  ;;  %vm1815_vm3 = vcmp.ge.f32.partialorder %v3013_v37, %v3825_v0 }
0x103b   :  { %2336 = vmatprep.mubr.msk.f32.mxu0 %vm1814_vm0, %v3015_v38  ;;  %2340 = vmatprep.mubr.msk.f32.mxu1 %vm1816_vm1, %v3021_v42  ;;  %v1977_v38 = vld [vmem:[#allocation9 + $0x320] sm:$0xff]  ;;  %v1963_v42 = vld [vmem:[#allocation9 + $0x2b0] sm:$0xff]  ;;  %vm1818_vm8 = vcmp.ge.f32.partialorder %v3019_v40, %v3825_v0  ;;  %vm1820_vm9 = vcmp.ge.f32.partialorder %v3023_v43, %v3825_v0  ;;  %vm1817_vm10 = vcmp.ge.f32.partialorder %v3011_v34, %v3825_v0 }
0x103c   :  { %2337 = vmatmul.mubr.msk.f32.vlgmr.msra.gmra.mrb[8].mxu0 %vm1813_vm2, %v3009_v33  ;;  %2341 = vmatmul.mubr.msk.f32.vlgmr.msra.gmra.mrb[8].mxu1 %vm1815_vm3, %v3013_v37  ;;  %v1996_v33 = vld [vmem:[#allocation9 + $0x3b8] sm:$0xff]  ;;  %v2706_v37 = vpack.c.bf16 %v1946_v46, %v1945_v45  ;;  %v2738_v58 = vpack.c.bf16 %v1978_v47, %v1977_v38  ;;  %v2708_v63 = vpack.c.bf16 %v1964_v52, %v1963_v42  ;;  %v1955_v38 = vld [vmem:[#allocation9 + $0x270] sm:$0xff] }
0x103d   :  { %2699 = vmatpush3.bf16.msra.mxu0 %v2698_v22  ;;  %2731 = vmatpush3.bf16.msra.mxu1 %v2730_v23  ;;  %v2740_v1 = vpack.c.bf16 %v1996_v33, %v1995_v53  ;;  %v1969_v22 = vld [vmem:[#allocation9 + $0x2e0] sm:$0xff]  ;;  %v1970_v23 = vld [vmem:[#allocation9 + $0x2e8] sm:$0xff]  ;;  %v2722_v45 = vpack.c.bf16 %v1954_v28, %v1953_v27  ;;  %v2754_v46 = vpack.c.bf16 %v1986_v32, %v1985_v31  ;;  %v1956_v52 = vld [vmem:[#allocation9 + $0x278] sm:$0xff] }
0x103e   :  { %2701 = vmatprep.subr.bf16.mxu0 %v2700_v24  ;;  %2733 = vmatprep.subr.bf16.mxu1 %v2732_v11  ;;  %v2001_v24 = vld [vmem:[#allocation9 + $0x3e0] sm:$0xff]  ;;  %v2002_v11 = vld [vmem:[#allocation9 + $0x3e8] sm:$0xff]  ;;  %v2720_v29 = vpack.c.bf16 %v1970_v23, %v1969_v22  ;;  %v1987_v53 = vld [vmem:[#allocation9 + $0x370] sm:$0xff]  ;;  %vm1819_vm11 = vcmp.ge.f32.partialorder %v3017_v39, %v3825_v0 }
0x103f   :  { %v2752_v30 = vpack.c.bf16 %v2002_v11, %v2001_v24  ;;  %v1988_v33 = vld [vmem:[#allocation9 + $0x378] sm:$0xff]  ;;  %v2335_v0 = vld [vmem:[%s3899_s4] ss:$0 sm:$0xff]  ;;  %s2897_s4 = smov [#allocation11]  }
0x1040   :  { %s2319_s19 = sshll.u32 %s2897_s4, 4  ;;  %s2320_s19 = int_to_ptr.vmem [resolvable:$true] %s2319_s19 }
0x1041   :  { %2703 = vmatpush3.bf16.msra.mxu0 %v2702_v35  ;;  %2735 = vmatpush3.bf16.msra.mxu1 %v2734_v36  ;;  %v1971_v35 = vld [vmem:[#allocation9 + $0x2f0] sm:$0xff]  ;;  %v1972_v36 = vld [vmem:[#allocation9 + $0x2f8] sm:$0xff]  ;;  %s2858_s20 = scalar_lea.vmem %s2320_s19, 256  ;;  %p2863_p5 = scmp.lt.s32.totalorder %s2320_s19, %s2320_s19 }
0x1042   :  { %v3839_v54 = vpop.xlane.xlu1 %1811  ;;  %2705 = vmatprep.subr.bf16.mxu0 %v2704_v41  ;;  %2737 = vmatprep.subr.bf16.mxu1 %v2736_v44  ;;  %v2003_v41 = vld [vmem:[#allocation9 + $0x3f0] sm:$0xff]  ;;  %v2004_v44 = vld [vmem:[#allocation9 + $0x3f8] sm:$0xff]  ;;  %v2724_v47 = vpack.c.bf16 %v1972_v36, %v1971_v35  ;;  %p2859_p4 = scmp.ne.s32.totalorder %s2320_s19, %s2858_s20  ;;  %p2864_p6 = scmp.lt.s32.totalorder %s2858_s20, %s2858_s20 }
0x1043   :  { %vm1838_vm4 = vcmp.ge.f32.partialorder %v3039_v55, %v3839_v54  ;;  %vm1840_vm5 = vcmp.ge.f32.partialorder %v3045_v60, %v3839_v54  ;;  %vm1837_vm6 = vcmp.ge.f32.partialorder %v3031_v49, %v3839_v54  ;;  %vm1839_vm7 = vcmp.ge.f32.partialorder %v3033_v50, %v3839_v54 }
0x1044   :  { %2338 = vmatprep.mubr.msk.f32.mxu0 %vm1838_vm4, %v3039_v55  ;;  %2342 = vmatprep.mubr.msk.f32.mxu1 %vm1840_vm5, %v3045_v60  ;;  %v1998_v55 = vld [vmem:[#allocation9 + $0x3c8] sm:$0xff]  ;;  %v2710_v60 = vpack.c.bf16 %v1948_v62, %v1947_v59  ;;  %v2756_v42 = vpack.c.bf16 %v2004_v44, %v2003_v41  ;;  %vm1842_vm12 = vcmp.ge.f32.partialorder %v3043_v57, %v3839_v54  ;;  %p2865_p7 = por %p2864_p6, %p2863_p5 }
0x1045   :  { %2339 = vmatmul.mubr.msk.f32.gmra.mrb[10].mxu0 %vm1837_vm6, %v3031_v49  ;;  %2343 = vmatmul.mubr.msk.f32.gmra.mrb[10].mxu1 %vm1839_vm7, %v3033_v50  ;;  %v1949_v49 = vld [vmem:[#allocation9 + $0x240] sm:$0xff]  ;;  %v2712_v50 = vpack.c.bf16 %v1966_v5, %v1965_v4  ;;  %v2744_v9 = vpack.c.bf16 %v1998_v55, %v1997_v6  ;;  %vm1844_vm13 = vcmp.ge.f32.partialorder %v3047_v61, %v3839_v54 }
0x1046   :  { %2344 = vmatprep.mubr.msk.f32.mxu0 %vm1818_vm8, %v3019_v40  ;;  %2348 = vmatprep.mubr.msk.f32.mxu1 %vm1820_vm9, %v3023_v43  ;;  %v2714_v40 = vpack.c.bf16 %v1950_v8, %v1949_v49  ;;  %v2746_v43 = vpack.c.bf16 %v1982_v12, %v1981_v10  ;;  %vm1841_vm14 = vcmp.ge.f32.partialorder %v3035_v51, %v3839_v54  ;;  %p2866_p8 = pnand %p2865_p7, %p2859_p4 }
0x1047   :  { %2707 = vmatpush3.bf16.msra.mxu0 %v2706_v37  ;;  %2739 = vmatpush3.bf16.msra.mxu1 %v2738_v58  ;;  %v2726_v37 = vpack.c.bf16 %v1956_v52, %v1955_v38  ;;  %v2758_v58 = vpack.c.bf16 %v1988_v33, %v1987_v53  ;;  %vm1843_vm15 = vcmp.ge.f32.partialorder %v3041_v56, %v3839_v54 }
0x1048   :  { %2709 = vmatprep.subr.bf16.mxu0 %v2708_v63  ;;  %2741 = vmatprep.subr.bf16.mxu1 %v2740_v1 }
0x104b   :  { %2711 = vmatpush3.bf16.msra.mxu0 %v2710_v60  ;;  %2743 = vmatpush3.bf16.msra.mxu1 %v2742_v7 }
0x104c   :  { %2713 = vmatprep.subr.bf16.mxu0 %v2712_v50  ;;  %2745 = vmatprep.subr.bf16.mxu1 %v2744_v9 }
0x104f   :  { %2715 = vmatpush3.bf16.msra.mxu0 %v2714_v40  ;;  %2747 = vmatpush3.bf16.msra.mxu1 %v2746_v43 }
0x1050   :  { %2717 = vmatprep.subr.bf16.mxu0 %v2716_v48  ;;  %2749 = vmatprep.subr.bf16.mxu1 %v2748_v19 }
0x1053   :  { %2719 = vmatpush3.bf16.msra.mxu0 %v2718_v25  ;;  %2751 = vmatpush3.bf16.msra.mxu1 %v2750_v26 }
0x1054   :  { %2721 = vmatprep.subr.bf16.mxu0 %v2720_v29  ;;  %2753 = vmatprep.subr.bf16.mxu1 %v2752_v30 }
0x1057   :  { %2723 = vmatpush3.bf16.msra.mxu0 %v2722_v45  ;;  %2755 = vmatpush3.bf16.msra.mxu1 %v2754_v46 }
0x1058   :  { %2725 = vmatprep.subr.bf16.mxu0 %v2724_v47  ;;  %2757 = vmatprep.subr.bf16.mxu1 %v2756_v42 }
0x105b   :  { %2727 = vmatpush3.bf16.msra.mxu0 %v2726_v37  ;;  %2759 = vmatpush3.bf16.msra.mxu1 %v2758_v58 }
0x105e   :  { %2345 = vmatmul.mubr.msk.f32.vlgmr.msra.gmra.mrb[12].mxu0 %vm1817_vm10, %v3011_v34  ;;  %2349 = vmatmul.mubr.msk.f32.vlgmr.msra.gmra.mrb[12].mxu1 %vm1819_vm11, %v3017_v39 }
0x105f   :  { %2346 = vmatprep.mubr.msk.f32.mxu0 %vm1842_vm12, %v3043_v57  ;;  %2350 = vmatprep.mubr.msk.f32.mxu1 %vm1844_vm13, %v3047_v61 }
0x1062   :  { %2347 = vmatmul.mubr.msk.f32.gmra.mrb[14].mxu0 %vm1841_vm14, %v3035_v51  ;;  %2351 = vmatmul.mubr.msk.f32.gmra.mrb[14].mxu1 %vm1843_vm15, %v3041_v56 }
0x110f   :  { %v2384_v34 = vpop.f32.mrb[8].mxu0  ;;  %v2422_v39 = vpop.f32.mrb[8].mxu1 }
0x1110   :  { %v2385_v59 = vpop.f32.mrb[9].mxu0  ;;  %v2423_v57 = vpop.f32.mrb[9].mxu1 }
0x1111   :  { %v2386_v62 = vadd.f32 %v2385_v59, %v2384_v34  ;;  %v2424_v61 = vadd.f32 %v2423_v57, %v2422_v39 }
0x1113   :  { %v2079_v63 = vadd.f32 %v2386_v62, %v2335_v0 }
0x1115   :  { %v2154_v1 = vadd.f32 %v2424_v61, %v2079_v63 }
0x1118   :  { %v2387_v2 = vpop.f32.mrb[10].mxu0  ;;  %v2425_v3 = vpop.f32.mrb[10].mxu1 }
0x1119   :  { %v2388_v4 = vpop.f32.mrb[11].mxu0  ;;  %v2426_v54 = vpop.f32.mrb[11].mxu1 }
0x111a   :  { %v2389_v5 = vadd.f32 %v2388_v4, %v2387_v2  ;;  %v2427_v51 = vadd.f32 %v2426_v54, %v2425_v3 }
0x111c   :  { %v2084_v6 = vadd.f32 %v2389_v5, %v2335_v0 }
0x111e   :  { %v2159_v56 = vadd.f32 %v2427_v51, %v2084_v6 }
0x1131   :  { %v2460_v55 = vpop.f32.mrb[12].mxu0  ;;  %v2498_v60 = vpop.f32.mrb[12].mxu1 }
0x1132   :  { %v2461_v7 = vpop.f32.mrb[13].mxu0  ;;  %v2499_v49 = vpop.f32.mrb[13].mxu1 }
0x1133   :  { %v2462_v8 = vadd.f32 %v2461_v7, %v2460_v55  ;;  %v2500_v50 = vadd.f32 %v2499_v49, %v2498_v60 }
0x1135   :  { %v2229_v9 = vadd.f32 %v2462_v8, %v2154_v1  ;;  %v2463_v10 = vpop.f32.mrb[14].mxu0  ;;  %v2501_v12 = vpop.f32.mrb[14].mxu1 }
0x1136   :  { %v2464_v13 = vpop.f32.mrb[15].mxu0  ;;  %v2502_v14 = vpop.f32.mrb[15].mxu1 }
0x1137   :  { %v2304_v15 = vadd.f32 %v2500_v50, %v2229_v9  ;;  %v2465_v16 = vadd.f32 %v2464_v13, %v2463_v10  ;;  %v2503_v40 = vadd.f32 %v2502_v14, %v2501_v12 }
0x1139   :  { %2312 = vst [vmem:[#allocation11] sm:$0xff] %v2304_v15  ;;  %v2234_v43 = vadd.f32 %v2465_v16, %v2159_v56 }
0x113b   :  { %v2309_v17 = vadd.f32 %v2503_v40, %v2234_v43 }
0x113d   :  { %2313 = vst [vmem:[#allocation11 + $0x8] sm:$0xff] %v2309_v17 }
0x113e   :  { %2869 = shalt.err (!%p2866_p8)
}
0x113f   :  { %s2870_s23 = scalar_lea.hbm %s3900_s5, 256 }
0x1140   :  { %p2871_p9 = scmp.ne.s32.totalorder %s3900_s5, %s2870_s23  ;;  %p2874_p10 = scmp.lt.u32.totalorder %s2870_s23, %s3900_s5 }
0x1142   :  { %p2876_p11 = pnand %p2874_p10, %p2871_p9 }
0x1144   :  { %2879 = shalt.err (!%p2876_p11)
}
0x1145   :  { %2325 = dma.vmem_to_hbm [thread:$0]  %s2320_s19, 256, %s3900_s5, [#allocation5], %s2892_s1, %s2892_s1, %s2893_s17  }
0x1146   :  { %2886 = dma.done.wait [#allocation5], 256  }
0x1147   :  { %2887 = vsyncadd [#allocation5], 4294967040 }
0x1148   :  { %2329 = vsyncpa [#allocation4], 1 }
0x1149   :  { %2330 = vsyncpa [#allocation7], 1 }
0x114a   :  { %2331 = vsyncpa [#allocation10], 1 }
0x114b   :  { %2332 = vsyncpa [#allocation5], 1 }

</bundles_post_ra>
